<compile_context>
chip_gen: v7x
topology: tpu7x:2x2x1
jax: 0.10.0
libtpu: 0.0.40
codegen_flags: <defaults>
</compile_context>

<pallas_src>
import functools

import jax
import jax.numpy as jnp
from jax.experimental import pallas as pl
from jax.experimental.pallas import tpu as pltpu


def _round_up(v, m):
    return ((v + m - 1) // m) * m


def _vmem_budgets():
    """(input block budget bytes, scoped vmem limit bytes), per-generation."""
    vmem_cap = 64 * 1024 * 1024            # conservative fallback (v7x per-TC)
    try:
        vmem_cap = int(pltpu.get_tpu_info().vmem_capacity_bytes)
    except Exception:
        pass
    vmem_limit = min(vmem_cap // 2, 64 * 1024 * 1024)   # v7x: 32 MiB, v5e/v6e: 64 MiB
    block_budget = max(2 * 1024 * 1024, (vmem_limit - 6 * 1024 * 1024) // 2)
    return block_budget, vmem_limit


def _pick_c_block(C, HW, itemsize, rows, budget_bytes):
    """Largest channel block that divides C, is a multiple of `rows` (or all of
    C), and keeps one input block under ~budget_bytes (double-buffer safe)."""
    if C * HW * itemsize <= budget_bytes:
        return C
    cap = max(rows, (budget_bytes // (HW * itemsize)) // rows * rows)
    blk_start = min(cap, (C // rows) * rows)
    for blk in range(blk_start, rows - 1, -rows):
        if C % blk == 0:
            return blk
    return C


def _spatial_attention_kernel(x_ref, w_ref, b_ref, o_ref,
                              maxs_ref, sums_ref, pad_ref,
                              *, H, W, K, ROWS, TL, HS):
    """Refs:
      x_ref   : (1, C_blk, H*W)  VMEM  lane-dense input block
      w_ref   : (2*K*K,)         SMEM  conv weights (avg plane pre-scaled by 1/C)
      b_ref   : (1,)             SMEM  conv bias
      o_ref   : (1, 1, H, W)     VMEM  output block (written on last C step)
      maxs_ref: (1, H*W)         VMEM  running channel max   (scratch)
      sums_ref: (1, H*W)         VMEM  running channel sum   (scratch)
      pad_ref : (2, Hp, Wp)      VMEM  zero-padded descriptor planes (scratch)
    """
    P = K // 2
    c_idx = pl.program_id(1)
    c_blk = x_ref.shape[1]
    HW = x_ref.shape[2]

    # ---- init running reductions at the first C step of each batch element.
    @pl.when(c_idx == 0)
    def _():
        maxs_ref[...] = jnp.full(maxs_ref.shape, -jnp.inf, jnp.float32)
        sums_ref[...] = jnp.zeros(sums_ref.shape, jnp.float32)

    # ---- fused single-pass max + sum over this channel block.
    # Lane-tiles outer (static), channel chunks inner (fori_loop, partial
    # unroll).  The inner loop is pure elementwise VALU on a small (ROWS, tile)
    # accumulator; the sublane collapse (XLU) runs once per lane-tile.
    n_full, rem = divmod(c_blk, ROWS)
    start = 0
    while start < HW:
        size = min(TL, HW - start)
        tile_max = None
        tile_sum = None
        if n_full > 0:
            def body(i, carry, _start=start, _size=size):
                m, s = carry
                r = pl.multiple_of(i * ROWS, ROWS)
                chunk = x_ref[0, pl.ds(r, ROWS),
                              pl.ds(_start, _size)].astype(jnp.float32)
                return jnp.maximum(m, chunk), s + chunk
            acc0 = (jnp.full((ROWS, size), -jnp.inf, jnp.float32),
                    jnp.zeros((ROWS, size), jnp.float32))
            acc_max, acc_sum = jax.lax.fori_loop(
                0, n_full, body, acc0, unroll=min(8, n_full))
            tile_max = jnp.max(acc_max, axis=0, keepdims=True)
            tile_sum = jnp.sum(acc_sum, axis=0, keepdims=True)
        if rem > 0:
            chunk = x_ref[0, pl.ds(n_full * ROWS, rem),
                          pl.ds(start, size)].astype(jnp.float32)
            cm = jnp.max(chunk, axis=0, keepdims=True)
            cs = jnp.sum(chunk, axis=0, keepdims=True)
            tile_max = cm if tile_max is None else jnp.maximum(tile_max, cm)
            tile_sum = cs if tile_sum is None else tile_sum + cs
        sl = pl.ds(start, size)
        maxs_ref[:, sl] = jnp.maximum(maxs_ref[:, sl], tile_max)
        sums_ref[:, sl] = sums_ref[:, sl] + tile_sum
        start += size

    # ---- finalize on the last C step: pad, KxK conv (VPU), sigmoid, store.
    @pl.when(c_idx == pl.num_programs(1) - 1)
    def _():
        Wp = pad_ref.shape[2]

        # Zero only the halo the conv reads; the interior is fully overwritten
        # below, so this is safe regardless of which core ran previous steps.
        for plane in range(2):
            if P > 0:
                pad_ref[plane, pl.ds(0, P), :] = jnp.zeros((P, Wp), jnp.float32)
                pad_ref[plane, pl.ds(P + H, P), :] = jnp.zeros((P, Wp), jnp.float32)
                pad_ref[plane, pl.ds(P, H), pl.ds(0, P)] = (
                    jnp.zeros((H, P), jnp.float32))
            if Wp - P - W > 0:
                pad_ref[plane, pl.ds(P, H), pl.ds(P + W, Wp - P - W)] = (
                    jnp.zeros((H, Wp - P - W), jnp.float32))

        # Interior rows.  The avg plane stores the raw channel sum — 1/C was
        # folded into the plane-1 conv weights in the wrapper.
        for i in range(H):
            pad_ref[0, pl.ds(P + i, 1), pl.ds(P, W)] = (
                maxs_ref[:, pl.ds(i * W, W)])
            pad_ref[1, pl.ds(P + i, 1), pl.ds(P, W)] = (
                sums_ref[:, pl.ds(i * W, W)])

        # Fully unrolled 2-channel KxK conv, tiled over H strips to bound live
        # vregs: hoist the ki row window once per (plane, ki), take the K lane
        # offsets from static XLU rolls (wrap-around only lands in columns >= W,
        # sliced away below), and round-robin taps over 4 accumulators for ILP.
        for h0 in range(0, H, HS):
            hs = min(HS, H - h0)
            accs = [jnp.zeros((hs, Wp), jnp.float32) for _ in range(4)]
            t = 0
            for plane in range(2):                             # 0: max, 1: avg
                for ki in range(K):
                    row_win = pad_ref[plane, pl.ds(h0 + ki, hs), :]   # (hs, Wp)
                    for kj in range(K):
                        wv = w_ref[plane * K * K + ki * K + kj]
                        if kj == 0:
                            tap = row_win
                        else:
                            # tap[:, j] = row_win[:, (j + kj) % Wp]
                            tap = pltpu.roll(row_win, Wp - kj, 1)
                        accs[t % 4] = accs[t % 4] + wv * tap
                        t += 1
            acc = (accs[0] + accs[1]) + (accs[2] + accs[3]) + b_ref[0]
            out2d = jax.lax.slice(acc, (0, 0), (hs, W))
            o_ref[0, 0, pl.ds(h0, hs), :] = (
                jax.nn.sigmoid(out2d).astype(o_ref.dtype))


def spatial_attention(x, weight, bias, *, kernel_size=7):
    """x: (B, C, H, W); weight: (1, 2, K, K); bias: (1,). Returns (B, 1, H, W)."""
    B, C, H, W = x.shape
    K = kernel_size
    P = K // 2
    HW = H * W
    itemsize = jnp.dtype(x.dtype).itemsize

    # Dtype-dependent chunk rows: a full packed vreg per sublane slice.
    rows = max(8, 8 * (4 // max(1, itemsize)))
    # Lane-tile width for the streaming reduction (bounds register pressure).
    tl = max(128, min(1024, (4096 // rows) // 128 * 128))

    budget, vmem_limit = _vmem_budgets()
    c_blk = _pick_c_block(C, HW, itemsize, rows, budget)
    n_c = C // c_blk

    hp = _round_up(H + 2 * P, 8)                # sublane-padded plane height
    wp = max(128, _round_up(W + 2 * P, 128))    # lane-aligned plane width
    # Conv strip height keeping ~(4 accs + row_win + tap) under ~36 vregs.
    hs = min(H, max(8, ((36 * 1024) // (6 * wp)) // 8 * 8))

    # Lane-dense layout for the heavy channel reduction (W << 128 usually).
    x_flat = x.reshape(B, C, HW)
    # Fold 1/C into the avg-plane weights (plane index 1 of the in_ch axis).
    w_scaled = weight.astype(jnp.float32).at[:, 1].multiply(1.0 / C)
    w_flat = w_scaled.reshape(-1)                         # (2*K*K,) -> SMEM
    b_flat = bias.reshape(-1).astype(jnp.float32)         # (1,)     -> SMEM

    kernel = functools.partial(_spatial_attention_kernel,
                               H=H, W=W, K=K, ROWS=rows, TL=tl, HS=hs)

    cost = pl.CostEstimate(
        flops=int(B * HW * (2 * C + 4 * K * K + 4)),
        transcendentals=int(B * HW),
        bytes_accessed=int(B * (C + 1) * HW * itemsize + (w_flat.size + 1) * 4),
    )

    return pl.pallas_call(
        kernel,
        out_shape=jax.ShapeDtypeStruct((B, 1, H, W), x.dtype),
        grid=(B, n_c),
        in_specs=[
            pl.BlockSpec((1, c_blk, HW), lambda b, c: (b, c, 0)),
            pl.BlockSpec(memory_space=pltpu.MemorySpace.SMEM),
            pl.BlockSpec(memory_space=pltpu.MemorySpace.SMEM),
        ],
        out_specs=pl.BlockSpec((1, 1, H, W), lambda b, c: (b, 0, 0, 0)),
        scratch_shapes=[
            pltpu.VMEM((1, HW), jnp.float32),       # running channel max
            pltpu.VMEM((1, HW), jnp.float32),       # running channel sum
            pltpu.VMEM((2, hp, wp), jnp.float32),   # padded descriptor planes
        ],
        compiler_params=pltpu.CompilerParams(
            dimension_semantics=("parallel", "arbitrary"),
            vmem_limit_bytes=int(vmem_limit)),
        cost_estimate=cost,
    )(x_flat, w_flat, b_flat)


def _reference(x, weight, bias):
    """Pure-JAX reference matching the PyTorch forward."""
    max_x = jnp.max(x, axis=1, keepdims=True)
    avg_x = jnp.mean(x, axis=1, keepdims=True)
    feat = jnp.concatenate([max_x, avg_x], axis=1)           # (B, 2, H, W)
    K = weight.shape[-1]
    y = jax.lax.conv_general_dilated(
        feat, weight, window_strides=(1, 1),
        padding=[(K // 2, K // 2), (K // 2, K // 2)],
        dimension_numbers=("NCHW", "OIHW", "NCHW"),
    ) + bias.reshape(1, 1, 1, 1)
    return jax.nn.sigmoid(y)


if __name__ == "__main__":
    kernel_size = 7
    B, C, H, W = 2, 4, 16, 16

    key = jax.random.PRNGKey(0)
    kx, kw, kb = jax.random.split(key, 3)

    x = jax.random.normal(kx, (B, C, H, W), dtype=jnp.float32)

    # Deterministic Conv2d(2, 1, k, pad=k//2) params (kaiming-uniform-style bound).
    fan_in = 2 * kernel_size * kernel_size
    bound = 1.0 / (fan_in ** 0.5)
    weight = jax.random.uniform(kw, (1, 2, kernel_size, kernel_size),
                                dtype=jnp.float32, minval=-bound, maxval=bound)
    bias = jax.random.uniform(kb, (1,), dtype=jnp.float32, minval=-bound, maxval=bound)

    out = spatial_attention(x, weight, bias, kernel_size=kernel_size)
    out = jax.block_until_ready(out)

    ref = _reference(x, weight, bias)
    assert out.shape == (B, 1, H, W), out.shape
    assert jnp.allclose(out, ref, atol=1e-5, rtol=1e-5), float(jnp.max(jnp.abs(out - ref)))

    print("KERNEL_OK")
</pallas_src>

<mosaic_0001>
module attributes {stable_mosaic.version = 11 : i64} {
  func.func @_spatial_attention_kernel(%arg0: i32, %arg1: i32, %arg2: memref<1x4x256xf32, #tpu.memory_space<vmem>>, %arg3: memref<98xf32, #tpu.memory_space<smem>>, %arg4: memref<1xf32, #tpu.memory_space<smem>>, %arg5: memref<1x1x16x16xf32, #tpu.memory_space<vmem>>, %arg6: memref<1x256xf32, #tpu.memory_space<vmem>>, %arg7: memref<1x256xf32, #tpu.memory_space<vmem>>, %arg8: memref<2x24x128xf32, #tpu.memory_space<vmem>>) attributes {dimension_semantics = [#tpu.dimension_semantics<parallel>, #tpu.dimension_semantics<arbitrary>], iteration_bounds = array<i64: 2, 1>, scalar_prefetch = 0 : i64, scratch_operands = 3 : i64, tpu.core_type = #tpu.core_type<tc>, window_params = [{transform_indices = @transform_0, window_bounds = array<i64: 1, 4, 256>}, {transform_indices = @transform_1, window_bounds = array<i64: 98>}, {transform_indices = @transform_2, window_bounds = array<i64: 1>}, {transform_indices = @transform_3, window_bounds = array<i64: 1, 1, 16, 16>}]} {
    %c0_i32 = arith.constant 0 : i32
    %0 = arith.cmpi eq, %arg1, %c0_i32 : i32
    %1 = arith.extui %0 : i1 to i32
    %c0_i32_0 = arith.constant 0 : i32
    %2 = arith.cmpi ne, %1, %c0_i32_0 : i32
    scf.if %2 {
      %cst_14 = arith.constant 0xFF800000 : f32
      %18 = vector.broadcast %cst_14 : f32 to vector<1x256xf32>
      %c0_15 = arith.constant 0 : index
      %c0_16 = arith.constant 0 : index
      %19 = vector.load %arg6[%c0_15, %c0_16] : memref<1x256xf32, #tpu.memory_space<vmem>>, vector<1x256xf32>
      tpu.vector_store %arg6[%c0_15, %c0_16], %18 {strides = array<i32>} : memref<1x256xf32, #tpu.memory_space<vmem>>, vector<1x256xf32>,
      %cst_17 = arith.constant 0.000000e+00 : f32
      %20 = vector.broadcast %cst_17 : f32 to vector<1x256xf32>
      %c0_18 = arith.constant 0 : index
      %c0_19 = arith.constant 0 : index
      %21 = vector.load %arg7[%c0_18, %c0_19] : memref<1x256xf32, #tpu.memory_space<vmem>>, vector<1x256xf32>
      tpu.vector_store %arg7[%c0_18, %c0_19], %20 {strides = array<i32>} : memref<1x256xf32, #tpu.memory_space<vmem>>, vector<1x256xf32>,
    } else {
    }
    %c0 = arith.constant 0 : index
    %c0_1 = arith.constant 0 : index
    %c0_2 = arith.constant 0 : index
    %3 = vector.load %arg2[%c0, %c0_1, %c0_2] : memref<1x4x256xf32, #tpu.memory_space<vmem>>, vector<1x4x256xf32>
    %4 = vector.shape_cast %3 : vector<1x4x256xf32> to vector<4x256xf32>
    %cst = arith.constant dense<0xFF800000> : vector<256xf32>
    %5 = vector.multi_reduction <maximumf>, %4, %cst [0] : vector<4x256xf32> to vector<256xf32>
    %6 = vector.shape_cast %5 : vector<256xf32> to vector<1x256xf32>
    %cst_3 = arith.constant dense<0.000000e+00> : vector<256xf32>
    %7 = vector.multi_reduction <add>, %4, %cst_3 [0] : vector<4x256xf32> to vector<256xf32>
    %8 = vector.shape_cast %7 : vector<256xf32> to vector<1x256xf32>
    %c0_4 = arith.constant 0 : index
    %c0_5 = arith.constant 0 : index
    %9 = vector.load %arg6[%c0_4, %c0_5] : memref<1x256xf32, #tpu.memory_space<vmem>>, vector<1x256xf32>
    %10 = arith.maximumf %9, %6 : vector<1x256xf32>
    %c0_6 = arith.constant 0 : index
    %c0_7 = arith.constant 0 : index
    %11 = vector.load %arg6[%c0_6, %c0_7] : memref<1x256xf32, #tpu.memory_space<vmem>>, vector<1x256xf32>
    tpu.vector_store %arg6[%c0_6, %c0_7], %10 {strides = array<i32>} : memref<1x256xf32, #tpu.memory_space<vmem>>, vector<1x256xf32>,
    %c0_8 = arith.constant 0 : index
    %c0_9 = arith.constant 0 : index
    %12 = vector.load %arg7[%c0_8, %c0_9] : memref<1x256xf32, #tpu.memory_space<vmem>>, vector<1x256xf32>
    %13 = arith.addf %12, %8 : vector<1x256xf32>
    %c0_10 = arith.constant 0 : index
    %c0_11 = arith.constant 0 : index
    %14 = vector.load %arg7[%c0_10, %c0_11] : memref<1x256xf32, #tpu.memory_space<vmem>>, vector<1x256xf32>
    tpu.vector_store %arg7[%c0_10, %c0_11], %13 {strides = array<i32>} : memref<1x256xf32, #tpu.memory_space<vmem>>, vector<1x256xf32>,
    %c0_i32_12 = arith.constant 0 : i32
    %15 = arith.cmpi eq, %arg1, %c0_i32_12 : i32
    %16 = arith.extui %15 : i1 to i32
    %c0_i32_13 = arith.constant 0 : i32
    %17 = arith.cmpi ne, %16, %c0_i32_13 : i32
    scf.if %17 {
      %cst_14 = arith.constant 0.000000e+00 : f32
      %18 = vector.broadcast %cst_14 : f32 to vector<3x128xf32>
      %c0_15 = arith.constant 0 : index
      %c0_16 = arith.constant 0 : index
      %c0_17 = arith.constant 0 : index
      %19 = vector.load %arg8[%c0_15, %c0_16, %c0_17] : memref<2x24x128xf32, #tpu.memory_space<vmem>>, vector<1x3x128xf32>
      %20 = vector.shape_cast %19 : vector<1x3x128xf32> to vector<3x128xf32>
      %21 = vector.shape_cast %18 : vector<3x128xf32> to vector<1x3x128xf32>
      tpu.vector_store %arg8[%c0_15, %c0_16, %c0_17], %21 {strides = array<i32>} : memref<2x24x128xf32, #tpu.memory_space<vmem>>, vector<1x3x128xf32>,
      %cst_18 = arith.constant 0.000000e+00 : f32
      %22 = vector.broadcast %cst_18 : f32 to vector<3x128xf32>
      %c0_19 = arith.constant 0 : index
      %c19 = arith.constant 19 : index
      %c0_20 = arith.constant 0 : index
      %23 = vector.load %arg8[%c0_19, %c19, %c0_20] : memref<2x24x128xf32, #tpu.memory_space<vmem>>, vector<1x3x128xf32>
      %24 = vector.shape_cast %23 : vector<1x3x128xf32> to vector<3x128xf32>
      %25 = vector.shape_cast %22 : vector<3x128xf32> to vector<1x3x128xf32>
      tpu.vector_store %arg8[%c0_19, %c19, %c0_20], %25 {strides = array<i32>} : memref<2x24x128xf32, #tpu.memory_space<vmem>>, vector<1x3x128xf32>,
      %cst_21 = arith.constant 0.000000e+00 : f32
      %26 = vector.broadcast %cst_21 : f32 to vector<16x3xf32>
      %c0_22 = arith.constant 0 : index
      %c3 = arith.constant 3 : index
      %c0_23 = arith.constant 0 : index
      %27 = vector.load %arg8[%c0_22, %c3, %c0_23] : memref<2x24x128xf32, #tpu.memory_space<vmem>>, vector<1x16x3xf32>
      %28 = vector.shape_cast %27 : vector<1x16x3xf32> to vector<16x3xf32>
      %29 = vector.shape_cast %26 : vector<16x3xf32> to vector<1x16x3xf32>
      tpu.vector_store %arg8[%c0_22, %c3, %c0_23], %29 {strides = array<i32>} : memref<2x24x128xf32, #tpu.memory_space<vmem>>, vector<1x16x3xf32>,
      %cst_24 = arith.constant 0.000000e+00 : f32
      %30 = vector.broadcast %cst_24 : f32 to vector<16x109xf32>
      %c0_25 = arith.constant 0 : index
      %c3_26 = arith.constant 3 : index
      %c19_27 = arith.constant 19 : index
      %31 = vector.load %arg8[%c0_25, %c3_26, %c19_27] : memref<2x24x128xf32, #tpu.memory_space<vmem>>, vector<1x16x109xf32>
      %32 = vector.shape_cast %31 : vector<1x16x109xf32> to vector<16x109xf32>
      %33 = vector.shape_cast %30 : vector<16x109xf32> to vector<1x16x109xf32>
      tpu.vector_store %arg8[%c0_25, %c3_26, %c19_27], %33 {strides = array<i32>} : memref<2x24x128xf32, #tpu.memory_space<vmem>>, vector<1x16x109xf32>,
      %cst_28 = arith.constant 0.000000e+00 : f32
      %34 = vector.broadcast %cst_28 : f32 to vector<3x128xf32>
      %c1 = arith.constant 1 : index
      %c0_29 = arith.constant 0 : index
      %c0_30 = arith.constant 0 : index
      %35 = vector.load %arg8[%c1, %c0_29, %c0_30] : memref<2x24x128xf32, #tpu.memory_space<vmem>>, vector<1x3x128xf32>
      %36 = vector.shape_cast %35 : vector<1x3x128xf32> to vector<3x128xf32>
      %37 = vector.shape_cast %34 : vector<3x128xf32> to vector<1x3x128xf32>
      tpu.vector_store %arg8[%c1, %c0_29, %c0_30], %37 {strides = array<i32>} : memref<2x24x128xf32, #tpu.memory_space<vmem>>, vector<1x3x128xf32>,
      %cst_31 = arith.constant 0.000000e+00 : f32
      %38 = vector.broadcast %cst_31 : f32 to vector<3x128xf32>
      %c1_32 = arith.constant 1 : index
      %c19_33 = arith.constant 19 : index
      %c0_34 = arith.constant 0 : index
      %39 = vector.load %arg8[%c1_32, %c19_33, %c0_34] : memref<2x24x128xf32, #tpu.memory_space<vmem>>, vector<1x3x128xf32>
      %40 = vector.shape_cast %39 : vector<1x3x128xf32> to vector<3x128xf32>
      %41 = vector.shape_cast %38 : vector<3x128xf32> to vector<1x3x128xf32>
      tpu.vector_store %arg8[%c1_32, %c19_33, %c0_34], %41 {strides = array<i32>} : memref<2x24x128xf32, #tpu.memory_space<vmem>>, vector<1x3x128xf32>,
      %cst_35 = arith.constant 0.000000e+00 : f32
      %42 = vector.broadcast %cst_35 : f32 to vector<16x3xf32>
      %c1_36 = arith.constant 1 : index
      %c3_37 = arith.constant 3 : index
      %c0_38 = arith.constant 0 : index
      %43 = vector.load %arg8[%c1_36, %c3_37, %c0_38] : memref<2x24x128xf32, #tpu.memory_space<vmem>>, vector<1x16x3xf32>
      %44 = vector.shape_cast %43 : vector<1x16x3xf32> to vector<16x3xf32>
      %45 = vector.shape_cast %42 : vector<16x3xf32> to vector<1x16x3xf32>
      tpu.vector_store %arg8[%c1_36, %c3_37, %c0_38], %45 {strides = array<i32>} : memref<2x24x128xf32, #tpu.memory_space<vmem>>, vector<1x16x3xf32>,
      %cst_39 = arith.constant 0.000000e+00 : f32
      %46 = vector.broadcast %cst_39 : f32 to vector<16x109xf32>
      %c1_40 = arith.constant 1 : index
      %c3_41 = arith.constant 3 : index
      %c19_42 = arith.constant 19 : index
      %47 = vector.load %arg8[%c1_40, %c3_41, %c19_42] : memref<2x24x128xf32, #tpu.memory_space<vmem>>, vector<1x16x109xf32>
      %48 = vector.shape_cast %47 : vector<1x16x109xf32> to vector<16x109xf32>
      %49 = vector.shape_cast %46 : vector<16x109xf32> to vector<1x16x109xf32>
      tpu.vector_store %arg8[%c1_40, %c3_41, %c19_42], %49 {strides = array<i32>} : memref<2x24x128xf32, #tpu.memory_space<vmem>>, vector<1x16x109xf32>,
      %c0_43 = arith.constant 0 : index
      %c0_44 = arith.constant 0 : index
      %50 = vector.load %arg6[%c0_43, %c0_44] : memref<1x256xf32, #tpu.memory_space<vmem>>, vector<1x16xf32>
      %c0_45 = arith.constant 0 : index
      %c3_46 = arith.constant 3 : index
      %c3_47 = arith.constant 3 : index
      %51 = vector.load %arg8[%c0_45, %c3_46, %c3_47] : memref<2x24x128xf32, #tpu.memory_space<vmem>>, vector<1x1x16xf32>
      %52 = vector.shape_cast %51 : vector<1x1x16xf32> to vector<1x16xf32>
      %53 = vector.shape_cast %50 : vector<1x16xf32> to vector<1x1x16xf32>
      tpu.vector_store %arg8[%c0_45, %c3_46, %c3_47], %53 {strides = array<i32>} : memref<2x24x128xf32, #tpu.memory_space<vmem>>, vector<1x1x16xf32>,
      %c0_48 = arith.constant 0 : index
      %c0_49 = arith.constant 0 : index
      %54 = vector.load %arg7[%c0_48, %c0_49] : memref<1x256xf32, #tpu.memory_space<vmem>>, vector<1x16xf32>
      %c1_50 = arith.constant 1 : index
      %c3_51 = arith.constant 3 : index
      %c3_52 = arith.constant 3 : index
      %55 = vector.load %arg8[%c1_50, %c3_51, %c3_52] : memref<2x24x128xf32, #tpu.memory_space<vmem>>, vector<1x1x16xf32>
      %56 = vector.shape_cast %55 : vector<1x1x16xf32> to vector<1x16xf32>
      %57 = vector.shape_cast %54 : vector<1x16xf32> to vector<1x1x16xf32>
      tpu.vector_store %arg8[%c1_50, %c3_51, %c3_52], %57 {strides = array<i32>} : memref<2x24x128xf32, #tpu.memory_space<vmem>>, vector<1x1x16xf32>,
      %c0_53 = arith.constant 0 : index
      %c16 = arith.constant 16 : index
      %58 = vector.load %arg6[%c0_53, %c16] : memref<1x256xf32, #tpu.memory_space<vmem>>, vector<1x16xf32>
      %c0_54 = arith.constant 0 : index
      %c4 = arith.constant 4 : index
      %c3_55 = arith.constant 3 : index
      %59 = vector.load %arg8[%c0_54, %c4, %c3_55] : memref<2x24x128xf32, #tpu.memory_space<vmem>>, vector<1x1x16xf32>
      %60 = vector.shape_cast %59 : vector<1x1x16xf32> to vector<1x16xf32>
      %61 = vector.shape_cast %58 : vector<1x16xf32> to vector<1x1x16xf32>
      tpu.vector_store %arg8[%c0_54, %c4, %c3_55], %61 {strides = array<i32>} : memref<2x24x128xf32, #tpu.memory_space<vmem>>, vector<1x1x16xf32>,
      %c0_56 = arith.constant 0 : index
      %c16_57 = arith.constant 16 : index
      %62 = vector.load %arg7[%c0_56, %c16_57] : memref<1x256xf32, #tpu.memory_space<vmem>>, vector<1x16xf32>
      %c1_58 = arith.constant 1 : index
      %c4_59 = arith.constant 4 : index
      %c3_60 = arith.constant 3 : index
      %63 = vector.load %arg8[%c1_58, %c4_59, %c3_60] : memref<2x24x128xf32, #tpu.memory_space<vmem>>, vector<1x1x16xf32>
      %64 = vector.shape_cast %63 : vector<1x1x16xf32> to vector<1x16xf32>
      %65 = vector.shape_cast %62 : vector<1x16xf32> to vector<1x1x16xf32>
      tpu.vector_store %arg8[%c1_58, %c4_59, %c3_60], %65 {strides = array<i32>} : memref<2x24x128xf32, #tpu.memory_space<vmem>>, vector<1x1x16xf32>,
      %c0_61 = arith.constant 0 : index
      %c32 = arith.constant 32 : index
      %66 = vector.load %arg6[%c0_61, %c32] : memref<1x256xf32, #tpu.memory_space<vmem>>, vector<1x16xf32>
      %c0_62 = arith.constant 0 : index
      %c5 = arith.constant 5 : index
      %c3_63 = arith.constant 3 : index
      %67 = vector.load %arg8[%c0_62, %c5, %c3_63] : memref<2x24x128xf32, #tpu.memory_space<vmem>>, vector<1x1x16xf32>
      %68 = vector.shape_cast %67 : vector<1x1x16xf32> to vector<1x16xf32>
      %69 = vector.shape_cast %66 : vector<1x16xf32> to vector<1x1x16xf32>
      tpu.vector_store %arg8[%c0_62, %c5, %c3_63], %69 {strides = array<i32>} : memref<2x24x128xf32, #tpu.memory_space<vmem>>, vector<1x1x16xf32>,
      %c0_64 = arith.constant 0 : index
      %c32_65 = arith.constant 32 : index
      %70 = vector.load %arg7[%c0_64, %c32_65] : memref<1x256xf32, #tpu.memory_space<vmem>>, vector<1x16xf32>
      %c1_66 = arith.constant 1 : index
      %c5_67 = arith.constant 5 : index
      %c3_68 = arith.constant 3 : index
      %71 = vector.load %arg8[%c1_66, %c5_67, %c3_68] : memref<2x24x128xf32, #tpu.memory_space<vmem>>, vector<1x1x16xf32>
      %72 = vector.shape_cast %71 : vector<1x1x16xf32> to vector<1x16xf32>
      %73 = vector.shape_cast %70 : vector<1x16xf32> to vector<1x1x16xf32>
      tpu.vector_store %arg8[%c1_66, %c5_67, %c3_68], %73 {strides = array<i32>} : memref<2x24x128xf32, #tpu.memory_space<vmem>>, vector<1x1x16xf32>,
      %c0_69 = arith.constant 0 : index
      %c48 = arith.constant 48 : index
      %74 = vector.load %arg6[%c0_69, %c48] : memref<1x256xf32, #tpu.memory_space<vmem>>, vector<1x16xf32>
      %c0_70 = arith.constant 0 : index
      %c6 = arith.constant 6 : index
      %c3_71 = arith.constant 3 : index
      %75 = vector.load %arg8[%c0_70, %c6, %c3_71] : memref<2x24x128xf32, #tpu.memory_space<vmem>>, vector<1x1x16xf32>
      %76 = vector.shape_cast %75 : vector<1x1x16xf32> to vector<1x16xf32>
      %77 = vector.shape_cast %74 : vector<1x16xf32> to vector<1x1x16xf32>
      tpu.vector_store %arg8[%c0_70, %c6, %c3_71], %77 {strides = array<i32>} : memref<2x24x128xf32, #tpu.memory_space<vmem>>, vector<1x1x16xf32>,
      %c0_72 = arith.constant 0 : index
      %c48_73 = arith.constant 48 : index
      %78 = vector.load %arg7[%c0_72, %c48_73] : memref<1x256xf32, #tpu.memory_space<vmem>>, vector<1x16xf32>
      %c1_74 = arith.constant 1 : index
      %c6_75 = arith.constant 6 : index
      %c3_76 = arith.constant 3 : index
      %79 = vector.load %arg8[%c1_74, %c6_75, %c3_76] : memref<2x24x128xf32, #tpu.memory_space<vmem>>, vector<1x1x16xf32>
      %80 = vector.shape_cast %79 : vector<1x1x16xf32> to vector<1x16xf32>
      %81 = vector.shape_cast %78 : vector<1x16xf32> to vector<1x1x16xf32>
      tpu.vector_store %arg8[%c1_74, %c6_75, %c3_76], %81 {strides = array<i32>} : memref<2x24x128xf32, #tpu.memory_space<vmem>>, vector<1x1x16xf32>,
      %c0_77 = arith.constant 0 : index
      %c64 = arith.constant 64 : index
      %82 = vector.load %arg6[%c0_77, %c64] : memref<1x256xf32, #tpu.memory_space<vmem>>, vector<1x16xf32>
      %c0_78 = arith.constant 0 : index
      %c7 = arith.constant 7 : index
      %c3_79 = arith.constant 3 : index
      %83 = vector.load %arg8[%c0_78, %c7, %c3_79] : memref<2x24x128xf32, #tpu.memory_space<vmem>>, vector<1x1x16xf32>
      %84 = vector.shape_cast %83 : vector<1x1x16xf32> to vector<1x16xf32>
      %85 = vector.shape_cast %82 : vector<1x16xf32> to vector<1x1x16xf32>
      tpu.vector_store %arg8[%c0_78, %c7, %c3_79], %85 {strides = array<i32>} : memref<2x24x128xf32, #tpu.memory_space<vmem>>, vector<1x1x16xf32>,
      %c0_80 = arith.constant 0 : index
      %c64_81 = arith.constant 64 : index
      %86 = vector.load %arg7[%c0_80, %c64_81] : memref<1x256xf32, #tpu.memory_space<vmem>>, vector<1x16xf32>
      %c1_82 = arith.constant 1 : index
      %c7_83 = arith.constant 7 : index
      %c3_84 = arith.constant 3 : index
      %87 = vector.load %arg8[%c1_82, %c7_83, %c3_84] : memref<2x24x128xf32, #tpu.memory_space<vmem>>, vector<1x1x16xf32>
      %88 = vector.shape_cast %87 : vector<1x1x16xf32> to vector<1x16xf32>
      %89 = vector.shape_cast %86 : vector<1x16xf32> to vector<1x1x16xf32>
      tpu.vector_store %arg8[%c1_82, %c7_83, %c3_84], %89 {strides = array<i32>} : memref<2x24x128xf32, #tpu.memory_space<vmem>>, vector<1x1x16xf32>,
      %c0_85 = arith.constant 0 : index
      %c80 = arith.constant 80 : index
      %90 = vector.load %arg6[%c0_85, %c80] : memref<1x256xf32, #tpu.memory_space<vmem>>, vector<1x16xf32>
      %c0_86 = arith.constant 0 : index
      %c8 = arith.constant 8 : index
      %c3_87 = arith.constant 3 : index
      %91 = vector.load %arg8[%c0_86, %c8, %c3_87] : memref<2x24x128xf32, #tpu.memory_space<vmem>>, vector<1x1x16xf32>
      %92 = vector.shape_cast %91 : vector<1x1x16xf32> to vector<1x16xf32>
      %93 = vector.shape_cast %90 : vector<1x16xf32> to vector<1x1x16xf32>
      tpu.vector_store %arg8[%c0_86, %c8, %c3_87], %93 {strides = array<i32>} : memref<2x24x128xf32, #tpu.memory_space<vmem>>, vector<1x1x16xf32>,
      %c0_88 = arith.constant 0 : index
      %c80_89 = arith.constant 80 : index
      %94 = vector.load %arg7[%c0_88, %c80_89] : memref<1x256xf32, #tpu.memory_space<vmem>>, vector<1x16xf32>
      %c1_90 = arith.constant 1 : index
      %c8_91 = arith.constant 8 : index
      %c3_92 = arith.constant 3 : index
      %95 = vector.load %arg8[%c1_90, %c8_91, %c3_92] : memref<2x24x128xf32, #tpu.memory_space<vmem>>, vector<1x1x16xf32>
      %96 = vector.shape_cast %95 : vector<1x1x16xf32> to vector<1x16xf32>
      %97 = vector.shape_cast %94 : vector<1x16xf32> to vector<1x1x16xf32>
      tpu.vector_store %arg8[%c1_90, %c8_91, %c3_92], %97 {strides = array<i32>} : memref<2x24x128xf32, #tpu.memory_space<vmem>>, vector<1x1x16xf32>,
      %c0_93 = arith.constant 0 : index
      %c96 = arith.constant 96 : index
      %98 = vector.load %arg6[%c0_93, %c96] : memref<1x256xf32, #tpu.memory_space<vmem>>, vector<1x16xf32>
      %c0_94 = arith.constant 0 : index
      %c9 = arith.constant 9 : index
      %c3_95 = arith.constant 3 : index
      %99 = vector.load %arg8[%c0_94, %c9, %c3_95] : memref<2x24x128xf32, #tpu.memory_space<vmem>>, vector<1x1x16xf32>
      %100 = vector.shape_cast %99 : vector<1x1x16xf32> to vector<1x16xf32>
      %101 = vector.shape_cast %98 : vector<1x16xf32> to vector<1x1x16xf32>
      tpu.vector_store %arg8[%c0_94, %c9, %c3_95], %101 {strides = array<i32>} : memref<2x24x128xf32, #tpu.memory_space<vmem>>, vector<1x1x16xf32>,
      %c0_96 = arith.constant 0 : index
      %c96_97 = arith.constant 96 : index
      %102 = vector.load %arg7[%c0_96, %c96_97] : memref<1x256xf32, #tpu.memory_space<vmem>>, vector<1x16xf32>
      %c1_98 = arith.constant 1 : index
      %c9_99 = arith.constant 9 : index
      %c3_100 = arith.constant 3 : index
      %103 = vector.load %arg8[%c1_98, %c9_99, %c3_100] : memref<2x24x128xf32, #tpu.memory_space<vmem>>, vector<1x1x16xf32>
      %104 = vector.shape_cast %103 : vector<1x1x16xf32> to vector<1x16xf32>
      %105 = vector.shape_cast %102 : vector<1x16xf32> to vector<1x1x16xf32>
      tpu.vector_store %arg8[%c1_98, %c9_99, %c3_100], %105 {strides = array<i32>} : memref<2x24x128xf32, #tpu.memory_space<vmem>>, vector<1x1x16xf32>,
      %c0_101 = arith.constant 0 : index
      %c112 = arith.constant 112 : index
      %106 = vector.load %arg6[%c0_101, %c112] : memref<1x256xf32, #tpu.memory_space<vmem>>, vector<1x16xf32>
      %c0_102 = arith.constant 0 : index
      %c10 = arith.constant 10 : index
      %c3_103 = arith.constant 3 : index
      %107 = vector.load %arg8[%c0_102, %c10, %c3_103] : memref<2x24x128xf32, #tpu.memory_space<vmem>>, vector<1x1x16xf32>
      %108 = vector.shape_cast %107 : vector<1x1x16xf32> to vector<1x16xf32>
      %109 = vector.shape_cast %106 : vector<1x16xf32> to vector<1x1x16xf32>
      tpu.vector_store %arg8[%c0_102, %c10, %c3_103], %109 {strides = array<i32>} : memref<2x24x128xf32, #tpu.memory_space<vmem>>, vector<1x1x16xf32>,
      %c0_104 = arith.constant 0 : index
      %c112_105 = arith.constant 112 : index
      %110 = vector.load %arg7[%c0_104, %c112_105] : memref<1x256xf32, #tpu.memory_space<vmem>>, vector<1x16xf32>
      %c1_106 = arith.constant 1 : index
      %c10_107 = arith.constant 10 : index
      %c3_108 = arith.constant 3 : index
      %111 = vector.load %arg8[%c1_106, %c10_107, %c3_108] : memref<2x24x128xf32, #tpu.memory_space<vmem>>, vector<1x1x16xf32>
      %112 = vector.shape_cast %111 : vector<1x1x16xf32> to vector<1x16xf32>
      %113 = vector.shape_cast %110 : vector<1x16xf32> to vector<1x1x16xf32>
      tpu.vector_store %arg8[%c1_106, %c10_107, %c3_108], %113 {strides = array<i32>} : memref<2x24x128xf32, #tpu.memory_space<vmem>>, vector<1x1x16xf32>,
      %c0_109 = arith.constant 0 : index
      %c128 = arith.constant 128 : index
      %114 = vector.load %arg6[%c0_109, %c128] : memref<1x256xf32, #tpu.memory_space<vmem>>, vector<1x16xf32>
      %c0_110 = arith.constant 0 : index
      %c11 = arith.constant 11 : index
      %c3_111 = arith.constant 3 : index
      %115 = vector.load %arg8[%c0_110, %c11, %c3_111] : memref<2x24x128xf32, #tpu.memory_space<vmem>>, vector<1x1x16xf32>
      %116 = vector.shape_cast %115 : vector<1x1x16xf32> to vector<1x16xf32>
      %117 = vector.shape_cast %114 : vector<1x16xf32> to vector<1x1x16xf32>
      tpu.vector_store %arg8[%c0_110, %c11, %c3_111], %117 {strides = array<i32>} : memref<2x24x128xf32, #tpu.memory_space<vmem>>, vector<1x1x16xf32>,
      %c0_112 = arith.constant 0 : index
      %c128_113 = arith.constant 128 : index
      %118 = vector.load %arg7[%c0_112, %c128_113] : memref<1x256xf32, #tpu.memory_space<vmem>>, vector<1x16xf32>
      %c1_114 = arith.constant 1 : index
      %c11_115 = arith.constant 11 : index
      %c3_116 = arith.constant 3 : index
      %119 = vector.load %arg8[%c1_114, %c11_115, %c3_116] : memref<2x24x128xf32, #tpu.memory_space<vmem>>, vector<1x1x16xf32>
      %120 = vector.shape_cast %119 : vector<1x1x16xf32> to vector<1x16xf32>
      %121 = vector.shape_cast %118 : vector<1x16xf32> to vector<1x1x16xf32>
      tpu.vector_store %arg8[%c1_114, %c11_115, %c3_116], %121 {strides = array<i32>} : memref<2x24x128xf32, #tpu.memory_space<vmem>>, vector<1x1x16xf32>,
      %c0_117 = arith.constant 0 : index
      %c144 = arith.constant 144 : index
      %122 = vector.load %arg6[%c0_117, %c144] : memref<1x256xf32, #tpu.memory_space<vmem>>, vector<1x16xf32>
      %c0_118 = arith.constant 0 : index
      %c12 = arith.constant 12 : index
      %c3_119 = arith.constant 3 : index
      %123 = vector.load %arg8[%c0_118, %c12, %c3_119] : memref<2x24x128xf32, #tpu.memory_space<vmem>>, vector<1x1x16xf32>
      %124 = vector.shape_cast %123 : vector<1x1x16xf32> to vector<1x16xf32>
      %125 = vector.shape_cast %122 : vector<1x16xf32> to vector<1x1x16xf32>
      tpu.vector_store %arg8[%c0_118, %c12, %c3_119], %125 {strides = array<i32>} : memref<2x24x128xf32, #tpu.memory_space<vmem>>, vector<1x1x16xf32>,
      %c0_120 = arith.constant 0 : index
      %c144_121 = arith.constant 144 : index
      %126 = vector.load %arg7[%c0_120, %c144_121] : memref<1x256xf32, #tpu.memory_space<vmem>>, vector<1x16xf32>
      %c1_122 = arith.constant 1 : index
      %c12_123 = arith.constant 12 : index
      %c3_124 = arith.constant 3 : index
      %127 = vector.load %arg8[%c1_122, %c12_123, %c3_124] : memref<2x24x128xf32, #tpu.memory_space<vmem>>, vector<1x1x16xf32>
      %128 = vector.shape_cast %127 : vector<1x1x16xf32> to vector<1x16xf32>
      %129 = vector.shape_cast %126 : vector<1x16xf32> to vector<1x1x16xf32>
      tpu.vector_store %arg8[%c1_122, %c12_123, %c3_124], %129 {strides = array<i32>} : memref<2x24x128xf32, #tpu.memory_space<vmem>>, vector<1x1x16xf32>,
      %c0_125 = arith.constant 0 : index
      %c160 = arith.constant 160 : index
      %130 = vector.load %arg6[%c0_125, %c160] : memref<1x256xf32, #tpu.memory_space<vmem>>, vector<1x16xf32>
      %c0_126 = arith.constant 0 : index
      %c13 = arith.constant 13 : index
      %c3_127 = arith.constant 3 : index
      %131 = vector.load %arg8[%c0_126, %c13, %c3_127] : memref<2x24x128xf32, #tpu.memory_space<vmem>>, vector<1x1x16xf32>
      %132 = vector.shape_cast %131 : vector<1x1x16xf32> to vector<1x16xf32>
      %133 = vector.shape_cast %130 : vector<1x16xf32> to vector<1x1x16xf32>
      tpu.vector_store %arg8[%c0_126, %c13, %c3_127], %133 {strides = array<i32>} : memref<2x24x128xf32, #tpu.memory_space<vmem>>, vector<1x1x16xf32>,
      %c0_128 = arith.constant 0 : index
      %c160_129 = arith.constant 160 : index
      %134 = vector.load %arg7[%c0_128, %c160_129] : memref<1x256xf32, #tpu.memory_space<vmem>>, vector<1x16xf32>
      %c1_130 = arith.constant 1 : index
      %c13_131 = arith.constant 13 : index
      %c3_132 = arith.constant 3 : index
      %135 = vector.load %arg8[%c1_130, %c13_131, %c3_132] : memref<2x24x128xf32, #tpu.memory_space<vmem>>, vector<1x1x16xf32>
      %136 = vector.shape_cast %135 : vector<1x1x16xf32> to vector<1x16xf32>
      %137 = vector.shape_cast %134 : vector<1x16xf32> to vector<1x1x16xf32>
      tpu.vector_store %arg8[%c1_130, %c13_131, %c3_132], %137 {strides = array<i32>} : memref<2x24x128xf32, #tpu.memory_space<vmem>>, vector<1x1x16xf32>,
      %c0_133 = arith.constant 0 : index
      %c176 = arith.constant 176 : index
      %138 = vector.load %arg6[%c0_133, %c176] : memref<1x256xf32, #tpu.memory_space<vmem>>, vector<1x16xf32>
      %c0_134 = arith.constant 0 : index
      %c14 = arith.constant 14 : index
      %c3_135 = arith.constant 3 : index
      %139 = vector.load %arg8[%c0_134, %c14, %c3_135] : memref<2x24x128xf32, #tpu.memory_space<vmem>>, vector<1x1x16xf32>
      %140 = vector.shape_cast %139 : vector<1x1x16xf32> to vector<1x16xf32>
      %141 = vector.shape_cast %138 : vector<1x16xf32> to vector<1x1x16xf32>
      tpu.vector_store %arg8[%c0_134, %c14, %c3_135], %141 {strides = array<i32>} : memref<2x24x128xf32, #tpu.memory_space<vmem>>, vector<1x1x16xf32>,
      %c0_136 = arith.constant 0 : index
      %c176_137 = arith.constant 176 : index
      %142 = vector.load %arg7[%c0_136, %c176_137] : memref<1x256xf32, #tpu.memory_space<vmem>>, vector<1x16xf32>
      %c1_138 = arith.constant 1 : index
      %c14_139 = arith.constant 14 : index
      %c3_140 = arith.constant 3 : index
      %143 = vector.load %arg8[%c1_138, %c14_139, %c3_140] : memref<2x24x128xf32, #tpu.memory_space<vmem>>, vector<1x1x16xf32>
      %144 = vector.shape_cast %143 : vector<1x1x16xf32> to vector<1x16xf32>
      %145 = vector.shape_cast %142 : vector<1x16xf32> to vector<1x1x16xf32>
      tpu.vector_store %arg8[%c1_138, %c14_139, %c3_140], %145 {strides = array<i32>} : memref<2x24x128xf32, #tpu.memory_space<vmem>>, vector<1x1x16xf32>,
      %c0_141 = arith.constant 0 : index
      %c192 = arith.constant 192 : index
      %146 = vector.load %arg6[%c0_141, %c192] : memref<1x256xf32, #tpu.memory_space<vmem>>, vector<1x16xf32>
      %c0_142 = arith.constant 0 : index
      %c15 = arith.constant 15 : index
      %c3_143 = arith.constant 3 : index
      %147 = vector.load %arg8[%c0_142, %c15, %c3_143] : memref<2x24x128xf32, #tpu.memory_space<vmem>>, vector<1x1x16xf32>
      %148 = vector.shape_cast %147 : vector<1x1x16xf32> to vector<1x16xf32>
      %149 = vector.shape_cast %146 : vector<1x16xf32> to vector<1x1x16xf32>
      tpu.vector_store %arg8[%c0_142, %c15, %c3_143], %149 {strides = array<i32>} : memref<2x24x128xf32, #tpu.memory_space<vmem>>, vector<1x1x16xf32>,
      %c0_144 = arith.constant 0 : index
      %c192_145 = arith.constant 192 : index
      %150 = vector.load %arg7[%c0_144, %c192_145] : memref<1x256xf32, #tpu.memory_space<vmem>>, vector<1x16xf32>
      %c1_146 = arith.constant 1 : index
      %c15_147 = arith.constant 15 : index
      %c3_148 = arith.constant 3 : index
      %151 = vector.load %arg8[%c1_146, %c15_147, %c3_148] : memref<2x24x128xf32, #tpu.memory_space<vmem>>, vector<1x1x16xf32>
      %152 = vector.shape_cast %151 : vector<1x1x16xf32> to vector<1x16xf32>
      %153 = vector.shape_cast %150 : vector<1x16xf32> to vector<1x1x16xf32>
      tpu.vector_store %arg8[%c1_146, %c15_147, %c3_148], %153 {strides = array<i32>} : memref<2x24x128xf32, #tpu.memory_space<vmem>>, vector<1x1x16xf32>,
      %c0_149 = arith.constant 0 : index
      %c208 = arith.constant 208 : index
      %154 = vector.load %arg6[%c0_149, %c208] : memref<1x256xf32, #tpu.memory_space<vmem>>, vector<1x16xf32>
      %c0_150 = arith.constant 0 : index
      %c16_151 = arith.constant 16 : index
      %c3_152 = arith.constant 3 : index
      %155 = vector.load %arg8[%c0_150, %c16_151, %c3_152] : memref<2x24x128xf32, #tpu.memory_space<vmem>>, vector<1x1x16xf32>
      %156 = vector.shape_cast %155 : vector<1x1x16xf32> to vector<1x16xf32>
      %157 = vector.shape_cast %154 : vector<1x16xf32> to vector<1x1x16xf32>
      tpu.vector_store %arg8[%c0_150, %c16_151, %c3_152], %157 {strides = array<i32>} : memref<2x24x128xf32, #tpu.memory_space<vmem>>, vector<1x1x16xf32>,
      %c0_153 = arith.constant 0 : index
      %c208_154 = arith.constant 208 : index
      %158 = vector.load %arg7[%c0_153, %c208_154] : memref<1x256xf32, #tpu.memory_space<vmem>>, vector<1x16xf32>
      %c1_155 = arith.constant 1 : index
      %c16_156 = arith.constant 16 : index
      %c3_157 = arith.constant 3 : index
      %159 = vector.load %arg8[%c1_155, %c16_156, %c3_157] : memref<2x24x128xf32, #tpu.memory_space<vmem>>, vector<1x1x16xf32>
      %160 = vector.shape_cast %159 : vector<1x1x16xf32> to vector<1x16xf32>
      %161 = vector.shape_cast %158 : vector<1x16xf32> to vector<1x1x16xf32>
      tpu.vector_store %arg8[%c1_155, %c16_156, %c3_157], %161 {strides = array<i32>} : memref<2x24x128xf32, #tpu.memory_space<vmem>>, vector<1x1x16xf32>,
      %c0_158 = arith.constant 0 : index
      %c224 = arith.constant 224 : index
      %162 = vector.load %arg6[%c0_158, %c224] : memref<1x256xf32, #tpu.memory_space<vmem>>, vector<1x16xf32>
      %c0_159 = arith.constant 0 : index
      %c17 = arith.constant 17 : index
      %c3_160 = arith.constant 3 : index
      %163 = vector.load %arg8[%c0_159, %c17, %c3_160] : memref<2x24x128xf32, #tpu.memory_space<vmem>>, vector<1x1x16xf32>
      %164 = vector.shape_cast %163 : vector<1x1x16xf32> to vector<1x16xf32>
      %165 = vector.shape_cast %162 : vector<1x16xf32> to vector<1x1x16xf32>
      tpu.vector_store %arg8[%c0_159, %c17, %c3_160], %165 {strides = array<i32>} : memref<2x24x128xf32, #tpu.memory_space<vmem>>, vector<1x1x16xf32>,
      %c0_161 = arith.constant 0 : index
      %c224_162 = arith.constant 224 : index
      %166 = vector.load %arg7[%c0_161, %c224_162] : memref<1x256xf32, #tpu.memory_space<vmem>>, vector<1x16xf32>
      %c1_163 = arith.constant 1 : index
      %c17_164 = arith.constant 17 : index
      %c3_165 = arith.constant 3 : index
      %167 = vector.load %arg8[%c1_163, %c17_164, %c3_165] : memref<2x24x128xf32, #tpu.memory_space<vmem>>, vector<1x1x16xf32>
      %168 = vector.shape_cast %167 : vector<1x1x16xf32> to vector<1x16xf32>
      %169 = vector.shape_cast %166 : vector<1x16xf32> to vector<1x1x16xf32>
      tpu.vector_store %arg8[%c1_163, %c17_164, %c3_165], %169 {strides = array<i32>} : memref<2x24x128xf32, #tpu.memory_space<vmem>>, vector<1x1x16xf32>,
      %c0_166 = arith.constant 0 : index
      %c240 = arith.constant 240 : index
      %170 = vector.load %arg6[%c0_166, %c240] : memref<1x256xf32, #tpu.memory_space<vmem>>, vector<1x16xf32>
      %c0_167 = arith.constant 0 : index
      %c18 = arith.constant 18 : index
      %c3_168 = arith.constant 3 : index
      %171 = vector.load %arg8[%c0_167, %c18, %c3_168] : memref<2x24x128xf32, #tpu.memory_space<vmem>>, vector<1x1x16xf32>
      %172 = vector.shape_cast %171 : vector<1x1x16xf32> to vector<1x16xf32>
      %173 = vector.shape_cast %170 : vector<1x16xf32> to vector<1x1x16xf32>
      tpu.vector_store %arg8[%c0_167, %c18, %c3_168], %173 {strides = array<i32>} : memref<2x24x128xf32, #tpu.memory_space<vmem>>, vector<1x1x16xf32>,
      %c0_169 = arith.constant 0 : index
      %c240_170 = arith.constant 240 : index
      %174 = vector.load %arg7[%c0_169, %c240_170] : memref<1x256xf32, #tpu.memory_space<vmem>>, vector<1x16xf32>
      %c1_171 = arith.constant 1 : index
      %c18_172 = arith.constant 18 : index
      %c3_173 = arith.constant 3 : index
      %175 = vector.load %arg8[%c1_171, %c18_172, %c3_173] : memref<2x24x128xf32, #tpu.memory_space<vmem>>, vector<1x1x16xf32>
      %176 = vector.shape_cast %175 : vector<1x1x16xf32> to vector<1x16xf32>
      %177 = vector.shape_cast %174 : vector<1x16xf32> to vector<1x1x16xf32>
      tpu.vector_store %arg8[%c1_171, %c18_172, %c3_173], %177 {strides = array<i32>} : memref<2x24x128xf32, #tpu.memory_space<vmem>>, vector<1x1x16xf32>,
      %cst_174 = arith.constant 0.000000e+00 : f32
      %178 = vector.broadcast %cst_174 : f32 to vector<16x128xf32>
      %cst_175 = arith.constant 0.000000e+00 : f32
      %179 = vector.broadcast %cst_175 : f32 to vector<16x128xf32>
      %cst_176 = arith.constant 0.000000e+00 : f32
      %180 = vector.broadcast %cst_176 : f32 to vector<16x128xf32>
      %cst_177 = arith.constant 0.000000e+00 : f32
      %181 = vector.broadcast %cst_177 : f32 to vector<16x128xf32>
      %c0_178 = arith.constant 0 : index
      %c0_179 = arith.constant 0 : index
      %c0_180 = arith.constant 0 : index
      %182 = vector.load %arg8[%c0_178, %c0_179, %c0_180] : memref<2x24x128xf32, #tpu.memory_space<vmem>>, vector<1x16x128xf32>
      %183 = vector.shape_cast %182 : vector<1x16x128xf32> to vector<16x128xf32>
      %c0_181 = arith.constant 0 : index
      %184 = memref.load %arg3[%c0_181] : memref<98xf32, #tpu.memory_space<smem>>
      %185 = vector.broadcast %184 : f32 to vector<16x128xf32>
      %186 = arith.mulf %185, %183 : vector<16x128xf32>
      %187 = arith.addf %178, %186 : vector<16x128xf32>
      %c1_182 = arith.constant 1 : index
      %188 = memref.load %arg3[%c1_182] : memref<98xf32, #tpu.memory_space<smem>>
      %c127_i32 = arith.constant 127 : i32
      %189 = tpu.dynamic_rotate %183 by %c127_i32 dim 1 : vector<16x128xf32>, i32 -> vector<16x128xf32>
      %190 = vector.broadcast %188 : f32 to vector<16x128xf32>
      %191 = arith.mulf %190, %189 : vector<16x128xf32>
      %192 = arith.addf %179, %191 : vector<16x128xf32>
      %c2 = arith.constant 2 : index
      %193 = memref.load %arg3[%c2] : memref<98xf32, #tpu.memory_space<smem>>
      %c126_i32 = arith.constant 126 : i32
      %194 = tpu.dynamic_rotate %183 by %c126_i32 dim 1 : vector<16x128xf32>, i32 -> vector<16x128xf32>
      %195 = vector.broadcast %193 : f32 to vector<16x128xf32>
      %196 = arith.mulf %195, %194 : vector<16x128xf32>
      %197 = arith.addf %180, %196 : vector<16x128xf32>
      %c3_183 = arith.constant 3 : index
      %198 = memref.load %arg3[%c3_183] : memref<98xf32, #tpu.memory_space<smem>>
      %c125_i32 = arith.constant 125 : i32
      %199 = tpu.dynamic_rotate %183 by %c125_i32 dim 1 : vector<16x128xf32>, i32 -> vector<16x128xf32>
      %200 = vector.broadcast %198 : f32 to vector<16x128xf32>
      %201 = arith.mulf %200, %199 : vector<16x128xf32>
      %202 = arith.addf %181, %201 : vector<16x128xf32>
      %c4_184 = arith.constant 4 : index
      %203 = memref.load %arg3[%c4_184] : memref<98xf32, #tpu.memory_space<smem>>
      %c124_i32 = arith.constant 124 : i32
      %204 = tpu.dynamic_rotate %183 by %c124_i32 dim 1 : vector<16x128xf32>, i32 -> vector<16x128xf32>
      %205 = vector.broadcast %203 : f32 to vector<16x128xf32>
      %206 = arith.mulf %205, %204 : vector<16x128xf32>
      %207 = arith.addf %187, %206 : vector<16x128xf32>
      %c5_185 = arith.constant 5 : index
      %208 = memref.load %arg3[%c5_185] : memref<98xf32, #tpu.memory_space<smem>>
      %c123_i32 = arith.constant 123 : i32
      %209 = tpu.dynamic_rotate %183 by %c123_i32 dim 1 : vector<16x128xf32>, i32 -> vector<16x128xf32>
      %210 = vector.broadcast %208 : f32 to vector<16x128xf32>
      %211 = arith.mulf %210, %209 : vector<16x128xf32>
      %212 = arith.addf %192, %211 : vector<16x128xf32>
      %c6_186 = arith.constant 6 : index
      %213 = memref.load %arg3[%c6_186] : memref<98xf32, #tpu.memory_space<smem>>
      %c122_i32 = arith.constant 122 : i32
      %214 = tpu.dynamic_rotate %183 by %c122_i32 dim 1 : vector<16x128xf32>, i32 -> vector<16x128xf32>
      %215 = vector.broadcast %213 : f32 to vector<16x128xf32>
      %216 = arith.mulf %215, %214 : vector<16x128xf32>
      %217 = arith.addf %197, %216 : vector<16x128xf32>
      %c0_187 = arith.constant 0 : index
      %c1_188 = arith.constant 1 : index
      %c0_189 = arith.constant 0 : index
      %218 = vector.load %arg8[%c0_187, %c1_188, %c0_189] : memref<2x24x128xf32, #tpu.memory_space<vmem>>, vector<1x16x128xf32>
      %219 = vector.shape_cast %218 : vector<1x16x128xf32> to vector<16x128xf32>
      %c7_190 = arith.constant 7 : index
      %220 = memref.load %arg3[%c7_190] : memref<98xf32, #tpu.memory_space<smem>>
      %221 = vector.broadcast %220 : f32 to vector<16x128xf32>
      %222 = arith.mulf %221, %219 : vector<16x128xf32>
      %223 = arith.addf %202, %222 : vector<16x128xf32>
      %c8_191 = arith.constant 8 : index
      %224 = memref.load %arg3[%c8_191] : memref<98xf32, #tpu.memory_space<smem>>
      %c127_i32_192 = arith.constant 127 : i32
      %225 = tpu.dynamic_rotate %219 by %c127_i32_192 dim 1 : vector<16x128xf32>, i32 -> vector<16x128xf32>
      %226 = vector.broadcast %224 : f32 to vector<16x128xf32>
      %227 = arith.mulf %226, %225 : vector<16x128xf32>
      %228 = arith.addf %207, %227 : vector<16x128xf32>
      %c9_193 = arith.constant 9 : index
      %229 = memref.load %arg3[%c9_193] : memref<98xf32, #tpu.memory_space<smem>>
      %c126_i32_194 = arith.constant 126 : i32
      %230 = tpu.dynamic_rotate %219 by %c126_i32_194 dim 1 : vector<16x128xf32>, i32 -> vector<16x128xf32>
      %231 = vector.broadcast %229 : f32 to vector<16x128xf32>
      %232 = arith.mulf %231, %230 : vector<16x128xf32>
      %233 = arith.addf %212, %232 : vector<16x128xf32>
      %c10_195 = arith.constant 10 : index
      %234 = memref.load %arg3[%c10_195] : memref<98xf32, #tpu.memory_space<smem>>
      %c125_i32_196 = arith.constant 125 : i32
      %235 = tpu.dynamic_rotate %219 by %c125_i32_196 dim 1 : vector<16x128xf32>, i32 -> vector<16x128xf32>
      %236 = vector.broadcast %234 : f32 to vector<16x128xf32>
      %237 = arith.mulf %236, %235 : vector<16x128xf32>
      %238 = arith.addf %217, %237 : vector<16x128xf32>
      %c11_197 = arith.constant 11 : index
      %239 = memref.load %arg3[%c11_197] : memref<98xf32, #tpu.memory_space<smem>>
      %c124_i32_198 = arith.constant 124 : i32
      %240 = tpu.dynamic_rotate %219 by %c124_i32_198 dim 1 : vector<16x128xf32>, i32 -> vector<16x128xf32>
      %241 = vector.broadcast %239 : f32 to vector<16x128xf32>
      %242 = arith.mulf %241, %240 : vector<16x128xf32>
      %243 = arith.addf %223, %242 : vector<16x128xf32>
      %c12_199 = arith.constant 12 : index
      %244 = memref.load %arg3[%c12_199] : memref<98xf32, #tpu.memory_space<smem>>
      %c123_i32_200 = arith.constant 123 : i32
      %245 = tpu.dynamic_rotate %219 by %c123_i32_200 dim 1 : vector<16x128xf32>, i32 -> vector<16x128xf32>
      %246 = vector.broadcast %244 : f32 to vector<16x128xf32>
      %247 = arith.mulf %246, %245 : vector<16x128xf32>
      %248 = arith.addf %228, %247 : vector<16x128xf32>
      %c13_201 = arith.constant 13 : index
      %249 = memref.load %arg3[%c13_201] : memref<98xf32, #tpu.memory_space<smem>>
      %c122_i32_202 = arith.constant 122 : i32
      %250 = tpu.dynamic_rotate %219 by %c122_i32_202 dim 1 : vector<16x128xf32>, i32 -> vector<16x128xf32>
      %251 = vector.broadcast %249 : f32 to vector<16x128xf32>
      %252 = arith.mulf %251, %250 : vector<16x128xf32>
      %253 = arith.addf %233, %252 : vector<16x128xf32>
      %c0_203 = arith.constant 0 : index
      %c2_204 = arith.constant 2 : index
      %c0_205 = arith.constant 0 : index
      %254 = vector.load %arg8[%c0_203, %c2_204, %c0_205] : memref<2x24x128xf32, #tpu.memory_space<vmem>>, vector<1x16x128xf32>
      %255 = vector.shape_cast %254 : vector<1x16x128xf32> to vector<16x128xf32>
      %c14_206 = arith.constant 14 : index
      %256 = memref.load %arg3[%c14_206] : memref<98xf32, #tpu.memory_space<smem>>
      %257 = vector.broadcast %256 : f32 to vector<16x128xf32>
      %258 = arith.mulf %257, %255 : vector<16x128xf32>
      %259 = arith.addf %238, %258 : vector<16x128xf32>
      %c15_207 = arith.constant 15 : index
      %260 = memref.load %arg3[%c15_207] : memref<98xf32, #tpu.memory_space<smem>>
      %c127_i32_208 = arith.constant 127 : i32
      %261 = tpu.dynamic_rotate %255 by %c127_i32_208 dim 1 : vector<16x128xf32>, i32 -> vector<16x128xf32>
      %262 = vector.broadcast %260 : f32 to vector<16x128xf32>
      %263 = arith.mulf %262, %261 : vector<16x128xf32>
      %264 = arith.addf %243, %263 : vector<16x128xf32>
      %c16_209 = arith.constant 16 : index
      %265 = memref.load %arg3[%c16_209] : memref<98xf32, #tpu.memory_space<smem>>
      %c126_i32_210 = arith.constant 126 : i32
      %266 = tpu.dynamic_rotate %255 by %c126_i32_210 dim 1 : vector<16x128xf32>, i32 -> vector<16x128xf32>
      %267 = vector.broadcast %265 : f32 to vector<16x128xf32>
      %268 = arith.mulf %267, %266 : vector<16x128xf32>
      %269 = arith.addf %248, %268 : vector<16x128xf32>
      %c17_211 = arith.constant 17 : index
      %270 = memref.load %arg3[%c17_211] : memref<98xf32, #tpu.memory_space<smem>>
      %c125_i32_212 = arith.constant 125 : i32
      %271 = tpu.dynamic_rotate %255 by %c125_i32_212 dim 1 : vector<16x128xf32>, i32 -> vector<16x128xf32>
      %272 = vector.broadcast %270 : f32 to vector<16x128xf32>
      %273 = arith.mulf %272, %271 : vector<16x128xf32>
      %274 = arith.addf %253, %273 : vector<16x128xf32>
      %c18_213 = arith.constant 18 : index
      %275 = memref.load %arg3[%c18_213] : memref<98xf32, #tpu.memory_space<smem>>
      %c124_i32_214 = arith.constant 124 : i32
      %276 = tpu.dynamic_rotate %255 by %c124_i32_214 dim 1 : vector<16x128xf32>, i32 -> vector<16x128xf32>
      %277 = vector.broadcast %275 : f32 to vector<16x128xf32>
      %278 = arith.mulf %277, %276 : vector<16x128xf32>
      %279 = arith.addf %259, %278 : vector<16x128xf32>
      %c19_215 = arith.constant 19 : index
      %280 = memref.load %arg3[%c19_215] : memref<98xf32, #tpu.memory_space<smem>>
      %c123_i32_216 = arith.constant 123 : i32
      %281 = tpu.dynamic_rotate %255 by %c123_i32_216 dim 1 : vector<16x128xf32>, i32 -> vector<16x128xf32>
      %282 = vector.broadcast %280 : f32 to vector<16x128xf32>
      %283 = arith.mulf %282, %281 : vector<16x128xf32>
      %284 = arith.addf %264, %283 : vector<16x128xf32>
      %c20 = arith.constant 20 : index
      %285 = memref.load %arg3[%c20] : memref<98xf32, #tpu.memory_space<smem>>
      %c122_i32_217 = arith.constant 122 : i32
      %286 = tpu.dynamic_rotate %255 by %c122_i32_217 dim 1 : vector<16x128xf32>, i32 -> vector<16x128xf32>
      %287 = vector.broadcast %285 : f32 to vector<16x128xf32>
      %288 = arith.mulf %287, %286 : vector<16x128xf32>
      %289 = arith.addf %269, %288 : vector<16x128xf32>
      %c0_218 = arith.constant 0 : index
      %c3_219 = arith.constant 3 : index
      %c0_220 = arith.constant 0 : index
      %290 = vector.load %arg8[%c0_218, %c3_219, %c0_220] : memref<2x24x128xf32, #tpu.memory_space<vmem>>, vector<1x16x128xf32>
      %291 = vector.shape_cast %290 : vector<1x16x128xf32> to vector<16x128xf32>
      %c21 = arith.constant 21 : index
      %292 = memref.load %arg3[%c21] : memref<98xf32, #tpu.memory_space<smem>>
      %293 = vector.broadcast %292 : f32 to vector<16x128xf32>
      %294 = arith.mulf %293, %291 : vector<16x128xf32>
      %295 = arith.addf %274, %294 : vector<16x128xf32>
      %c22 = arith.constant 22 : index
      %296 = memref.load %arg3[%c22] : memref<98xf32, #tpu.memory_space<smem>>
      %c127_i32_221 = arith.constant 127 : i32
      %297 = tpu.dynamic_rotate %291 by %c127_i32_221 dim 1 : vector<16x128xf32>, i32 -> vector<16x128xf32>
      %298 = vector.broadcast %296 : f32 to vector<16x128xf32>
      %299 = arith.mulf %298, %297 : vector<16x128xf32>
      %300 = arith.addf %279, %299 : vector<16x128xf32>
      %c23 = arith.constant 23 : index
      %301 = memref.load %arg3[%c23] : memref<98xf32, #tpu.memory_space<smem>>
      %c126_i32_222 = arith.constant 126 : i32
      %302 = tpu.dynamic_rotate %291 by %c126_i32_222 dim 1 : vector<16x128xf32>, i32 -> vector<16x128xf32>
      %303 = vector.broadcast %301 : f32 to vector<16x128xf32>
      %304 = arith.mulf %303, %302 : vector<16x128xf32>
      %305 = arith.addf %284, %304 : vector<16x128xf32>
      %c24 = arith.constant 24 : index
      %306 = memref.load %arg3[%c24] : memref<98xf32, #tpu.memory_space<smem>>
      %c125_i32_223 = arith.constant 125 : i32
      %307 = tpu.dynamic_rotate %291 by %c125_i32_223 dim 1 : vector<16x128xf32>, i32 -> vector<16x128xf32>
      %308 = vector.broadcast %306 : f32 to vector<16x128xf32>
      %309 = arith.mulf %308, %307 : vector<16x128xf32>
      %310 = arith.addf %289, %309 : vector<16x128xf32>
      %c25 = arith.constant 25 : index
      %311 = memref.load %arg3[%c25] : memref<98xf32, #tpu.memory_space<smem>>
      %c124_i32_224 = arith.constant 124 : i32
      %312 = tpu.dynamic_rotate %291 by %c124_i32_224 dim 1 : vector<16x128xf32>, i32 -> vector<16x128xf32>
      %313 = vector.broadcast %311 : f32 to vector<16x128xf32>
      %314 = arith.mulf %313, %312 : vector<16x128xf32>
      %315 = arith.addf %295, %314 : vector<16x128xf32>
      %c26 = arith.constant 26 : index
      %316 = memref.load %arg3[%c26] : memref<98xf32, #tpu.memory_space<smem>>
      %c123_i32_225 = arith.constant 123 : i32
      %317 = tpu.dynamic_rotate %291 by %c123_i32_225 dim 1 : vector<16x128xf32>, i32 -> vector<16x128xf32>
      %318 = vector.broadcast %316 : f32 to vector<16x128xf32>
      %319 = arith.mulf %318, %317 : vector<16x128xf32>
      %320 = arith.addf %300, %319 : vector<16x128xf32>
      %c27 = arith.constant 27 : index
      %321 = memref.load %arg3[%c27] : memref<98xf32, #tpu.memory_space<smem>>
      %c122_i32_226 = arith.constant 122 : i32
      %322 = tpu.dynamic_rotate %291 by %c122_i32_226 dim 1 : vector<16x128xf32>, i32 -> vector<16x128xf32>
      %323 = vector.broadcast %321 : f32 to vector<16x128xf32>
      %324 = arith.mulf %323, %322 : vector<16x128xf32>
      %325 = arith.addf %305, %324 : vector<16x128xf32>
      %c0_227 = arith.constant 0 : index
      %c4_228 = arith.constant 4 : index
      %c0_229 = arith.constant 0 : index
      %326 = vector.load %arg8[%c0_227, %c4_228, %c0_229] : memref<2x24x128xf32, #tpu.memory_space<vmem>>, vector<1x16x128xf32>
      %327 = vector.shape_cast %326 : vector<1x16x128xf32> to vector<16x128xf32>
      %c28 = arith.constant 28 : index
      %328 = memref.load %arg3[%c28] : memref<98xf32, #tpu.memory_space<smem>>
      %329 = vector.broadcast %328 : f32 to vector<16x128xf32>
      %330 = arith.mulf %329, %327 : vector<16x128xf32>
      %331 = arith.addf %310, %330 : vector<16x128xf32>
      %c29 = arith.constant 29 : index
      %332 = memref.load %arg3[%c29] : memref<98xf32, #tpu.memory_space<smem>>
      %c127_i32_230 = arith.constant 127 : i32
      %333 = tpu.dynamic_rotate %327 by %c127_i32_230 dim 1 : vector<16x128xf32>, i32 -> vector<16x128xf32>
      %334 = vector.broadcast %332 : f32 to vector<16x128xf32>
      %335 = arith.mulf %334, %333 : vector<16x128xf32>
      %336 = arith.addf %315, %335 : vector<16x128xf32>
      %c30 = arith.constant 30 : index
      %337 = memref.load %arg3[%c30] : memref<98xf32, #tpu.memory_space<smem>>
      %c126_i32_231 = arith.constant 126 : i32
      %338 = tpu.dynamic_rotate %327 by %c126_i32_231 dim 1 : vector<16x128xf32>, i32 -> vector<16x128xf32>
      %339 = vector.broadcast %337 : f32 to vector<16x128xf32>
      %340 = arith.mulf %339, %338 : vector<16x128xf32>
      %341 = arith.addf %320, %340 : vector<16x128xf32>
      %c31 = arith.constant 31 : index
      %342 = memref.load %arg3[%c31] : memref<98xf32, #tpu.memory_space<smem>>
      %c125_i32_232 = arith.constant 125 : i32
      %343 = tpu.dynamic_rotate %327 by %c125_i32_232 dim 1 : vector<16x128xf32>, i32 -> vector<16x128xf32>
      %344 = vector.broadcast %342 : f32 to vector<16x128xf32>
      %345 = arith.mulf %344, %343 : vector<16x128xf32>
      %346 = arith.addf %325, %345 : vector<16x128xf32>
      %c32_233 = arith.constant 32 : index
      %347 = memref.load %arg3[%c32_233] : memref<98xf32, #tpu.memory_space<smem>>
      %c124_i32_234 = arith.constant 124 : i32
      %348 = tpu.dynamic_rotate %327 by %c124_i32_234 dim 1 : vector<16x128xf32>, i32 -> vector<16x128xf32>
      %349 = vector.broadcast %347 : f32 to vector<16x128xf32>
      %350 = arith.mulf %349, %348 : vector<16x128xf32>
      %351 = arith.addf %331, %350 : vector<16x128xf32>
      %c33 = arith.constant 33 : index
      %352 = memref.load %arg3[%c33] : memref<98xf32, #tpu.memory_space<smem>>
      %c123_i32_235 = arith.constant 123 : i32
      %353 = tpu.dynamic_rotate %327 by %c123_i32_235 dim 1 : vector<16x128xf32>, i32 -> vector<16x128xf32>
      %354 = vector.broadcast %352 : f32 to vector<16x128xf32>
      %355 = arith.mulf %354, %353 : vector<16x128xf32>
      %356 = arith.addf %336, %355 : vector<16x128xf32>
      %c34 = arith.constant 34 : index
      %357 = memref.load %arg3[%c34] : memref<98xf32, #tpu.memory_space<smem>>
      %c122_i32_236 = arith.constant 122 : i32
      %358 = tpu.dynamic_rotate %327 by %c122_i32_236 dim 1 : vector<16x128xf32>, i32 -> vector<16x128xf32>
      %359 = vector.broadcast %357 : f32 to vector<16x128xf32>
      %360 = arith.mulf %359, %358 : vector<16x128xf32>
      %361 = arith.addf %341, %360 : vector<16x128xf32>
      %c0_237 = arith.constant 0 : index
      %c5_238 = arith.constant 5 : index
      %c0_239 = arith.constant 0 : index
      %362 = vector.load %arg8[%c0_237, %c5_238, %c0_239] : memref<2x24x128xf32, #tpu.memory_space<vmem>>, vector<1x16x128xf32>
      %363 = vector.shape_cast %362 : vector<1x16x128xf32> to vector<16x128xf32>
      %c35 = arith.constant 35 : index
      %364 = memref.load %arg3[%c35] : memref<98xf32, #tpu.memory_space<smem>>
      %365 = vector.broadcast %364 : f32 to vector<16x128xf32>
      %366 = arith.mulf %365, %363 : vector<16x128xf32>
      %367 = arith.addf %346, %366 : vector<16x128xf32>
      %c36 = arith.constant 36 : index
      %368 = memref.load %arg3[%c36] : memref<98xf32, #tpu.memory_space<smem>>
      %c127_i32_240 = arith.constant 127 : i32
      %369 = tpu.dynamic_rotate %363 by %c127_i32_240 dim 1 : vector<16x128xf32>, i32 -> vector<16x128xf32>
      %370 = vector.broadcast %368 : f32 to vector<16x128xf32>
      %371 = arith.mulf %370, %369 : vector<16x128xf32>
      %372 = arith.addf %351, %371 : vector<16x128xf32>
      %c37 = arith.constant 37 : index
      %373 = memref.load %arg3[%c37] : memref<98xf32, #tpu.memory_space<smem>>
      %c126_i32_241 = arith.constant 126 : i32
      %374 = tpu.dynamic_rotate %363 by %c126_i32_241 dim 1 : vector<16x128xf32>, i32 -> vector<16x128xf32>
      %375 = vector.broadcast %373 : f32 to vector<16x128xf32>
      %376 = arith.mulf %375, %374 : vector<16x128xf32>
      %377 = arith.addf %356, %376 : vector<16x128xf32>
      %c38 = arith.constant 38 : index
      %378 = memref.load %arg3[%c38] : memref<98xf32, #tpu.memory_space<smem>>
      %c125_i32_242 = arith.constant 125 : i32
      %379 = tpu.dynamic_rotate %363 by %c125_i32_242 dim 1 : vector<16x128xf32>, i32 -> vector<16x128xf32>
      %380 = vector.broadcast %378 : f32 to vector<16x128xf32>
      %381 = arith.mulf %380, %379 : vector<16x128xf32>
      %382 = arith.addf %361, %381 : vector<16x128xf32>
      %c39 = arith.constant 39 : index
      %383 = memref.load %arg3[%c39] : memref<98xf32, #tpu.memory_space<smem>>
      %c124_i32_243 = arith.constant 124 : i32
      %384 = tpu.dynamic_rotate %363 by %c124_i32_243 dim 1 : vector<16x128xf32>, i32 -> vector<16x128xf32>
      %385 = vector.broadcast %383 : f32 to vector<16x128xf32>
      %386 = arith.mulf %385, %384 : vector<16x128xf32>
      %387 = arith.addf %367, %386 : vector<16x128xf32>
      %c40 = arith.constant 40 : index
      %388 = memref.load %arg3[%c40] : memref<98xf32, #tpu.memory_space<smem>>
      %c123_i32_244 = arith.constant 123 : i32
      %389 = tpu.dynamic_rotate %363 by %c123_i32_244 dim 1 : vector<16x128xf32>, i32 -> vector<16x128xf32>
      %390 = vector.broadcast %388 : f32 to vector<16x128xf32>
      %391 = arith.mulf %390, %389 : vector<16x128xf32>
      %392 = arith.addf %372, %391 : vector<16x128xf32>
      %c41 = arith.constant 41 : index
      %393 = memref.load %arg3[%c41] : memref<98xf32, #tpu.memory_space<smem>>
      %c122_i32_245 = arith.constant 122 : i32
      %394 = tpu.dynamic_rotate %363 by %c122_i32_245 dim 1 : vector<16x128xf32>, i32 -> vector<16x128xf32>
      %395 = vector.broadcast %393 : f32 to vector<16x128xf32>
      %396 = arith.mulf %395, %394 : vector<16x128xf32>
      %397 = arith.addf %377, %396 : vector<16x128xf32>
      %c0_246 = arith.constant 0 : index
      %c6_247 = arith.constant 6 : index
      %c0_248 = arith.constant 0 : index
      %398 = vector.load %arg8[%c0_246, %c6_247, %c0_248] : memref<2x24x128xf32, #tpu.memory_space<vmem>>, vector<1x16x128xf32>
      %399 = vector.shape_cast %398 : vector<1x16x128xf32> to vector<16x128xf32>
      %c42 = arith.constant 42 : index
      %400 = memref.load %arg3[%c42] : memref<98xf32, #tpu.memory_space<smem>>
      %401 = vector.broadcast %400 : f32 to vector<16x128xf32>
      %402 = arith.mulf %401, %399 : vector<16x128xf32>
      %403 = arith.addf %382, %402 : vector<16x128xf32>
      %c43 = arith.constant 43 : index
      %404 = memref.load %arg3[%c43] : memref<98xf32, #tpu.memory_space<smem>>
      %c127_i32_249 = arith.constant 127 : i32
      %405 = tpu.dynamic_rotate %399 by %c127_i32_249 dim 1 : vector<16x128xf32>, i32 -> vector<16x128xf32>
      %406 = vector.broadcast %404 : f32 to vector<16x128xf32>
      %407 = arith.mulf %406, %405 : vector<16x128xf32>
      %408 = arith.addf %387, %407 : vector<16x128xf32>
      %c44 = arith.constant 44 : index
      %409 = memref.load %arg3[%c44] : memref<98xf32, #tpu.memory_space<smem>>
      %c126_i32_250 = arith.constant 126 : i32
      %410 = tpu.dynamic_rotate %399 by %c126_i32_250 dim 1 : vector<16x128xf32>, i32 -> vector<16x128xf32>
      %411 = vector.broadcast %409 : f32 to vector<16x128xf32>
      %412 = arith.mulf %411, %410 : vector<16x128xf32>
      %413 = arith.addf %392, %412 : vector<16x128xf32>
      %c45 = arith.constant 45 : index
      %414 = memref.load %arg3[%c45] : memref<98xf32, #tpu.memory_space<smem>>
      %c125_i32_251 = arith.constant 125 : i32
      %415 = tpu.dynamic_rotate %399 by %c125_i32_251 dim 1 : vector<16x128xf32>, i32 -> vector<16x128xf32>
      %416 = vector.broadcast %414 : f32 to vector<16x128xf32>
      %417 = arith.mulf %416, %415 : vector<16x128xf32>
      %418 = arith.addf %397, %417 : vector<16x128xf32>
      %c46 = arith.constant 46 : index
      %419 = memref.load %arg3[%c46] : memref<98xf32, #tpu.memory_space<smem>>
      %c124_i32_252 = arith.constant 124 : i32
      %420 = tpu.dynamic_rotate %399 by %c124_i32_252 dim 1 : vector<16x128xf32>, i32 -> vector<16x128xf32>
      %421 = vector.broadcast %419 : f32 to vector<16x128xf32>
      %422 = arith.mulf %421, %420 : vector<16x128xf32>
      %423 = arith.addf %403, %422 : vector<16x128xf32>
      %c47 = arith.constant 47 : index
      %424 = memref.load %arg3[%c47] : memref<98xf32, #tpu.memory_space<smem>>
      %c123_i32_253 = arith.constant 123 : i32
      %425 = tpu.dynamic_rotate %399 by %c123_i32_253 dim 1 : vector<16x128xf32>, i32 -> vector<16x128xf32>
      %426 = vector.broadcast %424 : f32 to vector<16x128xf32>
      %427 = arith.mulf %426, %425 : vector<16x128xf32>
      %428 = arith.addf %408, %427 : vector<16x128xf32>
      %c48_254 = arith.constant 48 : index
      %429 = memref.load %arg3[%c48_254] : memref<98xf32, #tpu.memory_space<smem>>
      %c122_i32_255 = arith.constant 122 : i32
      %430 = tpu.dynamic_rotate %399 by %c122_i32_255 dim 1 : vector<16x128xf32>, i32 -> vector<16x128xf32>
      %431 = vector.broadcast %429 : f32 to vector<16x128xf32>
      %432 = arith.mulf %431, %430 : vector<16x128xf32>
      %433 = arith.addf %413, %432 : vector<16x128xf32>
      %c1_256 = arith.constant 1 : index
      %c0_257 = arith.constant 0 : index
      %c0_258 = arith.constant 0 : index
      %434 = vector.load %arg8[%c1_256, %c0_257, %c0_258] : memref<2x24x128xf32, #tpu.memory_space<vmem>>, vector<1x16x128xf32>
      %435 = vector.shape_cast %434 : vector<1x16x128xf32> to vector<16x128xf32>
      %c49 = arith.constant 49 : index
      %436 = memref.load %arg3[%c49] : memref<98xf32, #tpu.memory_space<smem>>
      %437 = vector.broadcast %436 : f32 to vector<16x128xf32>
      %438 = arith.mulf %437, %435 : vector<16x128xf32>
      %439 = arith.addf %418, %438 : vector<16x128xf32>
      %c50 = arith.constant 50 : index
      %440 = memref.load %arg3[%c50] : memref<98xf32, #tpu.memory_space<smem>>
      %c127_i32_259 = arith.constant 127 : i32
      %441 = tpu.dynamic_rotate %435 by %c127_i32_259 dim 1 : vector<16x128xf32>, i32 -> vector<16x128xf32>
      %442 = vector.broadcast %440 : f32 to vector<16x128xf32>
      %443 = arith.mulf %442, %441 : vector<16x128xf32>
      %444 = arith.addf %423, %443 : vector<16x128xf32>
      %c51 = arith.constant 51 : index
      %445 = memref.load %arg3[%c51] : memref<98xf32, #tpu.memory_space<smem>>
      %c126_i32_260 = arith.constant 126 : i32
      %446 = tpu.dynamic_rotate %435 by %c126_i32_260 dim 1 : vector<16x128xf32>, i32 -> vector<16x128xf32>
      %447 = vector.broadcast %445 : f32 to vector<16x128xf32>
      %448 = arith.mulf %447, %446 : vector<16x128xf32>
      %449 = arith.addf %428, %448 : vector<16x128xf32>
      %c52 = arith.constant 52 : index
      %450 = memref.load %arg3[%c52] : memref<98xf32, #tpu.memory_space<smem>>
      %c125_i32_261 = arith.constant 125 : i32
      %451 = tpu.dynamic_rotate %435 by %c125_i32_261 dim 1 : vector<16x128xf32>, i32 -> vector<16x128xf32>
      %452 = vector.broadcast %450 : f32 to vector<16x128xf32>
      %453 = arith.mulf %452, %451 : vector<16x128xf32>
      %454 = arith.addf %433, %453 : vector<16x128xf32>
      %c53 = arith.constant 53 : index
      %455 = memref.load %arg3[%c53] : memref<98xf32, #tpu.memory_space<smem>>
      %c124_i32_262 = arith.constant 124 : i32
      %456 = tpu.dynamic_rotate %435 by %c124_i32_262 dim 1 : vector<16x128xf32>, i32 -> vector<16x128xf32>
      %457 = vector.broadcast %455 : f32 to vector<16x128xf32>
      %458 = arith.mulf %457, %456 : vector<16x128xf32>
      %459 = arith.addf %439, %458 : vector<16x128xf32>
      %c54 = arith.constant 54 : index
      %460 = memref.load %arg3[%c54] : memref<98xf32, #tpu.memory_space<smem>>
      %c123_i32_263 = arith.constant 123 : i32
      %461 = tpu.dynamic_rotate %435 by %c123_i32_263 dim 1 : vector<16x128xf32>, i32 -> vector<16x128xf32>
      %462 = vector.broadcast %460 : f32 to vector<16x128xf32>
      %463 = arith.mulf %462, %461 : vector<16x128xf32>
      %464 = arith.addf %444, %463 : vector<16x128xf32>
      %c55 = arith.constant 55 : index
      %465 = memref.load %arg3[%c55] : memref<98xf32, #tpu.memory_space<smem>>
      %c122_i32_264 = arith.constant 122 : i32
      %466 = tpu.dynamic_rotate %435 by %c122_i32_264 dim 1 : vector<16x128xf32>, i32 -> vector<16x128xf32>
      %467 = vector.broadcast %465 : f32 to vector<16x128xf32>
      %468 = arith.mulf %467, %466 : vector<16x128xf32>
      %469 = arith.addf %449, %468 : vector<16x128xf32>
      %c1_265 = arith.constant 1 : index
      %c1_266 = arith.constant 1 : index
      %c0_267 = arith.constant 0 : index
      %470 = vector.load %arg8[%c1_265, %c1_266, %c0_267] : memref<2x24x128xf32, #tpu.memory_space<vmem>>, vector<1x16x128xf32>
      %471 = vector.shape_cast %470 : vector<1x16x128xf32> to vector<16x128xf32>
      %c56 = arith.constant 56 : index
      %472 = memref.load %arg3[%c56] : memref<98xf32, #tpu.memory_space<smem>>
      %473 = vector.broadcast %472 : f32 to vector<16x128xf32>
      %474 = arith.mulf %473, %471 : vector<16x128xf32>
      %475 = arith.addf %454, %474 : vector<16x128xf32>
      %c57 = arith.constant 57 : index
      %476 = memref.load %arg3[%c57] : memref<98xf32, #tpu.memory_space<smem>>
      %c127_i32_268 = arith.constant 127 : i32
      %477 = tpu.dynamic_rotate %471 by %c127_i32_268 dim 1 : vector<16x128xf32>, i32 -> vector<16x128xf32>
      %478 = vector.broadcast %476 : f32 to vector<16x128xf32>
      %479 = arith.mulf %478, %477 : vector<16x128xf32>
      %480 = arith.addf %459, %479 : vector<16x128xf32>
      %c58 = arith.constant 58 : index
      %481 = memref.load %arg3[%c58] : memref<98xf32, #tpu.memory_space<smem>>
      %c126_i32_269 = arith.constant 126 : i32
      %482 = tpu.dynamic_rotate %471 by %c126_i32_269 dim 1 : vector<16x128xf32>, i32 -> vector<16x128xf32>
      %483 = vector.broadcast %481 : f32 to vector<16x128xf32>
      %484 = arith.mulf %483, %482 : vector<16x128xf32>
      %485 = arith.addf %464, %484 : vector<16x128xf32>
      %c59 = arith.constant 59 : index
      %486 = memref.load %arg3[%c59] : memref<98xf32, #tpu.memory_space<smem>>
      %c125_i32_270 = arith.constant 125 : i32
      %487 = tpu.dynamic_rotate %471 by %c125_i32_270 dim 1 : vector<16x128xf32>, i32 -> vector<16x128xf32>
      %488 = vector.broadcast %486 : f32 to vector<16x128xf32>
      %489 = arith.mulf %488, %487 : vector<16x128xf32>
      %490 = arith.addf %469, %489 : vector<16x128xf32>
      %c60 = arith.constant 60 : index
      %491 = memref.load %arg3[%c60] : memref<98xf32, #tpu.memory_space<smem>>
      %c124_i32_271 = arith.constant 124 : i32
      %492 = tpu.dynamic_rotate %471 by %c124_i32_271 dim 1 : vector<16x128xf32>, i32 -> vector<16x128xf32>
      %493 = vector.broadcast %491 : f32 to vector<16x128xf32>
      %494 = arith.mulf %493, %492 : vector<16x128xf32>
      %495 = arith.addf %475, %494 : vector<16x128xf32>
      %c61 = arith.constant 61 : index
      %496 = memref.load %arg3[%c61] : memref<98xf32, #tpu.memory_space<smem>>
      %c123_i32_272 = arith.constant 123 : i32
      %497 = tpu.dynamic_rotate %471 by %c123_i32_272 dim 1 : vector<16x128xf32>, i32 -> vector<16x128xf32>
      %498 = vector.broadcast %496 : f32 to vector<16x128xf32>
      %499 = arith.mulf %498, %497 : vector<16x128xf32>
      %500 = arith.addf %480, %499 : vector<16x128xf32>
      %c62 = arith.constant 62 : index
      %501 = memref.load %arg3[%c62] : memref<98xf32, #tpu.memory_space<smem>>
      %c122_i32_273 = arith.constant 122 : i32
      %502 = tpu.dynamic_rotate %471 by %c122_i32_273 dim 1 : vector<16x128xf32>, i32 -> vector<16x128xf32>
      %503 = vector.broadcast %501 : f32 to vector<16x128xf32>
      %504 = arith.mulf %503, %502 : vector<16x128xf32>
      %505 = arith.addf %485, %504 : vector<16x128xf32>
      %c1_274 = arith.constant 1 : index
      %c2_275 = arith.constant 2 : index
      %c0_276 = arith.constant 0 : index
      %506 = vector.load %arg8[%c1_274, %c2_275, %c0_276] : memref<2x24x128xf32, #tpu.memory_space<vmem>>, vector<1x16x128xf32>
      %507 = vector.shape_cast %506 : vector<1x16x128xf32> to vector<16x128xf32>
      %c63 = arith.constant 63 : index
      %508 = memref.load %arg3[%c63] : memref<98xf32, #tpu.memory_space<smem>>
      %509 = vector.broadcast %508 : f32 to vector<16x128xf32>
      %510 = arith.mulf %509, %507 : vector<16x128xf32>
      %511 = arith.addf %490, %510 : vector<16x128xf32>
      %c64_277 = arith.constant 64 : index
      %512 = memref.load %arg3[%c64_277] : memref<98xf32, #tpu.memory_space<smem>>
      %c127_i32_278 = arith.constant 127 : i32
      %513 = tpu.dynamic_rotate %507 by %c127_i32_278 dim 1 : vector<16x128xf32>, i32 -> vector<16x128xf32>
      %514 = vector.broadcast %512 : f32 to vector<16x128xf32>
      %515 = arith.mulf %514, %513 : vector<16x128xf32>
      %516 = arith.addf %495, %515 : vector<16x128xf32>
      %c65 = arith.constant 65 : index
      %517 = memref.load %arg3[%c65] : memref<98xf32, #tpu.memory_space<smem>>
      %c126_i32_279 = arith.constant 126 : i32
      %518 = tpu.dynamic_rotate %507 by %c126_i32_279 dim 1 : vector<16x128xf32>, i32 -> vector<16x128xf32>
      %519 = vector.broadcast %517 : f32 to vector<16x128xf32>
      %520 = arith.mulf %519, %518 : vector<16x128xf32>
      %521 = arith.addf %500, %520 : vector<16x128xf32>
      %c66 = arith.constant 66 : index
      %522 = memref.load %arg3[%c66] : memref<98xf32, #tpu.memory_space<smem>>
      %c125_i32_280 = arith.constant 125 : i32
      %523 = tpu.dynamic_rotate %507 by %c125_i32_280 dim 1 : vector<16x128xf32>, i32 -> vector<16x128xf32>
      %524 = vector.broadcast %522 : f32 to vector<16x128xf32>
      %525 = arith.mulf %524, %523 : vector<16x128xf32>
      %526 = arith.addf %505, %525 : vector<16x128xf32>
      %c67 = arith.constant 67 : index
      %527 = memref.load %arg3[%c67] : memref<98xf32, #tpu.memory_space<smem>>
      %c124_i32_281 = arith.constant 124 : i32
      %528 = tpu.dynamic_rotate %507 by %c124_i32_281 dim 1 : vector<16x128xf32>, i32 -> vector<16x128xf32>
      %529 = vector.broadcast %527 : f32 to vector<16x128xf32>
      %530 = arith.mulf %529, %528 : vector<16x128xf32>
      %531 = arith.addf %511, %530 : vector<16x128xf32>
      %c68 = arith.constant 68 : index
      %532 = memref.load %arg3[%c68] : memref<98xf32, #tpu.memory_space<smem>>
      %c123_i32_282 = arith.constant 123 : i32
      %533 = tpu.dynamic_rotate %507 by %c123_i32_282 dim 1 : vector<16x128xf32>, i32 -> vector<16x128xf32>
      %534 = vector.broadcast %532 : f32 to vector<16x128xf32>
      %535 = arith.mulf %534, %533 : vector<16x128xf32>
      %536 = arith.addf %516, %535 : vector<16x128xf32>
      %c69 = arith.constant 69 : index
      %537 = memref.load %arg3[%c69] : memref<98xf32, #tpu.memory_space<smem>>
      %c122_i32_283 = arith.constant 122 : i32
      %538 = tpu.dynamic_rotate %507 by %c122_i32_283 dim 1 : vector<16x128xf32>, i32 -> vector<16x128xf32>
      %539 = vector.broadcast %537 : f32 to vector<16x128xf32>
      %540 = arith.mulf %539, %538 : vector<16x128xf32>
      %541 = arith.addf %521, %540 : vector<16x128xf32>
      %c1_284 = arith.constant 1 : index
      %c3_285 = arith.constant 3 : index
      %c0_286 = arith.constant 0 : index
      %542 = vector.load %arg8[%c1_284, %c3_285, %c0_286] : memref<2x24x128xf32, #tpu.memory_space<vmem>>, vector<1x16x128xf32>
      %543 = vector.shape_cast %542 : vector<1x16x128xf32> to vector<16x128xf32>
      %c70 = arith.constant 70 : index
      %544 = memref.load %arg3[%c70] : memref<98xf32, #tpu.memory_space<smem>>
      %545 = vector.broadcast %544 : f32 to vector<16x128xf32>
      %546 = arith.mulf %545, %543 : vector<16x128xf32>
      %547 = arith.addf %526, %546 : vector<16x128xf32>
      %c71 = arith.constant 71 : index
      %548 = memref.load %arg3[%c71] : memref<98xf32, #tpu.memory_space<smem>>
      %c127_i32_287 = arith.constant 127 : i32
      %549 = tpu.dynamic_rotate %543 by %c127_i32_287 dim 1 : vector<16x128xf32>, i32 -> vector<16x128xf32>
      %550 = vector.broadcast %548 : f32 to vector<16x128xf32>
      %551 = arith.mulf %550, %549 : vector<16x128xf32>
      %552 = arith.addf %531, %551 : vector<16x128xf32>
      %c72 = arith.constant 72 : index
      %553 = memref.load %arg3[%c72] : memref<98xf32, #tpu.memory_space<smem>>
      %c126_i32_288 = arith.constant 126 : i32
      %554 = tpu.dynamic_rotate %543 by %c126_i32_288 dim 1 : vector<16x128xf32>, i32 -> vector<16x128xf32>
      %555 = vector.broadcast %553 : f32 to vector<16x128xf32>
      %556 = arith.mulf %555, %554 : vector<16x128xf32>
      %557 = arith.addf %536, %556 : vector<16x128xf32>
      %c73 = arith.constant 73 : index
      %558 = memref.load %arg3[%c73] : memref<98xf32, #tpu.memory_space<smem>>
      %c125_i32_289 = arith.constant 125 : i32
      %559 = tpu.dynamic_rotate %543 by %c125_i32_289 dim 1 : vector<16x128xf32>, i32 -> vector<16x128xf32>
      %560 = vector.broadcast %558 : f32 to vector<16x128xf32>
      %561 = arith.mulf %560, %559 : vector<16x128xf32>
      %562 = arith.addf %541, %561 : vector<16x128xf32>
      %c74 = arith.constant 74 : index
      %563 = memref.load %arg3[%c74] : memref<98xf32, #tpu.memory_space<smem>>
      %c124_i32_290 = arith.constant 124 : i32
      %564 = tpu.dynamic_rotate %543 by %c124_i32_290 dim 1 : vector<16x128xf32>, i32 -> vector<16x128xf32>
      %565 = vector.broadcast %563 : f32 to vector<16x128xf32>
      %566 = arith.mulf %565, %564 : vector<16x128xf32>
      %567 = arith.addf %547, %566 : vector<16x128xf32>
      %c75 = arith.constant 75 : index
      %568 = memref.load %arg3[%c75] : memref<98xf32, #tpu.memory_space<smem>>
      %c123_i32_291 = arith.constant 123 : i32
      %569 = tpu.dynamic_rotate %543 by %c123_i32_291 dim 1 : vector<16x128xf32>, i32 -> vector<16x128xf32>
      %570 = vector.broadcast %568 : f32 to vector<16x128xf32>
      %571 = arith.mulf %570, %569 : vector<16x128xf32>
      %572 = arith.addf %552, %571 : vector<16x128xf32>
      %c76 = arith.constant 76 : index
      %573 = memref.load %arg3[%c76] : memref<98xf32, #tpu.memory_space<smem>>
      %c122_i32_292 = arith.constant 122 : i32
      %574 = tpu.dynamic_rotate %543 by %c122_i32_292 dim 1 : vector<16x128xf32>, i32 -> vector<16x128xf32>
      %575 = vector.broadcast %573 : f32 to vector<16x128xf32>
      %576 = arith.mulf %575, %574 : vector<16x128xf32>
      %577 = arith.addf %557, %576 : vector<16x128xf32>
      %c1_293 = arith.constant 1 : index
      %c4_294 = arith.constant 4 : index
      %c0_295 = arith.constant 0 : index
      %578 = vector.load %arg8[%c1_293, %c4_294, %c0_295] : memref<2x24x128xf32, #tpu.memory_space<vmem>>, vector<1x16x128xf32>
      %579 = vector.shape_cast %578 : vector<1x16x128xf32> to vector<16x128xf32>
      %c77 = arith.constant 77 : index
      %580 = memref.load %arg3[%c77] : memref<98xf32, #tpu.memory_space<smem>>
      %581 = vector.broadcast %580 : f32 to vector<16x128xf32>
      %582 = arith.mulf %581, %579 : vector<16x128xf32>
      %583 = arith.addf %562, %582 : vector<16x128xf32>
      %c78 = arith.constant 78 : index
      %584 = memref.load %arg3[%c78] : memref<98xf32, #tpu.memory_space<smem>>
      %c127_i32_296 = arith.constant 127 : i32
      %585 = tpu.dynamic_rotate %579 by %c127_i32_296 dim 1 : vector<16x128xf32>, i32 -> vector<16x128xf32>
      %586 = vector.broadcast %584 : f32 to vector<16x128xf32>
      %587 = arith.mulf %586, %585 : vector<16x128xf32>
      %588 = arith.addf %567, %587 : vector<16x128xf32>
      %c79 = arith.constant 79 : index
      %589 = memref.load %arg3[%c79] : memref<98xf32, #tpu.memory_space<smem>>
      %c126_i32_297 = arith.constant 126 : i32
      %590 = tpu.dynamic_rotate %579 by %c126_i32_297 dim 1 : vector<16x128xf32>, i32 -> vector<16x128xf32>
      %591 = vector.broadcast %589 : f32 to vector<16x128xf32>
      %592 = arith.mulf %591, %590 : vector<16x128xf32>
      %593 = arith.addf %572, %592 : vector<16x128xf32>
      %c80_298 = arith.constant 80 : index
      %594 = memref.load %arg3[%c80_298] : memref<98xf32, #tpu.memory_space<smem>>
      %c125_i32_299 = arith.constant 125 : i32
      %595 = tpu.dynamic_rotate %579 by %c125_i32_299 dim 1 : vector<16x128xf32>, i32 -> vector<16x128xf32>
      %596 = vector.broadcast %594 : f32 to vector<16x128xf32>
      %597 = arith.mulf %596, %595 : vector<16x128xf32>
      %598 = arith.addf %577, %597 : vector<16x128xf32>
      %c81 = arith.constant 81 : index
      %599 = memref.load %arg3[%c81] : memref<98xf32, #tpu.memory_space<smem>>
      %c124_i32_300 = arith.constant 124 : i32
      %600 = tpu.dynamic_rotate %579 by %c124_i32_300 dim 1 : vector<16x128xf32>, i32 -> vector<16x128xf32>
      %601 = vector.broadcast %599 : f32 to vector<16x128xf32>
      %602 = arith.mulf %601, %600 : vector<16x128xf32>
      %603 = arith.addf %583, %602 : vector<16x128xf32>
      %c82 = arith.constant 82 : index
      %604 = memref.load %arg3[%c82] : memref<98xf32, #tpu.memory_space<smem>>
      %c123_i32_301 = arith.constant 123 : i32
      %605 = tpu.dynamic_rotate %579 by %c123_i32_301 dim 1 : vector<16x128xf32>, i32 -> vector<16x128xf32>
      %606 = vector.broadcast %604 : f32 to vector<16x128xf32>
      %607 = arith.mulf %606, %605 : vector<16x128xf32>
      %608 = arith.addf %588, %607 : vector<16x128xf32>
      %c83 = arith.constant 83 : index
      %609 = memref.load %arg3[%c83] : memref<98xf32, #tpu.memory_space<smem>>
      %c122_i32_302 = arith.constant 122 : i32
      %610 = tpu.dynamic_rotate %579 by %c122_i32_302 dim 1 : vector<16x128xf32>, i32 -> vector<16x128xf32>
      %611 = vector.broadcast %609 : f32 to vector<16x128xf32>
      %612 = arith.mulf %611, %610 : vector<16x128xf32>
      %613 = arith.addf %593, %612 : vector<16x128xf32>
      %c1_303 = arith.constant 1 : index
      %c5_304 = arith.constant 5 : index
      %c0_305 = arith.constant 0 : index
      %614 = vector.load %arg8[%c1_303, %c5_304, %c0_305] : memref<2x24x128xf32, #tpu.memory_space<vmem>>, vector<1x16x128xf32>
      %615 = vector.shape_cast %614 : vector<1x16x128xf32> to vector<16x128xf32>
      %c84 = arith.constant 84 : index
      %616 = memref.load %arg3[%c84] : memref<98xf32, #tpu.memory_space<smem>>
      %617 = vector.broadcast %616 : f32 to vector<16x128xf32>
      %618 = arith.mulf %617, %615 : vector<16x128xf32>
      %619 = arith.addf %598, %618 : vector<16x128xf32>
      %c85 = arith.constant 85 : index
      %620 = memref.load %arg3[%c85] : memref<98xf32, #tpu.memory_space<smem>>
      %c127_i32_306 = arith.constant 127 : i32
      %621 = tpu.dynamic_rotate %615 by %c127_i32_306 dim 1 : vector<16x128xf32>, i32 -> vector<16x128xf32>
      %622 = vector.broadcast %620 : f32 to vector<16x128xf32>
      %623 = arith.mulf %622, %621 : vector<16x128xf32>
      %624 = arith.addf %603, %623 : vector<16x128xf32>
      %c86 = arith.constant 86 : index
      %625 = memref.load %arg3[%c86] : memref<98xf32, #tpu.memory_space<smem>>
      %c126_i32_307 = arith.constant 126 : i32
      %626 = tpu.dynamic_rotate %615 by %c126_i32_307 dim 1 : vector<16x128xf32>, i32 -> vector<16x128xf32>
      %627 = vector.broadcast %625 : f32 to vector<16x128xf32>
      %628 = arith.mulf %627, %626 : vector<16x128xf32>
      %629 = arith.addf %608, %628 : vector<16x128xf32>
      %c87 = arith.constant 87 : index
      %630 = memref.load %arg3[%c87] : memref<98xf32, #tpu.memory_space<smem>>
      %c125_i32_308 = arith.constant 125 : i32
      %631 = tpu.dynamic_rotate %615 by %c125_i32_308 dim 1 : vector<16x128xf32>, i32 -> vector<16x128xf32>
      %632 = vector.broadcast %630 : f32 to vector<16x128xf32>
      %633 = arith.mulf %632, %631 : vector<16x128xf32>
      %634 = arith.addf %613, %633 : vector<16x128xf32>
      %c88 = arith.constant 88 : index
      %635 = memref.load %arg3[%c88] : memref<98xf32, #tpu.memory_space<smem>>
      %c124_i32_309 = arith.constant 124 : i32
      %636 = tpu.dynamic_rotate %615 by %c124_i32_309 dim 1 : vector<16x128xf32>, i32 -> vector<16x128xf32>
      %637 = vector.broadcast %635 : f32 to vector<16x128xf32>
      %638 = arith.mulf %637, %636 : vector<16x128xf32>
      %639 = arith.addf %619, %638 : vector<16x128xf32>
      %c89 = arith.constant 89 : index
      %640 = memref.load %arg3[%c89] : memref<98xf32, #tpu.memory_space<smem>>
      %c123_i32_310 = arith.constant 123 : i32
      %641 = tpu.dynamic_rotate %615 by %c123_i32_310 dim 1 : vector<16x128xf32>, i32 -> vector<16x128xf32>
      %642 = vector.broadcast %640 : f32 to vector<16x128xf32>
      %643 = arith.mulf %642, %641 : vector<16x128xf32>
      %644 = arith.addf %624, %643 : vector<16x128xf32>
      %c90 = arith.constant 90 : index
      %645 = memref.load %arg3[%c90] : memref<98xf32, #tpu.memory_space<smem>>
      %c122_i32_311 = arith.constant 122 : i32
      %646 = tpu.dynamic_rotate %615 by %c122_i32_311 dim 1 : vector<16x128xf32>, i32 -> vector<16x128xf32>
      %647 = vector.broadcast %645 : f32 to vector<16x128xf32>
      %648 = arith.mulf %647, %646 : vector<16x128xf32>
      %649 = arith.addf %629, %648 : vector<16x128xf32>
      %c1_312 = arith.constant 1 : index
      %c6_313 = arith.constant 6 : index
      %c0_314 = arith.constant 0 : index
      %650 = vector.load %arg8[%c1_312, %c6_313, %c0_314] : memref<2x24x128xf32, #tpu.memory_space<vmem>>, vector<1x16x128xf32>
      %651 = vector.shape_cast %650 : vector<1x16x128xf32> to vector<16x128xf32>
      %c91 = arith.constant 91 : index
      %652 = memref.load %arg3[%c91] : memref<98xf32, #tpu.memory_space<smem>>
      %653 = vector.broadcast %652 : f32 to vector<16x128xf32>
      %654 = arith.mulf %653, %651 : vector<16x128xf32>
      %655 = arith.addf %634, %654 : vector<16x128xf32>
      %c92 = arith.constant 92 : index
      %656 = memref.load %arg3[%c92] : memref<98xf32, #tpu.memory_space<smem>>
      %c127_i32_315 = arith.constant 127 : i32
      %657 = tpu.dynamic_rotate %651 by %c127_i32_315 dim 1 : vector<16x128xf32>, i32 -> vector<16x128xf32>
      %658 = vector.broadcast %656 : f32 to vector<16x128xf32>
      %659 = arith.mulf %658, %657 : vector<16x128xf32>
      %660 = arith.addf %639, %659 : vector<16x128xf32>
      %c93 = arith.constant 93 : index
      %661 = memref.load %arg3[%c93] : memref<98xf32, #tpu.memory_space<smem>>
      %c126_i32_316 = arith.constant 126 : i32
      %662 = tpu.dynamic_rotate %651 by %c126_i32_316 dim 1 : vector<16x128xf32>, i32 -> vector<16x128xf32>
      %663 = vector.broadcast %661 : f32 to vector<16x128xf32>
      %664 = arith.mulf %663, %662 : vector<16x128xf32>
      %665 = arith.addf %644, %664 : vector<16x128xf32>
      %c94 = arith.constant 94 : index
      %666 = memref.load %arg3[%c94] : memref<98xf32, #tpu.memory_space<smem>>
      %c125_i32_317 = arith.constant 125 : i32
      %667 = tpu.dynamic_rotate %651 by %c125_i32_317 dim 1 : vector<16x128xf32>, i32 -> vector<16x128xf32>
      %668 = vector.broadcast %666 : f32 to vector<16x128xf32>
      %669 = arith.mulf %668, %667 : vector<16x128xf32>
      %670 = arith.addf %649, %669 : vector<16x128xf32>
      %c95 = arith.constant 95 : index
      %671 = memref.load %arg3[%c95] : memref<98xf32, #tpu.memory_space<smem>>
      %c124_i32_318 = arith.constant 124 : i32
      %672 = tpu.dynamic_rotate %651 by %c124_i32_318 dim 1 : vector<16x128xf32>, i32 -> vector<16x128xf32>
      %673 = vector.broadcast %671 : f32 to vector<16x128xf32>
      %674 = arith.mulf %673, %672 : vector<16x128xf32>
      %675 = arith.addf %655, %674 : vector<16x128xf32>
      %c96_319 = arith.constant 96 : index
      %676 = memref.load %arg3[%c96_319] : memref<98xf32, #tpu.memory_space<smem>>
      %c123_i32_320 = arith.constant 123 : i32
      %677 = tpu.dynamic_rotate %651 by %c123_i32_320 dim 1 : vector<16x128xf32>, i32 -> vector<16x128xf32>
      %678 = vector.broadcast %676 : f32 to vector<16x128xf32>
      %679 = arith.mulf %678, %677 : vector<16x128xf32>
      %680 = arith.addf %660, %679 : vector<16x128xf32>
      %c97 = arith.constant 97 : index
      %681 = memref.load %arg3[%c97] : memref<98xf32, #tpu.memory_space<smem>>
      %c122_i32_321 = arith.constant 122 : i32
      %682 = tpu.dynamic_rotate %651 by %c122_i32_321 dim 1 : vector<16x128xf32>, i32 -> vector<16x128xf32>
      %683 = vector.broadcast %681 : f32 to vector<16x128xf32>
      %684 = arith.mulf %683, %682 : vector<16x128xf32>
      %685 = arith.addf %665, %684 : vector<16x128xf32>
      %686 = arith.addf %680, %685 : vector<16x128xf32>
      %687 = arith.addf %670, %675 : vector<16x128xf32>
      %688 = arith.addf %686, %687 : vector<16x128xf32>
      %c0_322 = arith.constant 0 : index
      %689 = memref.load %arg4[%c0_322] : memref<1xf32, #tpu.memory_space<smem>>
      %690 = vector.broadcast %689 : f32 to vector<16x128xf32>
      %691 = arith.addf %688, %690 : vector<16x128xf32>
      %692 = vector.extract_strided_slice %691 {offsets = [0, 0], sizes = [16, 16], strides = [1, 1]} : vector<16x128xf32> to vector<16x16xf32>
      %693 = arith.negf %692 : vector<16x16xf32>
      %694 = math.exp %693 : vector<16x16xf32>
      %cst_323 = arith.constant 1.000000e+00 : f32
      %695 = vector.broadcast %cst_323 : f32 to vector<16x16xf32>
      %696 = arith.addf %695, %694 : vector<16x16xf32>
      %697 = arith.divf %695, %696 : vector<16x16xf32>
      %c0_324 = arith.constant 0 : index
      %c0_325 = arith.constant 0 : index
      %c0_326 = arith.constant 0 : index
      %c0_327 = arith.constant 0 : index
      %698 = vector.load %arg5[%c0_324, %c0_325, %c0_326, %c0_327] : memref<1x1x16x16xf32, #tpu.memory_space<vmem>>, vector<1x1x16x16xf32>
      %699 = vector.shape_cast %698 : vector<1x1x16x16xf32> to vector<16x16xf32>
      %700 = vector.shape_cast %697 : vector<16x16xf32> to vector<1x1x16x16xf32>
      tpu.vector_store %arg5[%c0_324, %c0_325, %c0_326, %c0_327], %700 {strides = array<i32>} : memref<1x1x16x16xf32, #tpu.memory_space<vmem>>, vector<1x1x16x16xf32>,
    } else {
    }
    return
  }
  func.func @transform_0(%arg0: i32, %arg1: i32) -> (i32, i32, i32) {
    %c0_i32 = arith.constant 0 : i32
    %c0_i32_0 = arith.constant 0 : i32
    return %arg0, %arg1, %c0_i32 : i32, i32, i32
  }
  func.func @transform_1(%arg0: i32, %arg1: i32) -> i32 {
    %c0_i32 = arith.constant 0 : i32
    %c0_i32_0 = arith.constant 0 : i32
    return %c0_i32 : i32
  }
  func.func @transform_2(%arg0: i32, %arg1: i32) -> i32 {
    %c0_i32 = arith.constant 0 : i32
    %c0_i32_0 = arith.constant 0 : i32
    return %c0_i32 : i32
  }
  func.func @transform_3(%arg0: i32, %arg1: i32) -> (i32, i32, i32, i32) {
    %c0_i32 = arith.constant 0 : i32
    %c0_i32_0 = arith.constant 0 : i32
    %c0_i32_1 = arith.constant 0 : i32
    %c0_i32_2 = arith.constant 0 : i32
    return %arg0, %c0_i32, %c0_i32_0, %c0_i32_1 : i32, i32, i32, i32
  }
}

</mosaic_0001>

<bundles_post_ra>
// kernel: tpu_custom_call.1
= control target key start
LH: loop header
LB: loop body
LE: loop exit
PB: predicated region body
PF: predicated region fallthrough
CT: control target
= control target key end

     0   :  { %s3816_s0 = inlined_call_operand.hbm [shape: f32[2,4,256], index: 0, kind: input, shape index: {}]   ;;  %s3817_s1 = inlined_call_operand.vmem [shape: f32[98], index: 1, kind: input, shape index: {}]   ;;  %s3818_s2 = inlined_call_operand.<no memory space> [shape: f32[1], index: 2, kind: input, shape index: {}]   ;;  %s3819_s3 = inlined_call_operand.hbm [shape: f32[2,1,16,16], index: 3, kind: output, shape index: {}]  }
   0x1   :  { %3898 = sst [smem:[#allocation81_spill]] %s3816_s0 }
   0x2   :  { %3899 = sst [smem:[#allocation82_spill]] %s3817_s1 }
   0x3   :  { %3900 = sst [smem:[#allocation83_spill]] %s3819_s3 }
   0x4   :  { %8 = sst [smem:[#allocation5]] %s3818_s2 }
   0x5   :  { %9 = vsyncpa [#allocation7], 0 }
   0x6   :  { %11 = vsyncpa [#allocation7 + $0x1], 0 }
   0x7   :  { %12 = vsyncpa [#allocation9], 0 }
   0x8   :  { %13 = vsyncpa [#allocation8], 0 }
   0x9   :  { %15 = vsyncpa [#allocation8 + $0x1], 0  ;;  %s2163_s14 = smov 0   ;;  %s2165_s15 = smov 0  }
   0xa   :  { %s2167_s16 = smov 0   ;;  %s2169_s17 = smov 0  }
   0xb   :  { %s2171_s18 = smov 0   ;;  %s2173_s19 = smov 0  }
   0xc LB: > { %3901 = sst [smem:[#allocation15_spill]] %s2096_s14  ;;  %s1733_s2 = sadd.s32 4294967295, %s2116_s19   ;;  %s2116_s19 = sphi %s2173_s19, %s21_s19   ;;  %s2112_s18 = sphi %s2171_s18, %s4112_s18   ;;  %s2108_s17 = sphi %s2169_s17, %s4111_s17   ;;  %s2104_s16 = sphi %s2167_s16, %s4110_s16   ;;  %s2100_s15 = sphi %s2165_s15, %s4109_s15   ;;  %s2096_s14 = sphi %s2163_s14, %s4108_s14  }
   0xd   : > { %3902 = sst [smem:[#allocation16_spill]] %s2100_s15  ;;  %s1734_s20 = sadd.s32 4294967294, %s2116_s19  }
   0xe   : > { %3903 = sst [smem:[#allocation17_spill]] %s2104_s16  ;;  %p55_p0 = scmp.ne.s32.totalorder %s2100_s15, %s2096_s14 }
   0xf   : > { %3904 = sst [smem:[#allocation18_spill]] %s2108_s17  ;;  %p2197_p1 = scmp.eq.s32.totalorder %s1733_s2, 0 }
  0x10   : > { %3905 = sst [smem:[#allocation19_spill]] %s2112_s18  ;;  %p2201_p2 = scmp.eq.s32.totalorder %s1733_s2, 1 }
  0x11   : > { %3906 = sst [smem:[#allocation20_spill]] %s2116_s19  ;;  %p127_p3 = scmp.eq.s32.totalorder %s1734_s20, 1 }
  0x12   : > { %s3907_s21 = scalar_select %p2197_p1, 1, 0 }
  0x13   : > { %p2207_p4 = por %p2197_p1, %p55_p0  ;;  %p1735_p5 = scmp.ge.s32.totalorder %s2116_s19, 1 }
  0x14   : > { %p2212_p6 = por %p127_p3, %p55_p0  ;;  %p134_p7 = scmp.lt.s32.totalorder %s2116_s19, 3 }
  0x15   : > { %s3909_s23 = scalar_select %p2207_p4, 1, 0 }
  0x16   : > { %s3910_s24 = scalar_select %p2212_p6, 1, 0 }
  0x17   : > { %s3912_s1 = sld [smem:[#allocation82_spill]]  ;;  %p2220_p8 = pnand %p1735_p5, %p134_p7 }
  0x18   : > { %3911 = sst [smem:[#allocation21_spill]] %s3910_s24  ;;  %s33_s30 = sadd.s32 1, %s2112_s18 }
  0x19   : > { %p1891_p10 = pneg %p2220_p8  ;;  %s42_s4 = sadd.s32 1, %s2104_s16 }
  0x1a   : > { %p35_p12 = scmp.ge.s32.totalorder %s33_s30, 2 }
  0x1b   : > { %p2229_p11 = pnand %p1891_p10, %p2197_p1 }
  0x1d   : > { %s147_s27 = sshll.u32 %s3912_s1, 4  ;;  %p1987_p0 = pneg %p2229_p11  ;;  %s148_s27 = int_to_ptr.vmem [resolvable:$true] %s147_s27 }
  0x1e   : > { %s1985_s5 = scalar_lea.vmem %s148_s27, 16  ;;  %p1993_p7 = scmp.lt.s32.totalorder %s148_s27, %s148_s27 }
  0x1f   : > { %p1986_p13 = scmp.ne.s32.totalorder %s148_s27, %s1985_s5  ;;  %p1994_p6 = scmp.lt.s32.totalorder %s1985_s5, %s1985_s5 }
  0x21   : > { %p1988_p3 = pnand %p1987_p0, %p1986_p13  ;;  %p1995_p9 = por %p1994_p6, %p1993_p7 }
  0x23   : > { %p1989_p5 = pneg %p1988_p3 }
  0x25   : > { %p1996_p4 = pnand %p1995_p9, %p1989_p5 }
  0x27   : > { %1999 = shalt.err (!%p1996_p4)
}
  0x28   : > { %s2118_s6 = smov [#allocation10]   ;;  %s4114_s30 = smov (%p35_p12, %s33_s30), 0 }
  0x29   : > { %1894 = dma.vmem_to_smem (!%p2229_p11), %s148_s27, 16, %s2118_s6, [#allocation9]  }
  0x2a   : > { %3915 = sst [smem:[#allocation22_spill]] %s4114_s30  ;;  %p49_p10 = scmp.ne.s32.totalorder %s2104_s16, %s2100_s15 }
  0x2b   : > { %p50_p6 = scmp.eq.s32.totalorder %s2116_s19, 0  ;;  %s37_s7 = ssub.s32 %s2112_s18, %s4114_s30 }
  0x2c   : > { %p1904_p4 = scmp.lt.s32.totalorder %s2116_s19, 2  ;;  %p40_p9 = scmp.eq.s32.totalorder %s37_s7, 0 }
  0x2d   : > { %p51_p13 = por %p50_p6, %p49_p10  ;;  %p2249_p0 = por %p2201_p2, %p49_p10 }
  0x2e   : > { %s161_s9 = sand.u32 1, %s2104_s16   ;;  %s1881_s12 = sshll.u32 %s2112_s18, 7 }
  0x2f   : > { %s3916_s8 = scalar_select %p2249_p0, 1, 0 }
  0x30   : > { %s2255_s10 = scalar_select %p40_p9, %s2104_s16, %s42_s4  }
  0x31   : > { %3917 = sst [smem:[#allocation23_spill]] %s3916_s8  ;;  %s1738_s11 = sshll.u32 %s161_s9, 3 }
  0x32   : > { %3918 = sst [smem:[#allocation24_spill]] %s2255_s10  ;;  %s3919_s0 = sld [smem:[#allocation81_spill]] }
  0x33   : > { %s165_s25 = scalar_lea.vmem [#allocation6], %s1738_s11  ;;  %p2265_p2 = pnand %p1904_p4, %p51_p13 }
  0x34   : > { %s175_s22 = sshll.u32 %s165_s25, 4  ;;  %s162_s27 = scalar_lea.sflag [#allocation7], %s161_s9  ;;  %s2263_s22 = int_to_ptr.vmem [resolvable:$true] %s175_s22 }
  0x35   : > { %p2002_p12 = pneg %p2265_p2 }
  0x38   : > { %s2261_s20 = scalar_lea.hbm %s3919_s0, %s1881_s12  ;;  %s2005_s6 = scalar_lea.hbm %s3919_s0, 256 }
  0x39   : > { %s2000_s29 = scalar_lea.hbm %s2261_s20, 128  ;;  %p2006_p7 = scmp.lt.u32.totalorder %s2261_s20, %s3919_s0 }
  0x3a   : > { %p2001_p11 = scmp.ne.s32.totalorder %s2261_s20, %s2000_s29  ;;  %p2007_p10 = scmp.lt.u32.totalorder %s2005_s6, %s2000_s29 }
  0x3b   : > { %p2009_p4 = scmp.lt.u32.totalorder %s2000_s29, %s2261_s20 }
  0x3c   : > { %p2003_p3 = pnand %p2002_p12, %p2001_p11  ;;  %p2008_p6 = por %p2007_p10, %p2006_p7 }
  0x3e   : > { %p2004_p5 = pneg %p2003_p3  ;;  %p2010_p9 = por %p2009_p4, %p2008_p6 }
  0x40   : > { %p2011_p13 = pnand %p2010_p9, %p2004_p5 }
  0x42   : > { %2014 = shalt.err (!%p2011_p13)
}
  0x43   : > { %s2015_s9 = scalar_lea.vmem %s2263_s22, 128  ;;  %s2119_s12 = smov [#allocation6]  }
  0x44   : > { %p2016_p11 = scmp.ne.s32.totalorder %s2263_s22, %s2015_s9  ;;  %s2020_s13 = sshll.u32 %s2119_s12, 4  ;;  %s2021_s13 = int_to_ptr.vmem [resolvable:$false] %s2020_s13 }
  0x45   : > { %s2022_s2 = scalar_lea.vmem %s2021_s13, 256  ;;  %p2023_p1 = scmp.lt.s32.totalorder %s2263_s22, %s2021_s13 }
  0x46   : > { %p2018_p3 = pnand %p2016_p11, %p2002_p12  ;;  %p2024_p7 = scmp.lt.s32.totalorder %s2022_s2, %s2015_s9 }
  0x48   : > { %p2019_p0 = pneg %p2018_p3  ;;  %p2025_p10 = por %p2024_p7, %p2023_p1 }
  0x4a   : > { %p2026_p6 = pnand %p2025_p10, %p2019_p0 }
  0x4c   : > { %2029 = shalt.err (!%p2026_p6)
}
  0x4d   : > { %1898 = dma.hbm_to_vmem [thread:$0]  (!%p2265_p2), %s2261_s20, 128, %s2263_s22, %s162_s27  }
  0x4e   : > { %184 = sbr.rel (%p2220_p8) target bundleno = 795 (0x31b), region = 32 }
  0x55   : > { %s2297_s25 = sand.u32 1, %s2100_s15   ;;  %p3922_p1 = scmp.ne.s32.totalorder %s3909_s23, 0 }
  0x56   : > { %3921 = sst [smem:[#allocation25_spill]] %s2297_s25  ;;  %s1742_s29 = sshll.u32 %s2297_s25, 3 }
  0x57   : > { %s187_s4 = scalar_lea.sflag [#allocation7], %s2297_s25  ;;  %s190_s5 = scalar_lea.vmem [#allocation6], %s1742_s29 }
  0x58   : > { %2083 = dma.done.wait (%p3922_p1), %s187_s4, 128  }
  0x59   : > { %2085 = vsyncadd (%p3922_p1), %s187_s4, 4294967168  ;;  %p3923_p0 = scmp.ne.s32.totalorder %s3907_s21, 0 }
  0x5b   : > { %2087 = dma.done.wait (%p3923_p0), [#allocation9], 16  }
  0x5c   : > { %2089 = vsyncadd (%p3923_p0), [#allocation9], 4294967280 }
  0x5d   : > { %199 = sfence }
  0x5e   : > { %v222_v0 = vlaneseq  ;;  %v228_v1 = vld [vmem:[%s190_s5] sm:$0xff]  ;;  %vm232_vm0 = vcmask 1043456   ;;  %v2120_v7 = vmov 0.0   ;;  %v2121_v8 = vmov -inf   ;;  %s2123_s21 = smov 115   ;;  %s2124_s23 = smov 3  }
  0x5f   : > { %v230_v2 = vcombine.high %v228_v1, %v228_v1  ;;  %v233_v3 = vsel %vm232_vm0, %v228_v1, -inf  ;;  %v247_v6 = vsel %vm232_vm0, %v228_v1, 0.0  ;;  %310 = vst [vmem:[#allocation4] sm:$0x7] %v2120_v7  ;;  %311 = vst [vmem:[#allocation4 + $0x13] sm:$0x7] %v2120_v7 }
  0x60   : > { %vm2310_vm1 = vcmp.lt.s32.totalorder %v222_v0, 256  ;;  %v234_v5 = vrot.slane %v233_v3, 4  ;;  %319 = vst [vmem:[#allocation4 + $0x18] sm:$0x7] %v2120_v7  ;;  %320 = vst [vmem:[#allocation4 + $0x2b] sm:$0x7] %v2120_v7 }
  0x61   : > { %226 = vst.msk [vmem:[#allocation2] sm:$0x3] %vm2310_vm1, %v2121_v8  ;;  %v240_v9 = vsel %vm232_vm0, %v230_v2, -inf  ;;  %227 = vst.msk [vmem:[#allocation3] sm:$0x3] %vm2310_vm1, %v2120_v7  ;;  %v248_v10 = vrot.slane %v247_v6, 4 }
  0x62   : > { %v254_v11 = vsel %vm232_vm0, %v230_v2, 0.0  ;;  %v235_v12 = vmax.f32 %v233_v3, %v234_v5  ;;  %v241_v13 = vrot.slane %v240_v9, 4  ;;  %vm312_vm2 = vcmask 23552   ;;  %s2125_s28 = smov 99   ;;  %s2126_s20 = smov 83  }
  0x63   : > { %v255_v14 = vrot.slane %v254_v11, 4  ;;  %v249_v15 = vadd.f32 %v248_v10, %v247_v6  ;;  %313 = vst.msk [vmem:[#allocation4 + $0x3] sm:$0xff] %vm312_vm2, %v2120_v7  ;;  %vm315_vm3 = vcmask 1047704   ;;  %314 = vst.msk [vmem:[#allocation4 + $0xb] sm:$0xff] %vm312_vm2, %v2120_v7  ;;  %v2122_v18 = vmov 1966171168  }
  0x64   : > { %321 = vst.msk [vmem:[#allocation4 + $0x1b] sm:$0xff] %vm312_vm2, %v2120_v7  ;;  %322 = vst.msk [vmem:[#allocation4 + $0x23] sm:$0xff] %vm312_vm2, %v2120_v7  ;;  %v236_v16 = vrot.slane %v235_v12, 2  ;;  %v242_v17 = vmax.f32 %v240_v9, %v241_v13  ;;  %v266_v19 = vunpack.c.l.s4 %v2122_v18  ;;  %v269_v25 = vshrl.u32 %v222_v0, 7  ;;  %s2127_s22 = smov 67   ;;  %s2128_s26 = smov 51  }
  0x65   : > { %v256_v20 = vadd.f32 %v255_v14, %v254_v11  ;;  %316 = vst.msk [vmem:[#allocation4 + $0x3] sm:$0xff] %vm315_vm3, %v2120_v7  ;;  %317 = vst.msk [vmem:[#allocation4 + $0xb] sm:$0xff] %vm315_vm3, %v2120_v7  ;;  %v250_v21 = vrot.slane %v249_v15, 2  ;;  %s2129_s27 = smov 35   ;;  %s2130_s6 = smov 19   ;;  %vm334_vm4 = vcmask 147480  }
  0x66   : > { %323 = vst.msk [vmem:[#allocation4 + $0x1b] sm:$0xff] %vm315_vm3, %v2120_v7  ;;  %324 = vst.msk [vmem:[#allocation4 + $0x23] sm:$0xff] %vm315_vm3, %v2120_v7  ;;  %v237_v22 = vmax.f32 %v235_v12, %v236_v16  ;;  %v243_v23 = vrot.slane %v242_v17, 2  ;;  %v267_v29 = vunpack.c.0.s8 %v266_v19  ;;  %s3831_s7 = smov 127   ;;  %s3840_s11 = smov 126   ;;  %vm1620_vm5 = vcmask 130048  }
  0x67   : > { %v257_v24 = vrot.slane %v256_v20, 2  ;;  %v251_v26 = vadd.f32 %v250_v21, %v249_v15  ;;  %s3835_s9 = smov 125   ;;  %s3842_s12 = smov 124  }
  0x68   : > { %v238_v27 = vrot.slane %v237_v22, 1  ;;  %v244_v28 = vmax.f32 %v242_v17, %v243_v23  ;;  %v270_v37 = vsub.s32 %v267_v29, %v269_v25  ;;  %v261_v43 = vld [vmem:[#allocation2] sm:$0x3]  ;;  %v286_v44 = vld [vmem:[#allocation3] sm:$0x3]  ;;  %s3833_s13 = smov 123  }
  0x69   : > { %v258_v30 = vadd.f32 %v257_v24, %v256_v20  ;;  %v252_v31 = vrot.slane %v251_v26, 1  ;;  %s3829_s2 = smov 122   ;;  %s2693_s29 = sld [smem:[#allocation10]] }
  0x6a   : > { %v239_v32 = vmax.f32 %v237_v22, %v238_v27  ;;  %v245_v33 = vrot.slane %v244_v28, 1  ;;  %s2695_s4 = sld [smem:[#allocation10 + $0x7]]  ;;  %s2697_s5 = sld [smem:[#allocation10 + $0xe]] }
  0x6b   : > { %v259_v34 = vrot.slane %v258_v30, 1  ;;  %v253_v35 = vadd.f32 %v252_v31, %v251_v26  ;;  %s2741_s0 = sld [smem:[#allocation10 + $0xa]]  ;;  %s2743_s1 = sld [smem:[#allocation10 + $0xc]] }
  0x6c   : > { %v246_v36 = vmax.f32 %v244_v28, %v245_v33  ;;  %s2745_s30 = sld [smem:[#allocation10 + $0xd]]  ;;  %s2747_s18 = sld [smem:[#allocation10 + $0xf]] }
  0x6d   : > { %v260_v38 = vadd.f32 %v259_v34, %v258_v30  ;;  %s2758_s10 = sld [smem:[#allocation10 + $0x12]]  ;;  %s2760_s16 = sld [smem:[#allocation10 + $0x13]] }
  0x6e   : > { %v264_v39 = vcombine.low %v239_v32, %v246_v36  ;;  %s3963_s15 = smov 125   ;;  %s3964_s19 = smov 123  }
  0x6f   : > { %v289_v40 = vcombine.low %v253_v35, %v260_v38  ;;  %3945 = sst [smem:[#allocation45_spill]] %s2693_s29  ;;  %s2768_s24 = sld [smem:[#allocation10 + $0x14]] }
  0x70   : > { %v271_v41 = vrot.slane %v264_v39, %v270_v37  ;;  %3946 = sst [smem:[#allocation46_spill]] %s2697_s5  ;;  %s2775_s14 = sld [smem:[#allocation10 + $0x17]] }
  0x71   : > { %v296_v42 = vrot.slane %v289_v40, %v270_v37  ;;  %3956 = sst [smem:[#allocation56_spill]] %s2743_s1  ;;  %s2788_s3 = sld [smem:[#allocation10 + $0x18]] }
  0x72   : > { %v278_v45 = vrot.slane %v271_v41, %v270_v37  ;;  %3957 = sst [smem:[#allocation57_spill]] %s2745_s30  ;;  %s2800_s8 = sld [smem:[#allocation10 + $0x1b]] }
  0x73   : > { %v303_v46 = vrot.slane %v296_v42, %v270_v37  ;;  %3958 = sst [smem:[#allocation58_spill]] %s2747_s18  ;;  %s3972_s17 = smov 124  }
  0x74   : > { %v280_v47 = vmax.f32 %v261_v43, %v278_v45  ;;  %3962 = sst [smem:[#allocation62_spill]] %s2760_s16  ;;  %s3973_s25 = smov 122  }
  0x75   : > { %v305_v48 = vadd.f32 %v303_v46, %v286_v44 }
  0x76   : > { %285 = vst.msk [vmem:[#allocation2] sm:$0x3] %vm2310_vm1, %v280_v47  ;;  %3965 = sst [smem:[#allocation63_spill]] %s2775_s14 }
  0x77   : > { %306 = vst.msk [vmem:[#allocation3] sm:$0x3] %vm2310_vm1, %v305_v48  ;;  %3968 = sst [smem:[#allocation65_spill]] %s2788_s3 }
  0x78   : > { %3971 = sst [smem:[#allocation66_spill]] %s2800_s8 }
  0x7d   : > { %v1747_v49 = vld [vmem:[#allocation2] ss:$0 sm:$0xff]  ;;  %v1761_v51 = vld [vmem:[#allocation2 + $0x1] ss:$0 sm:$0xff] }
  0x7e   : > { %352 = vrot.lane.b32.xlu1 %v1747_v49, %s2123_s21  ;;  %331 = vrot.lane.b32.xlu0 %v1747_v49, %s2124_s23  ;;  %v1748_v50 = vld [vmem:[#allocation3] ss:$0 sm:$0xff]  ;;  %v1762_v52 = vld [vmem:[#allocation3 + $0x1] ss:$0 sm:$0xff] }
  0x82   : > { %362 = vrot.lane.b32.xlu1 %v1748_v50, %s2123_s21  ;;  %342 = vrot.lane.b32.xlu0 %v1748_v50, %s2124_s23 }
  0x86   : > { %382 = vrot.lane.b32.xlu1 %v1748_v50, %s2125_s28  ;;  %372 = vrot.lane.b32.xlu0 %v1747_v49, %s2125_s28 }
  0x8a   : > { %402 = vrot.lane.b32.xlu1 %v1748_v50, %s2126_s20  ;;  %392 = vrot.lane.b32.xlu0 %v1747_v49, %s2126_s20 }
  0x8e   : > { %422 = vrot.lane.b32.xlu1 %v1748_v50, %s2127_s22  ;;  %412 = vrot.lane.b32.xlu0 %v1747_v49, %s2127_s22 }
  0x92   : > { %442 = vrot.lane.b32.xlu1 %v1748_v50, %s2128_s26  ;;  %432 = vrot.lane.b32.xlu0 %v1747_v49, %s2128_s26 }
  0x96   : > { %462 = vrot.lane.b32.xlu1 %v1748_v50, %s2129_s27  ;;  %452 = vrot.lane.b32.xlu0 %v1747_v49, %s2129_s27 }
  0x9a   : > { %482 = vrot.lane.b32.xlu1 %v1748_v50, %s2130_s6  ;;  %472 = vrot.lane.b32.xlu0 %v1747_v49, %s2130_s6 }
  0x9e   : > { %492 = vrot.lane.b32.xlu0 %v1761_v51, %s2124_s23  ;;  %502 = vrot.lane.b32.xlu1 %v1762_v52, %s2124_s23  ;;  %s2705_s23 = sld [smem:[#allocation10 + $0x1c]] }
  0xa2   : > { %512 = vrot.lane.b32.xlu0 %v1761_v51, %s2123_s21  ;;  %522 = vrot.lane.b32.xlu1 %v1762_v52, %s2123_s21  ;;  %s2703_s21 = sld [smem:[#allocation10 + $0x15]] }
  0xa4   : > { %3949 = sst [smem:[#allocation49_spill]] %s2705_s23 }
  0xa6   : > { %532 = vrot.lane.b32.xlu0 %v1761_v51, %s2125_s28  ;;  %542 = vrot.lane.b32.xlu1 %v1762_v52, %s2125_s28  ;;  %s2709_s28 = sld [smem:[#allocation10 + $0x1]] }
  0xa8   : > { %3948 = sst [smem:[#allocation48_spill]] %s2703_s21 }
  0xaa   : > { %552 = vrot.lane.b32.xlu0 %v1761_v51, %s2126_s20  ;;  %562 = vrot.lane.b32.xlu1 %v1762_v52, %s2126_s20  ;;  %s2715_s20 = sld [smem:[#allocation10 + $0x23]] }
  0xac   : > { %3950 = sst [smem:[#allocation50_spill]] %s2709_s28 }
  0xae   : > { %572 = vrot.lane.b32.xlu0 %v1761_v51, %s2127_s22  ;;  %582 = vrot.lane.b32.xlu1 %v1762_v52, %s2127_s22  ;;  %s2717_s22 = sld [smem:[#allocation10 + $0x2]] }
  0xb2   : > { %592 = vrot.lane.b32.xlu0 %v1761_v51, %s2128_s26  ;;  %602 = vrot.lane.b32.xlu1 %v1762_v52, %s2128_s26  ;;  %s2719_s26 = sld [smem:[#allocation10 + $0x3]] }
  0xb6   : > { %612 = vrot.lane.b32.xlu0 %v1761_v51, %s2129_s27  ;;  %622 = vrot.lane.b32.xlu1 %v1762_v52, %s2129_s27  ;;  %s2721_s27 = sld [smem:[#allocation10 + $0x4]] }
  0xba   : > { %632 = vrot.lane.b32.xlu0 %v1761_v51, %s2130_s6  ;;  %642 = vrot.lane.b32.xlu1 %v1762_v52, %s2130_s6  ;;  %s2723_s6 = sld [smem:[#allocation10 + $0x5]] }
  0xf0   : > { %v353_v53 = vpop.permute.xlu1 %352  ;;  %v332_v54 = vpop.permute.xlu0 %331 }
  0xf1   : > { %355 = vst.msk [vmem:[#allocation4 + $0x4] sm:$0x1] %vm334_vm4, %v353_v53  ;;  %335 = vst.msk [vmem:[#allocation4 + $0x3] sm:$0x1] %vm334_vm4, %v332_v54 }
  0xf4   : > { %v363_v55 = vpop.permute.xlu1 %362  ;;  %v343_v56 = vpop.permute.xlu0 %342 }
  0xf5   : > { %365 = vst.msk [vmem:[#allocation4 + $0x1c] sm:$0x1] %vm334_vm4, %v363_v55  ;;  %345 = vst.msk [vmem:[#allocation4 + $0x1b] sm:$0x1] %vm334_vm4, %v343_v56 }
  0xf8   : > { %v383_v57 = vpop.permute.xlu1 %382  ;;  %v373_v58 = vpop.permute.xlu0 %372 }
  0xf9   : > { %385 = vst.msk [vmem:[#allocation4 + $0x1d] sm:$0x1] %vm334_vm4, %v383_v57  ;;  %375 = vst.msk [vmem:[#allocation4 + $0x5] sm:$0x1] %vm334_vm4, %v373_v58 }
  0xfc   : > { %v403_v59 = vpop.permute.xlu1 %402  ;;  %v393_v60 = vpop.permute.xlu0 %392 }
  0xfd   : > { %405 = vst.msk [vmem:[#allocation4 + $0x1e] sm:$0x1] %vm334_vm4, %v403_v59  ;;  %395 = vst.msk [vmem:[#allocation4 + $0x6] sm:$0x1] %vm334_vm4, %v393_v60 }
 0x100   : > { %v423_v61 = vpop.permute.xlu1 %422  ;;  %v413_v62 = vpop.permute.xlu0 %412 }
 0x101   : > { %425 = vst.msk [vmem:[#allocation4 + $0x1f] sm:$0x1] %vm334_vm4, %v423_v61  ;;  %415 = vst.msk [vmem:[#allocation4 + $0x7] sm:$0x1] %vm334_vm4, %v413_v62 }
 0x104   : > { %v443_v63 = vpop.permute.xlu1 %442  ;;  %v433_v0 = vpop.permute.xlu0 %432 }
 0x105   : > { %445 = vst.msk [vmem:[#allocation4 + $0x20] sm:$0x1] %vm334_vm4, %v443_v63  ;;  %435 = vst.msk [vmem:[#allocation4 + $0x8] sm:$0x1] %vm334_vm4, %v433_v0 }
 0x108   : > { %v463_v1 = vpop.permute.xlu1 %462  ;;  %v453_v2 = vpop.permute.xlu0 %452  ;;  %v2337_v3 = vld [vmem:[#allocation4] sm:$0xff]  ;;  %v2575_v54 = vld [vmem:[#allocation4 + $0x18] sm:$0xff] }
 0x109   : > { %465 = vst.msk [vmem:[#allocation4 + $0x21] sm:$0x1] %vm334_vm4, %v463_v1  ;;  %455 = vst.msk [vmem:[#allocation4 + $0x9] sm:$0x1] %vm334_vm4, %v453_v2  ;;  %655 = vrot.lane.b32.xlu0 %v2337_v3, %s3831_s7 }
 0x10a   : > { %3930 = vst [vmem:[#allocation30_spill] sm:$0xff] %v2575_v54 }
 0x10c   : > { %v483_v4 = vpop.permute.xlu1 %482  ;;  %v473_v5 = vpop.permute.xlu0 %472  ;;  %v2363_v15 = vld [vmem:[#allocation4 + $0x1] sm:$0xff] }
 0x10d   : > { %485 = vst.msk [vmem:[#allocation4 + $0x22] sm:$0x1] %vm334_vm4, %v483_v4  ;;  %475 = vst.msk [vmem:[#allocation4 + $0xa] sm:$0x1] %vm334_vm4, %v473_v5  ;;  %665 = vrot.lane.b32.xlu0 %v2337_v3, %s3840_s11  ;;  %v2627_v5 = vld [vmem:[#allocation4 + $0x19] sm:$0xff] }
 0x10e   : > { %3936 = vst [vmem:[#allocation36_spill] sm:$0xff] %v2627_v5 }
 0x110   : > { %v493_v6 = vpop.permute.xlu0 %492  ;;  %v503_v7 = vpop.permute.xlu1 %502  ;;  %v2395_v24 = vld [vmem:[#allocation4 + $0x2] sm:$0xff] }
 0x111   : > { %495 = vst.msk [vmem:[#allocation4 + $0xb] sm:$0x1] %vm334_vm4, %v493_v6  ;;  %675 = vrot.lane.b32.xlu0 %v2337_v3, %s3835_s9  ;;  %505 = vst.msk [vmem:[#allocation4 + $0x23] sm:$0x1] %vm334_vm4, %v503_v7 }
 0x114   : > { %v513_v8 = vpop.permute.xlu0 %512  ;;  %v523_v9 = vpop.permute.xlu1 %522  ;;  %v2423_v26 = vld [vmem:[#allocation4 + $0x3] sm:$0xff] }
 0x115   : > { %515 = vst.msk [vmem:[#allocation4 + $0xc] sm:$0x1] %vm334_vm4, %v513_v8  ;;  %685 = vrot.lane.b32.xlu0 %v2337_v3, %s3842_s12  ;;  %525 = vst.msk [vmem:[#allocation4 + $0x24] sm:$0x1] %vm334_vm4, %v523_v9 }
 0x118   : > { %v533_v10 = vpop.permute.xlu0 %532  ;;  %v543_v11 = vpop.permute.xlu1 %542  ;;  %v2451_v28 = vld [vmem:[#allocation4 + $0x4] sm:$0xff] }
 0x119   : > { %535 = vst.msk [vmem:[#allocation4 + $0xd] sm:$0x1] %vm334_vm4, %v533_v10  ;;  %695 = vrot.lane.b32.xlu0 %v2337_v3, %s3833_s13  ;;  %545 = vst.msk [vmem:[#allocation4 + $0x25] sm:$0x1] %vm334_vm4, %v543_v11 }
 0x11c   : > { %v553_v12 = vpop.permute.xlu0 %552  ;;  %v563_v13 = vpop.permute.xlu1 %562  ;;  %v2483_v32 = vld [vmem:[#allocation4 + $0x5] sm:$0xff] }
 0x11d   : > { %555 = vst.msk [vmem:[#allocation4 + $0xe] sm:$0x1] %vm334_vm4, %v553_v12  ;;  %705 = vrot.lane.b32.xlu0 %v2337_v3, %s3829_s2  ;;  %565 = vst.msk [vmem:[#allocation4 + $0x26] sm:$0x1] %vm334_vm4, %v563_v13 }
 0x120   : > { %v573_v14 = vpop.permute.xlu0 %572  ;;  %v583_v16 = vpop.permute.xlu1 %582  ;;  %v2523_v40 = vld [vmem:[#allocation4 + $0x6] sm:$0xff] }
 0x121   : > { %575 = vst.msk [vmem:[#allocation4 + $0xf] sm:$0x1] %vm334_vm4, %v573_v14  ;;  %723 = vrot.lane.b32.xlu0 %v2363_v15, %s3831_s7  ;;  %585 = vst.msk [vmem:[#allocation4 + $0x27] sm:$0x1] %vm334_vm4, %v583_v16 }
 0x124   : > { %v593_v17 = vpop.permute.xlu0 %592  ;;  %v603_v18 = vpop.permute.xlu1 %602 }
 0x125   : > { %595 = vst.msk [vmem:[#allocation4 + $0x10] sm:$0x1] %vm334_vm4, %v593_v17  ;;  %733 = vrot.lane.b32.xlu0 %v2363_v15, %s3840_s11  ;;  %605 = vst.msk [vmem:[#allocation4 + $0x28] sm:$0x1] %vm334_vm4, %v603_v18 }
 0x128   : > { %v613_v19 = vpop.permute.xlu0 %612  ;;  %v2373_v20 = vld [vmem:[#allocation4 + $0x8] sm:$0xff]  ;;  %v623_v21 = vpop.permute.xlu1 %622  ;;  %v2645_v10 = vld [vmem:[#allocation4 + $0x20] sm:$0xff] }
 0x129   : > { %615 = vst.msk [vmem:[#allocation4 + $0x11] sm:$0x1] %vm334_vm4, %v613_v19  ;;  %743 = vrot.lane.b32.xlu0 %v2363_v15, %s3835_s9  ;;  %657 = vrot.lane.b32.xlu1 %v2373_v20, %s3831_s7  ;;  %625 = vst.msk [vmem:[#allocation4 + $0x29] sm:$0x1] %vm334_vm4, %v623_v21  ;;  %v2679_v21 = vld [vmem:[#allocation4 + $0x1a] sm:$0xff] }
 0x12a   : > { %3938 = vst [vmem:[#allocation38_spill] sm:$0xff] %v2645_v10  ;;  %3943 = vst [vmem:[#allocation43_spill] sm:$0xff] %v2679_v21 }
 0x12c   : > { %v633_v22 = vpop.permute.xlu0 %632  ;;  %v643_v23 = vpop.permute.xlu1 %642  ;;  %v2405_v25 = vld [vmem:[#allocation4 + $0x9] sm:$0xff] }
 0x12d   : > { %635 = vst.msk [vmem:[#allocation4 + $0x12] sm:$0x1] %vm334_vm4, %v633_v22  ;;  %753 = vrot.lane.b32.xlu0 %v2363_v15, %s3842_s12  ;;  %667 = vrot.lane.b32.xlu1 %v2373_v20, %s3840_s11  ;;  %645 = vst.msk [vmem:[#allocation4 + $0x2a] sm:$0x1] %vm334_vm4, %v643_v23 }
 0x130   : > { %v2433_v27 = vld [vmem:[#allocation4 + $0xa] sm:$0xff] }
 0x131   : > { %763 = vrot.lane.b32.xlu0 %v2363_v15, %s3833_s13  ;;  %677 = vrot.lane.b32.xlu1 %v2373_v20, %s3835_s9  ;;  %3926 = vst [vmem:[#allocation26_spill] sm:$0xff] %v2433_v27 }
 0x134   : > { %v2461_v29 = vld [vmem:[#allocation4 + $0xb] sm:$0xff] }
 0x135   : > { %773 = vrot.lane.b32.xlu0 %v2363_v15, %s3829_s2  ;;  %687 = vrot.lane.b32.xlu1 %v2373_v20, %s3842_s12  ;;  %3927 = vst [vmem:[#allocation27_spill] sm:$0xff] %v2461_v29  ;;  %v2497_v35 = vld [vmem:[#allocation4 + $0xc] sm:$0xff] }
 0x136   : > { %3928 = vst [vmem:[#allocation28_spill] sm:$0xff] %v2497_v35  ;;  %v2541_v45 = vld [vmem:[#allocation4 + $0xd] sm:$0xff] }
 0x137   : > { %3929 = vst [vmem:[#allocation29_spill] sm:$0xff] %v2541_v45  ;;  %v2593_v59 = vld [vmem:[#allocation4 + $0xe] sm:$0xff] }
 0x138   : > { %3932 = vst [vmem:[#allocation32_spill] sm:$0xff] %v2593_v59 }
 0x139   : > { %791 = vrot.lane.b32.xlu0 %v2395_v24, %s3831_s7  ;;  %697 = vrot.lane.b32.xlu1 %v2373_v20, %s3833_s13 }
 0x13d   : > { %801 = vrot.lane.b32.xlu0 %v2395_v24, %s3840_s11  ;;  %707 = vrot.lane.b32.xlu1 %v2373_v20, %s3829_s2 }
 0x141   : > { %811 = vrot.lane.b32.xlu0 %v2395_v24, %s3835_s9  ;;  %725 = vrot.lane.b32.xlu1 %v2405_v25, %s3831_s7 }
 0x145   : > { %821 = vrot.lane.b32.xlu0 %v2395_v24, %s3842_s12  ;;  %735 = vrot.lane.b32.xlu1 %v2405_v25, %s3840_s11 }
 0x149   : > { %831 = vrot.lane.b32.xlu0 %v2395_v24, %s3833_s13  ;;  %745 = vrot.lane.b32.xlu1 %v2405_v25, %s3835_s9 }
 0x14d   : > { %841 = vrot.lane.b32.xlu0 %v2395_v24, %s3829_s2  ;;  %755 = vrot.lane.b32.xlu1 %v2405_v25, %s3842_s12 }
 0x151   : > { %859 = vrot.lane.b32.xlu0 %v2423_v26, %s3831_s7  ;;  %765 = vrot.lane.b32.xlu1 %v2405_v25, %s3833_s13 }
 0x155   : > { %869 = vrot.lane.b32.xlu0 %v2423_v26, %s3840_s11  ;;  %775 = vrot.lane.b32.xlu1 %v2405_v25, %s3829_s2 }
 0x159   : > { %879 = vrot.lane.b32.xlu0 %v2423_v26, %s3835_s9  ;;  %793 = vrot.lane.b32.xlu1 %v2433_v27, %s3831_s7 }
 0x15d   : > { %889 = vrot.lane.b32.xlu0 %v2423_v26, %s3842_s12  ;;  %803 = vrot.lane.b32.xlu1 %v2433_v27, %s3840_s11 }
 0x161   : > { %899 = vrot.lane.b32.xlu0 %v2423_v26, %s3833_s13  ;;  %813 = vrot.lane.b32.xlu1 %v2433_v27, %s3835_s9 }
 0x165   : > { %909 = vrot.lane.b32.xlu0 %v2423_v26, %s3829_s2  ;;  %823 = vrot.lane.b32.xlu1 %v2433_v27, %s3842_s12 }
 0x169   : > { %927 = vrot.lane.b32.xlu0 %v2451_v28, %s3831_s7  ;;  %833 = vrot.lane.b32.xlu1 %v2433_v27, %s3833_s13 }
 0x16d   : > { %937 = vrot.lane.b32.xlu0 %v2451_v28, %s3840_s11  ;;  %843 = vrot.lane.b32.xlu1 %v2433_v27, %s3829_s2  ;;  %v3986_v27 = vstv %s2743_s1  ;;  %s2884_s1 = sld [smem:[#allocation10 + $0x20]] }
 0x171   : > { %947 = vrot.lane.b32.xlu0 %v2451_v28, %s3835_s9  ;;  %861 = vrot.lane.b32.xlu1 %v2461_v29, %s3831_s7 }
 0x175   : > { %957 = vrot.lane.b32.xlu0 %v2451_v28, %s3842_s12  ;;  %871 = vrot.lane.b32.xlu1 %v2461_v29, %s3840_s11 }
 0x179   : > { %967 = vrot.lane.b32.xlu0 %v2451_v28, %s3833_s13  ;;  %881 = vrot.lane.b32.xlu1 %v2461_v29, %s3835_s9 }
 0x17b   : > { %v2475_v30 = vpop.permute.xlu0 %655 }
 0x17d   : > { %977 = vrot.lane.b32.xlu0 %v2451_v28, %s3829_s2  ;;  %891 = vrot.lane.b32.xlu1 %v2461_v29, %s3842_s12 }
 0x17f   : > { %v2481_v31 = vpop.permute.xlu0 %665 }
 0x181   : > { %995 = vrot.lane.b32.xlu0 %v2483_v32, %s3831_s7  ;;  %901 = vrot.lane.b32.xlu1 %v2461_v29, %s3833_s13 }
 0x183   : > { %v2489_v33 = vpop.permute.xlu0 %675 }
 0x185   : > { %1005 = vrot.lane.b32.xlu0 %v2483_v32, %s3840_s11  ;;  %911 = vrot.lane.b32.xlu1 %v2461_v29, %s3829_s2 }
 0x187   : > { %v2495_v34 = vpop.permute.xlu0 %685 }
 0x189   : > { %1015 = vrot.lane.b32.xlu0 %v2483_v32, %s3835_s9  ;;  %929 = vrot.lane.b32.xlu1 %v2497_v35, %s3831_s7 }
 0x18b   : > { %v2503_v36 = vpop.permute.xlu0 %695 }
 0x18d   : > { %1025 = vrot.lane.b32.xlu0 %v2483_v32, %s3842_s12  ;;  %939 = vrot.lane.b32.xlu1 %v2497_v35, %s3840_s11 }
 0x18f   : > { %v2509_v37 = vpop.permute.xlu0 %705 }
 0x191   : > { %1035 = vrot.lane.b32.xlu0 %v2483_v32, %s3833_s13  ;;  %949 = vrot.lane.b32.xlu1 %v2497_v35, %s3835_s9 }
 0x193   : > { %v2515_v38 = vpop.permute.xlu0 %723 }
 0x195   : > { %1045 = vrot.lane.b32.xlu0 %v2483_v32, %s3829_s2  ;;  %959 = vrot.lane.b32.xlu1 %v2497_v35, %s3842_s12 }
 0x197   : > { %v2521_v39 = vpop.permute.xlu0 %733 }
 0x199   : > { %1063 = vrot.lane.b32.xlu0 %v2523_v40, %s3831_s7  ;;  %969 = vrot.lane.b32.xlu1 %v2497_v35, %s3833_s13 }
 0x19b   : > { %v2529_v41 = vpop.permute.xlu1 %657  ;;  %v2531_v42 = vpop.permute.xlu0 %743 }
 0x19d   : > { %1073 = vrot.lane.b32.xlu0 %v2523_v40, %s3840_s11  ;;  %979 = vrot.lane.b32.xlu1 %v2497_v35, %s3829_s2 }
 0x19f   : > { %v2537_v43 = vpop.permute.xlu1 %667  ;;  %v2539_v44 = vpop.permute.xlu0 %753 }
 0x1a1   : > { %1083 = vrot.lane.b32.xlu0 %v2523_v40, %s3835_s9  ;;  %997 = vrot.lane.b32.xlu1 %v2541_v45, %s3831_s7 }
 0x1a3   : > { %v2547_v46 = vpop.permute.xlu1 %677  ;;  %v2549_v47 = vpop.permute.xlu0 %763 }
 0x1a5   : > { %1093 = vrot.lane.b32.xlu0 %v2523_v40, %s3842_s12  ;;  %1007 = vrot.lane.b32.xlu1 %v2541_v45, %s3840_s11 }
 0x1a7   : > { %v2555_v48 = vpop.permute.xlu1 %687  ;;  %v2557_v49 = vpop.permute.xlu0 %773 }
 0x1a9   : > { %1103 = vrot.lane.b32.xlu0 %v2523_v40, %s3833_s13  ;;  %1017 = vrot.lane.b32.xlu1 %v2541_v45, %s3835_s9 }
 0x1ab   : > { %v2563_v50 = vpop.permute.xlu1 %697  ;;  %v2565_v51 = vpop.permute.xlu0 %791 }
 0x1ad   : > { %1113 = vrot.lane.b32.xlu0 %v2523_v40, %s3829_s2  ;;  %1027 = vrot.lane.b32.xlu1 %v2541_v45, %s3842_s12 }
 0x1af   : > { %v2571_v52 = vpop.permute.xlu1 %707  ;;  %v2573_v53 = vpop.permute.xlu0 %801 }
 0x1b1   : > { %1131 = vrot.lane.b32.xlu0 %v2575_v54, %s3831_s7  ;;  %1037 = vrot.lane.b32.xlu1 %v2541_v45, %s3833_s13 }
 0x1b3   : > { %v2581_v55 = vpop.permute.xlu1 %725  ;;  %v2583_v56 = vpop.permute.xlu0 %811 }
 0x1b5   : > { %1141 = vrot.lane.b32.xlu0 %v2575_v54, %s3840_s11  ;;  %1047 = vrot.lane.b32.xlu1 %v2541_v45, %s3829_s2  ;;  %v2707_v45 = vld [vmem:[#allocation4 + $0x21] sm:$0xff] }
 0x1b7   : > { %v2589_v57 = vpop.permute.xlu1 %735  ;;  %v2591_v58 = vpop.permute.xlu0 %821 }
 0x1b8   : > { %3931 = vst [vmem:[#allocation31_spill] sm:$0xff] %v2589_v57  ;;  %v873_v57 = vstv %s2775_s14  ;;  %s2933_s14 = sld [smem:[#allocation10 + $0x28]] }
 0x1b9   : > { %1151 = vrot.lane.b32.xlu0 %v2575_v54, %s3835_s9  ;;  %1065 = vrot.lane.b32.xlu1 %v2593_v59, %s3831_s7 }
 0x1bb   : > { %v2599_v60 = vpop.permute.xlu1 %745  ;;  %v2601_v61 = vpop.permute.xlu0 %831 }
 0x1bc   : > { %3933 = vst [vmem:[#allocation33_spill] sm:$0xff] %v2599_v60 }
 0x1bd   : > { %1161 = vrot.lane.b32.xlu0 %v2575_v54, %s3842_s12  ;;  %1075 = vrot.lane.b32.xlu1 %v2593_v59, %s3840_s11 }
 0x1be   : > { %4001 = sst [smem:[#allocation74_spill]] %s2933_s14 }
 0x1bf   : > { %v2607_v62 = vpop.permute.xlu1 %755  ;;  %v2609_v63 = vpop.permute.xlu0 %841 }
 0x1c1   : > { %1171 = vrot.lane.b32.xlu0 %v2575_v54, %s3833_s13  ;;  %1085 = vrot.lane.b32.xlu1 %v2593_v59, %s3835_s9 }
 0x1c3   : > { %v2615_v0 = vpop.permute.xlu1 %765  ;;  %v2617_v1 = vpop.permute.xlu0 %859 }
 0x1c4   : > { %3934 = vst [vmem:[#allocation34_spill] sm:$0xff] %v2615_v0  ;;  %v913_v0 = vstv %s2800_s8  ;;  %s2941_s8 = sld [smem:[#allocation10 + $0x2b]] }
 0x1c5   : > { %1181 = vrot.lane.b32.xlu0 %v2575_v54, %s3829_s2  ;;  %1095 = vrot.lane.b32.xlu1 %v2593_v59, %s3842_s12 }
 0x1c7   : > { %v2623_v2 = vpop.permute.xlu1 %775  ;;  %v2625_v4 = vpop.permute.xlu0 %869 }
 0x1c8   : > { %3935 = vst [vmem:[#allocation35_spill] sm:$0xff] %v2623_v2 }
 0x1c9   : > { %1105 = vrot.lane.b32.xlu1 %v2593_v59, %s3833_s13  ;;  %1199 = vrot.lane.b32.xlu0 %v2627_v5, %s3831_s7 }
 0x1ca   : > { %4002 = sst [smem:[#allocation75_spill]] %s2941_s8 }
 0x1cb   : > { %v2633_v6 = vpop.permute.xlu1 %793  ;;  %v2635_v7 = vpop.permute.xlu0 %879 }
 0x1cd   : > { %1115 = vrot.lane.b32.xlu1 %v2593_v59, %s3829_s2  ;;  %1209 = vrot.lane.b32.xlu0 %v2627_v5, %s3840_s11 }
 0x1cf   : > { %v2641_v8 = vpop.permute.xlu1 %803  ;;  %v2643_v9 = vpop.permute.xlu0 %889 }
 0x1d0   : > { %3937 = vst [vmem:[#allocation37_spill] sm:$0xff] %v2641_v8  ;;  %v3859_v8 = vstv %s2721_s27 }
 0x1d1   : > { %1133 = vrot.lane.b32.xlu1 %v2645_v10, %s3831_s7  ;;  %1219 = vrot.lane.b32.xlu0 %v2627_v5, %s3835_s9 }
 0x1d3   : > { %v2651_v11 = vpop.permute.xlu1 %813  ;;  %v2653_v12 = vpop.permute.xlu0 %899 }
 0x1d4   : > { %3939 = vst [vmem:[#allocation39_spill] sm:$0xff] %v2651_v11  ;;  %v690_v11 = vmul.f32 %v3859_v8, %v2495_v34  ;;  %v2836_v34 = vld [vmem:[#allocation4 + $0x1b] sm:$0xff] }
 0x1d5   : > { %1143 = vrot.lane.b32.xlu1 %v2645_v10, %s3840_s11  ;;  %1229 = vrot.lane.b32.xlu0 %v2627_v5, %s3842_s12 }
 0x1d7   : > { %v2659_v13 = vpop.permute.xlu1 %823  ;;  %v2661_v14 = vpop.permute.xlu0 %909 }
 0x1d8   : > { %3940 = vst [vmem:[#allocation40_spill] sm:$0xff] %v2659_v13  ;;  %v3970_v13 = vstv %s2697_s5  ;;  %s2816_s5 = sld [smem:[#allocation10 + $0x1f]] }
 0x1d9   : > { %1153 = vrot.lane.b32.xlu1 %v2645_v10, %s3835_s9  ;;  %1239 = vrot.lane.b32.xlu0 %v2627_v5, %s3833_s13 }
 0x1db   : > { %v2667_v16 = vpop.permute.xlu1 %833  ;;  %v2669_v17 = vpop.permute.xlu0 %927 }
 0x1dc   : > { %3941 = vst [vmem:[#allocation41_spill] sm:$0xff] %v2667_v16  ;;  %v2798_v16 = vmul.f32 %v3970_v13, %v2395_v24  ;;  %v3975_v24 = vstv %s2703_s21  ;;  %s2843_s21 = sld [smem:[#allocation10 + $0x16]] }
 0x1dd   : > { %1163 = vrot.lane.b32.xlu1 %v2645_v10, %s3842_s12  ;;  %1249 = vrot.lane.b32.xlu0 %v2627_v5, %s3829_s2  ;;  %v2814_v13 = vmul.f32 %v3975_v24, %v2423_v26 }
 0x1de   : > { %3976 = sst [smem:[#allocation67_spill]] %s2816_s5 }
 0x1df   : > { %v2675_v18 = vpop.permute.xlu1 %843  ;;  %v2677_v19 = vpop.permute.xlu0 %937 }
 0x1e0   : > { %3942 = vst [vmem:[#allocation42_spill] sm:$0xff] %v2675_v18 }
 0x1e1   : > { %1173 = vrot.lane.b32.xlu1 %v2645_v10, %s3833_s13  ;;  %1267 = vrot.lane.b32.xlu0 %v2679_v21, %s3831_s7  ;;  %s2733_s13 = sld [smem:[#allocation10 + $0x9]] }
 0x1e3   : > { %v2685_v22 = vpop.permute.xlu1 %861  ;;  %v2687_v23 = vpop.permute.xlu0 %947 }
 0x1e4   : > { %3944 = vst [vmem:[#allocation44_spill] sm:$0xff] %v2685_v22 }
 0x1e5   : > { %1183 = vrot.lane.b32.xlu1 %v2645_v10, %s3829_s2  ;;  %1277 = vrot.lane.b32.xlu0 %v2679_v21, %s3840_s11  ;;  %s2729_s2 = sld [smem:[#allocation10 + $0x6]] }
 0x1e7   : > { %v2699_v5 = vpop.permute.xlu1 %871  ;;  %v2701_v59 = vpop.permute.xlu0 %957  ;;  %3954 = sst [smem:[#allocation54_spill]] %s2733_s13 }
 0x1e8   : > { %3947 = vst [vmem:[#allocation47_spill] sm:$0xff] %v2699_v5 }
 0x1e9   : > { %1201 = vrot.lane.b32.xlu1 %v2707_v45, %s3831_s7  ;;  %1287 = vrot.lane.b32.xlu0 %v2679_v21, %s3835_s9  ;;  %s2731_s7 = sld [smem:[#allocation10 + $0x8]]  ;;  %s2735_s9 = sld [smem:[#allocation10 + $0xb]] }
 0x1eb   : > { %v2725_v10 = vpop.permute.xlu1 %881  ;;  %v2727_v35 = vpop.permute.xlu0 %967  ;;  %3952 = sst [smem:[#allocation52_spill]] %s2729_s2 }
 0x1ec   : > { %3951 = vst [vmem:[#allocation51_spill] sm:$0xff] %v2725_v10  ;;  %v3969_v10 = vstv %s2695_s4 }
 0x1ed   : > { %1211 = vrot.lane.b32.xlu1 %v2707_v45, %s3840_s11  ;;  %1297 = vrot.lane.b32.xlu0 %v2679_v21, %s3842_s12  ;;  %s2753_s11 = sld [smem:[#allocation10 + $0x10]]  ;;  %s2755_s12 = sld [smem:[#allocation10 + $0x11]]  ;;  %v718_v18 = vmul.f32 %v3969_v10, %v2363_v15 }
 0x1ef   : > { %3953 = sst [smem:[#allocation53_spill]] %s2731_s7  ;;  %v2749_v22 = vpop.permute.xlu1 %891  ;;  %v2751_v54 = vpop.permute.xlu0 %977  ;;  %v3979_v26 = vstv %s2735_s9  ;;  %v3980_v8 = vstv %s2731_s7  ;;  %s2872_s7 = sld [smem:[#allocation10 + $0x1d]] }
 0x1f0   : > { %3955 = sst [smem:[#allocation55_spill]] %s2735_s9  ;;  %3959 = vst [vmem:[#allocation59_spill] sm:$0xff] %v2749_v22  ;;  %v3967_v22 = vstv %s2693_s29  ;;  %v758_v24 = vmul.f32 %v3979_v26, %v2539_v44  ;;  %v728_v60 = vmul.f32 %v3980_v8, %v2515_v38  ;;  %s2845_s29 = sld [smem:[#allocation10 + $0x19]]  ;;  %v3983_v44 = vstv %s2709_s28 }
 0x1f1   : > { %1221 = vrot.lane.b32.xlu1 %v2707_v45, %s3963_s15  ;;  %1307 = vrot.lane.b32.xlu0 %v2679_v21, %s3964_s19  ;;  %v650_v29 = vmul.f32 %v3967_v22, %v2337_v3  ;;  %v3974_v3 = vstv %s2719_s26  ;;  %v3978_v22 = vstv %s2723_s6  ;;  %s3982_s9 = smov 127   ;;  %v660_v38 = vmul.f32 %v3983_v44, %v2475_v30  ;;  %s2874_s28 = sld [smem:[#allocation10 + $0x1e]] }
 0x1f2   : > { %v680_v15 = vmul.f32 %v3974_v3, %v2489_v33  ;;  %v700_v10 = vmul.f32 %v3978_v22, %v2503_v36  ;;  %v3981_v36 = vstv %s2705_s23  ;;  %v3984_v26 = vstv %s2747_s18  ;;  %s2863_s23 = sld [smem:[#allocation10 + $0x1a]]  ;;  %s2899_s18 = sld [smem:[#allocation10 + $0x27]] }
 0x1f3   : > { %3960 = sst [smem:[#allocation60_spill]] %s2753_s11  ;;  %v2777_v5 = vpop.permute.xlu1 %901  ;;  %v2779_v2 = vpop.permute.xlu0 %995  ;;  %v2850_v22 = vmul.f32 %v3981_v36, %v2451_v28  ;;  %v692_v28 = vadd.f32 %v690_v11, %v650_v29  ;;  %v3985_v36 = vstv %s2733_s13  ;;  %v3988_v11 = vstv %s2760_s16  ;;  %s2893_s13 = sld [smem:[#allocation10 + $0x21]] }
 0x1f4   : > { %3961 = sst [smem:[#allocation61_spill]] %s2755_s12  ;;  %3966 = vst [vmem:[#allocation64_spill] sm:$0xff] %v2777_v5  ;;  %v720_v8 = vadd.f32 %v718_v18, %v680_v15  ;;  %v796_v5 = vmul.f32 %v3984_v26, %v2565_v51  ;;  %v702_v18 = vadd.f32 %v700_v10, %v660_v38  ;;  %v883_v15 = vstv %s2788_s3  ;;  %s3992_s16 = smov 126  }
 0x1f5   : > { %1231 = vrot.lane.b32.xlu1 %v2707_v45, %s3972_s17  ;;  %1317 = vrot.lane.b32.xlu0 %v2679_v21, %s3973_s25  ;;  %v738_v21 = vmul.f32 %v3985_v36, %v2521_v39  ;;  %3987 = sst [smem:[#allocation69_spill]] %s2872_s7  ;;  %v836_v39 = vmul.f32 %v3988_v11, %v2601_v61  ;;  %v730_v44 = vadd.f32 %v728_v60, %v692_v28  ;;  %v3990_v26 = vstv %s2745_s30  ;;  %s2908_s30 = sld [smem:[#allocation10 + $0x22]] }
 0x1f6   : > { %v760_v29 = vadd.f32 %v758_v24, %v720_v8  ;;  %v778_v36 = vmul.f32 %v3990_v26, %v2557_v49  ;;  %v874_v49 = vmul.f32 %v873_v57, %v2625_v4  ;;  %v951_v10 = vstv %s2816_s5  ;;  %s2969_s5 = sld [smem:[#allocation10 + $0x29]]  ;;  %s2971_s3 = sld [smem:[#allocation10 + $0x2c]] }
 0x1f7   : > { %v2824_v33 = vpop.permute.xlu1 %911  ;;  %v2826_v3 = vpop.permute.xlu0 %1005  ;;  %v740_v38 = vadd.f32 %v738_v21, %v702_v18  ;;  %v4000_v26 = vstv %s2768_s24  ;;  %v914_v21 = vmul.f32 %v913_v0, %v2661_v14  ;;  %v884_v14 = vmul.f32 %v883_v15, %v2635_v7 }
 0x1f8   : > { %3977 = vst [vmem:[#allocation68_spill] sm:$0xff] %v2824_v33  ;;  %v768_v33 = vmul.f32 %v3986_v27, %v2549_v47  ;;  %v3989_v27 = vstv %s2729_s2  ;;  %3993 = sst [smem:[#allocation71_spill]] %s2899_s18  ;;  %v798_v61 = vadd.f32 %v796_v5, %v760_v29  ;;  %s2910_s2 = sld [smem:[#allocation10 + $0x24]]  ;;  %v3997_v5 = vstv %s2741_s0 }
 0x1f9   : > { %1241 = vrot.lane.b32.xlu1 %v2707_v45, %s3964_s19  ;;  %1335 = vrot.lane.b32.xlu0 %v2836_v34, %s3982_s9  ;;  %v710_v47 = vmul.f32 %v3989_v27, %v2509_v37  ;;  %3991 = sst [smem:[#allocation70_spill]] %s2893_s13  ;;  %v3994_v37 = vstv %s2753_s11  ;;  %v748_v8 = vmul.f32 %v3997_v5, %v2531_v42  ;;  %s2918_s11 = sld [smem:[#allocation10 + $0x25]]  ;;  %v3999_v29 = vstv %s2755_s12  ;;  %v2931_v42 = vld [vmem:[#allocation4 + $0x22] sm:$0xff] }
 0x1fa   : > { %v806_v60 = vmul.f32 %v3994_v37, %v2573_v53  ;;  %v770_v28 = vadd.f32 %v768_v33, %v730_v44  ;;  %v816_v11 = vmul.f32 %v3999_v29, %v2583_v56  ;;  %v838_v27 = vadd.f32 %v836_v39, %v798_v61  ;;  %s2949_s12 = sld [smem:[#allocation10 + $0x26]] }
 0x1fb   : > { %v2876_v30 = vpop.permute.xlu1 %929  ;;  %v2878_v51 = vpop.permute.xlu0 %1015  ;;  %3995 = sst [smem:[#allocation72_spill]] %s2908_s30  ;;  %v780_v18 = vadd.f32 %v778_v36, %v740_v38  ;;  %v863_v44 = vstv %s2843_s21  ;;  %v893_v37 = vstv %s2845_s29  ;;  %v952_v39 = vmul.f32 %v951_v10, %v2687_v23  ;;  %s3436_s29 = sld [smem:[#allocation10 + $0x45]] }
 0x1fc   : > { %v808_v56 = vadd.f32 %v806_v60, %v770_v28  ;;  %v903_v36 = vstv %s2863_s23  ;;  %v931_v61 = vstv %s2872_s7  ;;  %v961_v7 = vstv %s2884_s1  ;;  %4006 = sst [smem:[#allocation77_spill]] %s2969_s5  ;;  %s3018_s7 = sld [smem:[#allocation10 + $0x2a]] }
 0x1fd   : > { %1251 = vrot.lane.b32.xlu1 %v2707_v45, %s3973_s25  ;;  %1345 = vrot.lane.b32.xlu0 %v2836_v34, %s3992_s16  ;;  %v3996_v45 = vstv %s2717_s22  ;;  %v4004_v28 = vstv %s2758_s10  ;;  %4007 = sst [smem:[#allocation78_spill]] %s2971_s3  ;;  %s3462_s21 = sld [smem:[#allocation10 + $0x48]] }
 0x1fe   : > { %v670_v24 = vmul.f32 %v3996_v45, %v2481_v31  ;;  %v846_v31 = vmul.f32 %v4000_v26, %v2609_v63  ;;  %v876_v63 = vadd.f32 %v874_v49, %v838_v27  ;;  %v941_v45 = vstv %s2874_s28  ;;  %s4081_s28 = sld [smem:[#allocation77_spill]]  ;;  %s3453_s1 = sld [smem:[#allocation10 + $0x47]] }
 0x1ff   : > { %3998 = sst [smem:[#allocation73_spill]] %s2918_s11  ;;  %v2920_v53 = vpop.permute.xlu1 %939  ;;  %v1026_v4 = vpop.permute.xlu0 %1025  ;;  %v818_v49 = vadd.f32 %v816_v11, %v780_v18  ;;  %v826_v23 = vmul.f32 %v4004_v28, %v2591_v58  ;;  %v971_v29 = vstv %s2893_s13  ;;  %v1029_v26 = vstv %s2899_s18  ;;  %s3003_s18 = sld [smem:[#allocation10 + $0x2d]] }
 0x200   : > { %v712_v33 = vadd.f32 %v710_v47, %v670_v24  ;;  %4003 = sst [smem:[#allocation76_spill]] %s2949_s12  ;;  %v848_v38 = vadd.f32 %v846_v31, %v808_v56  ;;  %v916_v5 = vadd.f32 %v914_v21, %v876_v63  ;;  %v981_v31 = vstv %s2908_s30  ;;  %s3030_s13 = sld [smem:[#allocation10 + $0x2e]] }
 0x201   : > { %1269 = vrot.lane.b32.xlu1 %v2931_v42, %s3982_s9  ;;  %1355 = vrot.lane.b32.xlu0 %v2836_v34, %s3963_s15  ;;  %v894_v18 = vmul.f32 %v893_v37, %v2643_v9  ;;  %v3897_v56 = vstv %s2918_s11  ;;  %v904_v9 = vmul.f32 %v903_v36, %v2653_v12  ;;  %v3896_v12 = vstv %s2949_s12  ;;  %s3058_s11 = sld [smem:[#allocation10 + $0x2f]]  ;;  %s4012_s12 = sld [smem:[#allocation45_spill]] }
 0x202   : > { %v750_v47 = vadd.f32 %v748_v8, %v712_v33  ;;  %v4005_v8 = vstv %s2715_s20  ;;  %v886_v58 = vadd.f32 %v884_v14, %v848_v38  ;;  %v954_v11 = vadd.f32 %v952_v39, %v916_v5  ;;  %4009 = sst [smem:[#allocation80_spill]] %s3018_s7  ;;  %s3072_s30 = sld [smem:[#allocation10 + $0x30]] }
 0x203   : > { %v2954_v24 = vpop.permute.xlu1 %949  ;;  %v1036_v60 = vpop.permute.xlu0 %1035  ;;  %v990_v27 = vmul.f32 %v4005_v8, %v2483_v32  ;;  %v999_v32 = vstv %s2910_s2  ;;  %v864_v33 = vmul.f32 %v863_v44, %v2617_v1  ;;  %v856_v14 = vadd.f32 %v2814_v13, %v818_v49  ;;  %s4080_s2 = sld [smem:[#allocation76_spill]]  ;;  %s3563_s23 = sld [smem:[#allocation10 + $0x52]] }
 0x204   : > { %v788_v21 = vadd.f32 %v2798_v16, %v750_v47  ;;  %v962_v39 = vmul.f32 %v961_v7, %v2701_v59  ;;  %v1030_v16 = vmul.f32 %v1029_v26, %v1026_v4  ;;  %v1039_v47 = vstv %s2933_s14  ;;  %s4014_s14 = sld [smem:[#allocation53_spill]] }
 0x205   : > { %1279 = vrot.lane.b32.xlu1 %v2931_v42, %s3992_s16  ;;  %1365 = vrot.lane.b32.xlu0 %v2836_v34, %s3972_s17  ;;  %v932_v38 = vmul.f32 %v931_v61, %v2669_v17  ;;  %v1067_v59 = vstv %s2941_s8  ;;  %4008 = sst [smem:[#allocation79_spill]] %s3003_s18  ;;  %v924_v13 = vadd.f32 %v2850_v22, %v886_v58  ;;  %v1000_v4 = vmul.f32 %v999_v32, %v2779_v2  ;;  %s3042_s8 = sld [smem:[#allocation10 + $0x31]] }
 0x206   : > { %v828_v1 = vadd.f32 %v826_v23, %v788_v21  ;;  %v992_v49 = vadd.f32 %v990_v27, %v954_v11  ;;  %v896_v5 = vadd.f32 %v894_v18, %v856_v14  ;;  %v942_v23 = vmul.f32 %v941_v45, %v2677_v19 }
 0x207   : > { %v2983_v63 = vpop.permute.xlu1 %959  ;;  %v1046_v28 = vpop.permute.xlu0 %1045  ;;  %v972_v8 = vmul.f32 %v971_v29, %v2727_v35  ;;  %v964_v2 = vadd.f32 %v962_v39, %v924_v13  ;;  %v1040_v27 = vmul.f32 %v1039_v47, %v1036_v60  ;;  %v3895_v19 = vstv %s2969_s5  ;;  %s4011_s5 = sld [smem:[#allocation50_spill]] }
 0x208   : > { %v866_v17 = vadd.f32 %v864_v33, %v828_v1  ;;  %v1032_v58 = vadd.f32 %v1030_v16, %v992_v49  ;;  %v934_v18 = vadd.f32 %v932_v38, %v896_v5  ;;  %v3893_v35 = vstv %s2971_s3  ;;  %s4010_s3 = sld [smem:[#allocation55_spill]] }
 0x209   : > { %1289 = vrot.lane.b32.xlu1 %v2931_v42, %s3963_s15  ;;  %1375 = vrot.lane.b32.xlu0 %v2836_v34, %s3964_s19  ;;  %v982_v60 = vmul.f32 %v981_v31, %v2751_v54  ;;  %v1002_v14 = vadd.f32 %v1000_v4, %v964_v2  ;;  %v1010_v39 = vmul.f32 %v3897_v56, %v2826_v3  ;;  %v3051_v3 = vld [vmem:[#allocation4 + $0x1c] sm:$0xff]  ;;  %v3892_v5 = vstv %s3003_s18  ;;  %s4017_s18 = sld [smem:[#allocation58_spill]] }
 0x20a   : > { %v906_v33 = vadd.f32 %v904_v9, %v866_v17  ;;  %v974_v9 = vadd.f32 %v972_v8, %v934_v18  ;;  %v1020_v49 = vmul.f32 %v3896_v12, %v2878_v51  ;;  %v1050_v54 = vmul.f32 %v3895_v19, %v1046_v28  ;;  %v4052_v12 = vld [vmem:[#allocation39_spill] sm:$0xff] }
 0x20b   : > { %v3016_v21 = vpop.permute.xlu1 %969  ;;  %v1064_v22 = vpop.permute.xlu0 %1063  ;;  %v1042_v17 = vadd.f32 %v1040_v27, %v1002_v14  ;;  %v3891_v2 = vstv %s3018_s7  ;;  %v4013_v18 = vstv %s2719_s26  ;;  %s4020_s26 = sld [smem:[#allocation52_spill]]  ;;  %s4022_s7 = sld [smem:[#allocation56_spill]] }
 0x20c   : > { %v1068_v11 = vmul.f32 %v1067_v59, %v1064_v22  ;;  %v944_v1 = vadd.f32 %v942_v23, %v906_v33  ;;  %v1012_v23 = vadd.f32 %v1010_v39, %v974_v9  ;;  %v3890_v33 = vstv %s3030_s13 }
 0x20d   : > { %1299 = vrot.lane.b32.xlu1 %v2931_v42, %s3972_s17  ;;  %1385 = vrot.lane.b32.xlu0 %v2836_v34, %s3973_s25  ;;  %v1058_v39 = vmul.f32 %v3891_v2, %v2523_v40  ;;  %v4034_v2 = vld [vmem:[#allocation34_spill] sm:$0xff] }
 0x20e   : > { %v3038_v16 = vadd.f32 %v1068_v11, %v1032_v58  ;;  %v984_v51 = vadd.f32 %v982_v60, %v944_v1  ;;  %v1052_v27 = vadd.f32 %v1050_v54, %v1012_v23  ;;  %v681_v60 = vmul.f32 %v4013_v18, %v2547_v46 }
 0x20f   : > { %v3040_v38 = vpop.permute.xlu1 %979  ;;  %v1074_v13 = vpop.permute.xlu0 %1073  ;;  %v4015_v1 = vstv %s2695_s4  ;;  %v4018_v46 = vstv %s2723_s6  ;;  %v4019_v23 = vstv %s4010_s3  ;;  %s4021_s4 = sld [smem:[#allocation54_spill]]  ;;  %v4024_v18 = vstv %s4012_s12  ;;  %s4026_s3 = sld [smem:[#allocation62_spill]] }
 0x210   : > { %v1078_v4 = vmul.f32 %v3893_v35, %v1074_v13  ;;  %v1022_v58 = vadd.f32 %v1020_v49, %v984_v51  ;;  %v719_v9 = vmul.f32 %v4015_v1, %v2405_v25  ;;  %v4016_v13 = vstv %s2721_s27  ;;  %s3115_s27 = sld [smem:[#allocation10 + $0x32]]  ;;  %s4028_s12 = sld [smem:[#allocation60_spill]] }
 0x211   : > { %1309 = vrot.lane.b32.xlu1 %v2931_v42, %s3964_s19  ;;  %1403 = vrot.lane.b32.xlu0 %v3051_v3, %s3982_s9  ;;  %v691_v49 = vmul.f32 %v4016_v13, %v2555_v48  ;;  %v701_v51 = vmul.f32 %v4018_v46, %v2563_v50  ;;  %v4023_v48 = vstv %s4011_s5  ;;  %v651_v1 = vmul.f32 %v4024_v18, %v2373_v20  ;;  %v4031_v18 = vld [vmem:[#allocation31_spill] sm:$0xff]  ;;  %s4079_s5 = sld [smem:[#allocation73_spill]]  ;;  %s3290_s6 = sld [smem:[#allocation10 + $0x39]] }
 0x212   : > { %v3060_v28 = vadd.f32 %v1078_v4, %v1042_v17  ;;  %v1125_v4 = vstv %s3042_s8  ;;  %v1060_v40 = vadd.f32 %v1058_v39, %v1022_v58  ;;  %v4025_v13 = vstv %s4014_s14  ;;  %s4033_s14 = sld [smem:[#allocation57_spill]]  ;;  %s3404_s8 = sld [smem:[#allocation10 + $0x42]] }
 0x213   : > { %v3062_v8 = vpop.permute.xlu1 %997  ;;  %v1084_v22 = vpop.permute.xlu0 %1083  ;;  %v729_v50 = vmul.f32 %v4025_v13, %v2581_v55  ;;  %v4027_v58 = vstv %s2717_s22  ;;  %v721_v20 = vadd.f32 %v719_v9, %v681_v60  ;;  %v4029_v39 = vstv %s4017_s18  ;;  %s4043_s18 = sld [smem:[#allocation61_spill]]  ;;  %s3150_s22 = sld [smem:[#allocation10 + $0x33]] }
 0x214   : > { %v1088_v11 = vmul.f32 %v3892_v5, %v1084_v22  ;;  %v759_v22 = vmul.f32 %v4019_v23, %v2607_v62  ;;  %v3894_v62 = vstv %s3058_s11  ;;  %v797_v55 = vmul.f32 %v4029_v39, %v2633_v6  ;;  %v4037_v6 = vld [vmem:[#allocation41_spill] sm:$0xff] }
 0x215   : > { %1319 = vrot.lane.b32.xlu1 %v2931_v42, %s3973_s25  ;;  %1413 = vrot.lane.b32.xlu0 %v3051_v3, %s3992_s16  ;;  %v693_v46 = vadd.f32 %v691_v49, %v651_v1  ;;  %v4030_v23 = vstv %s4020_s26  ;;  %v4032_v13 = vstv %s4021_s4  ;;  %v4039_v1 = vld [vmem:[#allocation33_spill] sm:$0xff]  ;;  %s4054_s26 = sld [smem:[#allocation46_spill]] }
 0x216   : > { %v3077_v14 = vadd.f32 %v1088_v11, %v1052_v27  ;;  %v3099_v27 = vld [vmem:[#allocation4 + $0x23] sm:$0xff]  ;;  %v661_v11 = vmul.f32 %v4023_v48, %v2529_v41  ;;  %v671_v41 = vmul.f32 %v4027_v58, %v2537_v43  ;;  %v711_v48 = vmul.f32 %v4030_v23, %v2571_v52  ;;  %s3178_s4 = sld [smem:[#allocation10 + $0x34]] }
 0x217   : > { %v3088_v17 = vpop.permute.xlu1 %1007  ;;  %v1094_v54 = vpop.permute.xlu0 %1093  ;;  %v4035_v5 = vstv %s4022_s7  ;;  %v761_v58 = vadd.f32 %v759_v22, %v721_v20  ;;  %v731_v52 = vadd.f32 %v729_v50, %v693_v46  ;;  %v4040_v39 = vstv %s2741_s0  ;;  %v4048_v20 = vld [vmem:[#allocation47_spill] sm:$0xff]  ;;  %s3266_s7 = sld [smem:[#allocation10 + $0x37]]  ;;  %s4087_s0 = sld [smem:[#allocation79_spill]] }
 0x218   : > { %v1098_v25 = vmul.f32 %v3890_v33, %v1094_v54  ;;  %v739_v33 = vmul.f32 %v4032_v13, %v4031_v18  ;;  %v769_v35 = vmul.f32 %v4035_v5, %v4034_v2  ;;  %v703_v9 = vadd.f32 %v701_v51, %v661_v11  ;;  %v4041_v18 = vld [vmem:[#allocation37_spill] sm:$0xff]  ;;  %v4045_v51 = vld [vmem:[#allocation35_spill] sm:$0xff] }
 0x219   : > { %1337 = vrot.lane.b32.xlu1 %v3099_v27, %s3982_s9  ;;  %1423 = vrot.lane.b32.xlu0 %v3051_v3, %s3963_s15  ;;  %v749_v23 = vmul.f32 %v4040_v39, %v4039_v1  ;;  %v4042_v13 = vstv %s4028_s12  ;;  %v1117_v2 = vstv %s3072_s30  ;;  %v799_v50 = vadd.f32 %v797_v55, %v761_v58  ;;  %v4049_v39 = vld [vmem:[#allocation42_spill] sm:$0xff]  ;;  %v4055_v58 = vld [vmem:[#allocation68_spill] sm:$0xff]  ;;  %s3332_s12 = sld [smem:[#allocation10 + $0x3c]]  ;;  %s3357_s30 = sld [smem:[#allocation10 + $0x3e]] }
 0x21a   : > { %v1100_v54 = vadd.f32 %v1098_v25, %v1060_v40  ;;  %v4038_v40 = vstv %s4026_s3  ;;  %v807_v5 = vmul.f32 %v4042_v13, %v4041_v18  ;;  %v4046_v22 = vstv %s4033_s14  ;;  %s4062_s3 = sld [smem:[#allocation49_spill]]  ;;  %s3426_s14 = sld [smem:[#allocation10 + $0x44]] }
 0x21b   : > { %v3132_v43 = vpop.permute.xlu1 %1017  ;;  %v1104_v60 = vpop.permute.xlu0 %1103  ;;  %v837_v25 = vmul.f32 %v4038_v40, %v4037_v6  ;;  %v779_v11 = vmul.f32 %v4046_v22, %v4045_v51  ;;  %v875_v46 = vmul.f32 %v873_v57, %v4048_v20  ;;  %v713_v6 = vadd.f32 %v711_v48, %v671_v41  ;;  %v4058_v48 = vld [vmem:[#allocation26_spill] sm:$0xff] }
 0x21c   : > { %v1108_v49 = vmul.f32 %v3894_v62, %v1104_v60  ;;  %v741_v40 = vadd.f32 %v739_v33, %v703_v9  ;;  %v771_v1 = vadd.f32 %v769_v35, %v731_v52  ;;  %v4050_v18 = vstv %s2768_s24  ;;  %v4056_v35 = vld [vmem:[#allocation51_spill] sm:$0xff]  ;;  %s4057_s24 = sld [smem:[#allocation48_spill]] }
 0x21d   : > { %1347 = vrot.lane.b32.xlu1 %v3099_v27, %s3992_s16  ;;  %1433 = vrot.lane.b32.xlu0 %v3051_v3, %s3972_s17  ;;  %v847_v13 = vmul.f32 %v4050_v18, %v4049_v39  ;;  %v4053_v56 = vstv %s4043_s18  ;;  %v839_v55 = vadd.f32 %v837_v25, %v799_v50  ;;  %v915_v57 = vmul.f32 %v913_v0, %v4055_v58  ;;  %v4060_v50 = vld [vmem:[#allocation40_spill] sm:$0xff]  ;;  %v4066_v39 = vld [vmem:[#allocation30_spill] sm:$0xff]  ;;  %s4082_s18 = sld [smem:[#allocation78_spill]] }
 0x21e   : > { %v1110_v60 = vadd.f32 %v1108_v49, %v3038_v16  ;;  %v817_v51 = vmul.f32 %v4053_v56, %v4052_v12  ;;  %v751_v49 = vadd.f32 %v749_v23, %v713_v6  ;;  %v809_v33 = vadd.f32 %v807_v5, %v771_v1 }
 0x21f   : > { %v1028_v62 = vpop.permute.xlu1 %1027  ;;  %v1114_v19 = vpop.permute.xlu0 %1113  ;;  %v885_v41 = vmul.f32 %v883_v15, %v4056_v35  ;;  %v1135_v56 = vstv %s3115_s27  ;;  %v781_v0 = vadd.f32 %v779_v11, %v741_v40  ;;  %v877_v12 = vadd.f32 %v875_v46, %v839_v55  ;;  %v4070_v35 = vld [vmem:[#allocation28_spill] sm:$0xff]  ;;  %s3376_s27 = sld [smem:[#allocation10 + $0x40]] }
 0x220   : > { %v1118_v16 = vmul.f32 %v1117_v2, %v1114_v19  ;;  %v953_v19 = vmul.f32 %v951_v10, %v2954_v24  ;;  %v4059_v9 = vstv %s4054_s26  ;;  %v849_v52 = vadd.f32 %v847_v13, %v809_v33  ;;  %s4088_s26 = sld [smem:[#allocation80_spill]] }
 0x221   : > { %1357 = vrot.lane.b32.xlu1 %v3099_v27, %s3963_s15  ;;  %1443 = vrot.lane.b32.xlu0 %v3051_v3, %s3964_s19  ;;  %v787_v25 = vmul.f32 %v4059_v9, %v4058_v48  ;;  %v819_v22 = vadd.f32 %v817_v51, %v781_v0  ;;  %v4061_v20 = vstv %s2758_s10  ;;  %v917_v46 = vadd.f32 %v915_v57, %v877_v12  ;;  %s3203_s10 = sld [smem:[#allocation10 + $0x35]]  ;;  %v4067_v51 = vld [vmem:[#allocation44_spill] sm:$0xff]  ;;  %v4072_v48 = vld [vmem:[#allocation29_spill] sm:$0xff] }
 0x222   : > { %v1120_v15 = vadd.f32 %v1118_v16, %v3060_v28  ;;  %v827_v11 = vmul.f32 %v4061_v20, %v4060_v50  ;;  %v887_v24 = vadd.f32 %v885_v41, %v849_v52  ;;  %v4063_v28 = vld [vmem:[#allocation27_spill] sm:$0xff]  ;;  %v4064_v6 = vstv %s4057_s24  ;;  %v4075_v50 = vld [vmem:[#allocation64_spill] sm:$0xff]  ;;  %s3301_s24 = sld [smem:[#allocation10 + $0x3a]] }
 0x223   : > { %v1038_v23 = vpop.permute.xlu1 %1037  ;;  %v1132_v5 = vpop.permute.xlu0 %1131  ;;  %v855_v40 = vmul.f32 %v4064_v6, %v4063_v28  ;;  %v1145_v1 = vstv %s3150_s22  ;;  %v1126_v18 = vmul.f32 %v1125_v4, %v4066_v39  ;;  %v789_v13 = vadd.f32 %v787_v25, %v751_v49  ;;  %v4069_v16 = vld [vmem:[#allocation59_spill] sm:$0xff]  ;;  %s3387_s22 = sld [smem:[#allocation10 + $0x41]] }
 0x224   : > { %v1136_v10 = vmul.f32 %v1135_v56, %v1132_v5  ;;  %v865_v55 = vmul.f32 %v863_v44, %v4067_v51  ;;  %v955_v58 = vadd.f32 %v953_v19, %v917_v46  ;;  %v895_v33 = vmul.f32 %v893_v37, %v4069_v16  ;;  %v3226_v5 = vld [vmem:[#allocation4 + $0x1d] sm:$0xff] }
 0x225   : > { %1367 = vrot.lane.b32.xlu1 %v3099_v27, %s3972_s17  ;;  %1453 = vrot.lane.b32.xlu0 %v3051_v3, %s3973_s25  ;;  %v4071_v41 = vstv %s4062_s3  ;;  %v963_v12 = vmul.f32 %v961_v7, %v2983_v63  ;;  %v4073_v9 = vstv %s2715_s20  ;;  %v829_v44 = vadd.f32 %v827_v11, %v789_v13  ;;  %s3239_s20 = sld [smem:[#allocation10 + $0x36]]  ;;  %s3318_s3 = sld [smem:[#allocation10 + $0x3b]] }
 0x226   : > { %v3208_v57 = vadd.f32 %v1136_v10, %v1100_v54  ;;  %v923_v0 = vmul.f32 %v4071_v41, %v4070_v35  ;;  %v991_v49 = vmul.f32 %v4073_v9, %v4072_v48  ;;  %v857_v19 = vadd.f32 %v855_v40, %v819_v22 }
 0x227   : > { %v1048_v25 = vpop.permute.xlu1 %1047  ;;  %v1142_v52 = vpop.permute.xlu0 %1141  ;;  %v1031_v54 = vmul.f32 %v1029_v26, %v1028_v62  ;;  %v905_v20 = vmul.f32 %v903_v36, %v4075_v50  ;;  %v933_v7 = vmul.f32 %v931_v61, %v2876_v30  ;;  %v1155_v26 = vstv %s3178_s4  ;;  %s3406_s4 = sld [smem:[#allocation10 + $0x3f]] }
 0x228   : > { %v1146_v37 = vmul.f32 %v1145_v1, %v1142_v52  ;;  %v925_v63 = vadd.f32 %v923_v0, %v887_v24  ;;  %v867_v62 = vadd.f32 %v865_v55, %v829_v44  ;;  %v1001_v36 = vmul.f32 %v999_v32, %v3062_v8 }
 0x229   : > { %1377 = vrot.lane.b32.xlu1 %v3099_v27, %s3964_s19  ;;  %1471 = vrot.lane.b32.xlu0 %v3226_v5, %s3982_s9  ;;  %v993_v22 = vadd.f32 %v991_v49, %v955_v58  ;;  %v897_v61 = vadd.f32 %v895_v33, %v857_v19  ;;  %v943_v11 = vmul.f32 %v941_v45, %v2920_v53  ;;  %v1165_v45 = vstv %s3203_s10  ;;  %s3417_s10 = sld [smem:[#allocation10 + $0x43]] }
 0x22a   : > { %v3244_v30 = vadd.f32 %v1146_v37, %v1110_v60  ;;  %v965_v46 = vadd.f32 %v963_v12, %v925_v63  ;;  %v973_v10 = vmul.f32 %v971_v29, %v3016_v21  ;;  %v1041_v40 = vmul.f32 %v1039_v47, %v1038_v23  ;;  %v4090_v63 = vld [vmem:[#allocation32_spill] sm:$0xff] }
 0x22b   : > { %v1066_v24 = vpop.permute.xlu1 %1065  ;;  %v1152_v28 = vpop.permute.xlu0 %1151  ;;  %v1033_v6 = vadd.f32 %v1031_v54, %v993_v22  ;;  %v907_v60 = vadd.f32 %v905_v20, %v867_v62  ;;  %v935_v39 = vadd.f32 %v933_v7, %v897_v61  ;;  %v983_v53 = vmul.f32 %v981_v31, %v3040_v38 }
 0x22c   : > { %v1069_v32 = vmul.f32 %v1067_v59, %v1066_v24  ;;  %v1156_v8 = vmul.f32 %v1155_v26, %v1152_v28  ;;  %v1003_v29 = vadd.f32 %v1001_v36, %v965_v46  ;;  %v4083_v47 = vstv %s4079_s5  ;;  %s3565_s5 = sld [smem:[#allocation10 + $0x57]] }
 0x22d   : > { %1387 = vrot.lane.b32.xlu1 %v3099_v27, %s3973_s25  ;;  %1481 = vrot.lane.b32.xlu0 %v3226_v5, %s3992_s16  ;;  %v1011_v59 = vmul.f32 %v4083_v47, %v3088_v17  ;;  %v945_v31 = vadd.f32 %v943_v11, %v907_v60  ;;  %v975_v38 = vadd.f32 %v973_v10, %v935_v39  ;;  %v4084_v13 = vstv %s4080_s2  ;;  %s3567_s2 = sld [smem:[#allocation10 + $0x4c]] }
 0x22e   : > { %v1071_v21 = vadd.f32 %v1069_v32, %v1033_v6  ;;  %v3271_v23 = vadd.f32 %v1156_v8, %v1120_v15  ;;  %v1021_v51 = vmul.f32 %v4084_v13, %v3132_v43  ;;  %v1128_v58 = vadd.f32 %v1126_v18, %v3077_v14  ;;  %v3283_v15 = vld [vmem:[#allocation4 + $0x24] sm:$0xff] }
 0x22f   : > { %v1076_v55 = vpop.permute.xlu1 %1075  ;;  %v1162_v16 = vpop.permute.xlu0 %1161  ;;  %v1043_v33 = vadd.f32 %v1041_v40, %v1003_v29  ;;  %v4085_v35 = vstv %s4081_s28  ;;  %v4086_v0 = vstv %s4082_s18  ;;  %v1175_v14 = vstv %s3239_s20  ;;  %v3338_v13 = vld [vmem:[#allocation4 + $0x1e] sm:$0xff]  ;;  %s3492_s20 = sld [smem:[#allocation10 + $0x4b]]  ;;  %s3569_s28 = sld [smem:[#allocation10 + $0x56]] }
 0x230   : > { %v1051_v41 = vmul.f32 %v4085_v35, %v1048_v25  ;;  %v1079_v12 = vmul.f32 %v4086_v0, %v1076_v55  ;;  %v1166_v17 = vmul.f32 %v1165_v45, %v1162_v16  ;;  %v985_v43 = vadd.f32 %v983_v53, %v945_v31  ;;  %s3573_s18 = sld [smem:[#allocation10 + $0x50]] }
 0x231   : > { %1405 = vrot.lane.b32.xlu1 %v3283_v15, %s3982_s9  ;;  %1491 = vrot.lane.b32.xlu0 %v3226_v5, %s3963_s15  ;;  %v1013_v18 = vadd.f32 %v1011_v59, %v975_v38  ;;  %v4089_v19 = vstv %s4087_s0  ;;  %v1185_v50 = vstv %s3266_s7  ;;  %s3576_s7 = sld [smem:[#allocation10 + $0x4d]]  ;;  %s3578_s0 = sld [smem:[#allocation10 + $0x5a]] }
 0x232   : > { %v1081_v48 = vadd.f32 %v1079_v12, %v1043_v33  ;;  %v1168_v9 = vadd.f32 %v1166_v17, %v1128_v58  ;;  %v1023_v52 = vadd.f32 %v1021_v51, %v985_v43  ;;  %v4091_v62 = vstv %s4088_s26  ;;  %v4094_v17 = vld [vmem:[#allocation36_spill] sm:$0xff]  ;;  %s3588_s26 = sld [smem:[#allocation10 + $0x5e]] }
 0x233   : > { %v1086_v49 = vpop.permute.xlu1 %1085  ;;  %v1172_v25 = vpop.permute.xlu0 %1171  ;;  %v1053_v44 = vadd.f32 %v1051_v41, %v1013_v18  ;;  %v1059_v36 = vmul.f32 %v4091_v62, %v4090_v63  ;;  %v4092_v46 = vstv %s3030_s13  ;;  %s3321_s13 = sld [smem:[#allocation10 + $0x38]]  ;;  %v4093_v8 = vstv %s3058_s11  ;;  %s3345_s11 = sld [smem:[#allocation10 + $0x3d]] }
 0x234   : > { %v1089_v54 = vmul.f32 %v4089_v19, %v1086_v49  ;;  %v1176_v37 = vmul.f32 %v1175_v14, %v1172_v25  ;;  %v1213_v53 = vstv %s3301_s24  ;;  %v1233_v41 = vstv %s3332_s12  ;;  %v3369_v25 = vld [vmem:[#allocation4 + $0x25] sm:$0xff]  ;;  %s3590_s24 = sld [smem:[#allocation10 + $0x5b]]  ;;  %s3606_s12 = sld [smem:[#allocation10 + $0x54]] }
 0x235   : > { %1415 = vrot.lane.b32.xlu1 %v3283_v15, %s3992_s16  ;;  %1501 = vrot.lane.b32.xlu0 %v3226_v5, %s3972_s17  ;;  %v1061_v11 = vadd.f32 %v1059_v36, %v1023_v52  ;;  %v4095_v36 = vld [vmem:[#allocation38_spill] sm:$0xff] }
 0x236   : > { %v3303_v20 = vadd.f32 %v1089_v54, %v1053_v44  ;;  %v1178_v7 = vadd.f32 %v1176_v37, %v3208_v57  ;;  %v1203_v57 = vstv %s3290_s6  ;;  %s3580_s6 = sld [smem:[#allocation10 + $0x51]] }
 0x237   : > { %v1096_v22 = vpop.permute.xlu1 %1095  ;;  %v1182_v61 = vpop.permute.xlu0 %1181 }
 0x238   : > { %v1099_v10 = vmul.f32 %v4092_v46, %v1096_v22  ;;  %v1186_v24 = vmul.f32 %v1185_v50, %v1182_v61  ;;  %v1127_v22 = vmul.f32 %v1125_v4, %v4095_v36  ;;  %v1984_v36 = vld [vmem:[#allocation4 + $0x21] sm:$0xff] }
 0x239   : > { %1425 = vrot.lane.b32.xlu1 %v3283_v15, %s3963_s15  ;;  %1511 = vrot.lane.b32.xlu0 %v3226_v5, %s3964_s19  ;;  %v1193_v16 = vstv %s3321_s13  ;;  %v1243_v52 = vstv %s3345_s11  ;;  %s3598_s13 = sld [smem:[#allocation10 + $0x5f]]  ;;  %s3609_s11 = sld [smem:[#allocation10 + $0x58]] }
 0x23a   : > { %v1101_v28 = vadd.f32 %v1099_v10, %v1061_v11  ;;  %v1188_v6 = vadd.f32 %v1186_v24, %v3244_v30  ;;  %v1194_v43 = vmul.f32 %v1193_v16, %v4094_v17  ;;  %v1129_v11 = vadd.f32 %v1127_v22, %v3303_v20 }
 0x23b   : > { %v1106_v40 = vpop.permute.xlu1 %1105  ;;  %v1200_v32 = vpop.permute.xlu0 %1199  ;;  %v1271_v24 = vstv %s3376_s27  ;;  %v1195_v22 = vmul.f32 %v1984_v36, %v1193_v16  ;;  %s3626_s27 = sld [smem:[#allocation10 + $0x5c]] }
 0x23c   : > { %v1109_v60 = vmul.f32 %v4093_v8, %v1106_v40  ;;  %v1204_v39 = vmul.f32 %v1203_v57, %v1200_v32  ;;  %v1281_v32 = vstv %s3387_s22  ;;  %s3628_s22 = sld [smem:[#allocation10 + $0x5d]] }
 0x23d   : > { %1435 = vrot.lane.b32.xlu1 %v3283_v15, %s3972_s17  ;;  %1521 = vrot.lane.b32.xlu0 %v3226_v5, %s3973_s25 }
 0x23e   : > { %v1111_v30 = vadd.f32 %v1109_v60, %v1071_v21  ;;  %v1206_v29 = vadd.f32 %v1204_v39, %v1168_v9  ;;  %v1223_v21 = vstv %s3318_s3  ;;  %v1196_v9 = vadd.f32 %v1194_v43, %v3271_v23  ;;  %s3595_s3 = sld [smem:[#allocation10 + $0x55]] }
 0x23f   : > { %v1116_v47 = vpop.permute.xlu1 %1115  ;;  %v1210_v59 = vpop.permute.xlu0 %1209 }
 0x240   : > { %v1119_v31 = vmul.f32 %v1117_v2, %v1116_v47  ;;  %v1214_v38 = vmul.f32 %v1213_v53, %v1210_v59  ;;  %v1291_v47 = vstv %s3404_s8  ;;  %s3641_s8 = sld [smem:[#allocation10 + $0x60]] }
 0x241   : > { %1445 = vrot.lane.b32.xlu1 %v3283_v15, %s3964_s19  ;;  %1539 = vrot.lane.b32.xlu0 %v3338_v13, %s3982_s9 }
 0x242   : > { %v1121_v51 = vadd.f32 %v1119_v31, %v1081_v48  ;;  %v1216_v55 = vadd.f32 %v1214_v38, %v1178_v7  ;;  %v1253_v7 = vstv %s3357_s30  ;;  %s3611_s30 = sld [smem:[#allocation10 + $0x59]] }
 0x243   : > { %v1134_v58 = vpop.permute.xlu1 %1133  ;;  %v1220_v2 = vpop.permute.xlu0 %1219 }
 0x244   : > { %v1137_v33 = vmul.f32 %v1135_v56, %v1134_v58  ;;  %v1224_v35 = vmul.f32 %v1223_v21, %v1220_v2  ;;  %v1301_v2 = vstv %s3417_s10  ;;  %s3688_s10 = sld [smem:[#allocation5]] }
 0x245   : > { %1455 = vrot.lane.b32.xlu1 %v3283_v15, %s3973_s25  ;;  %1549 = vrot.lane.b32.xlu0 %v3338_v13, %s3992_s16 }
 0x246   : > { %v1139_v0 = vadd.f32 %v1137_v33, %v1101_v28  ;;  %v3359_v12 = vadd.f32 %v1224_v35, %v1188_v6 }
 0x247   : > { %v1144_v56 = vpop.permute.xlu1 %1143  ;;  %v1230_v18 = vpop.permute.xlu0 %1229 }
 0x248   : > { %v1147_v48 = vmul.f32 %v1145_v1, %v1144_v56  ;;  %v1234_v49 = vmul.f32 %v1233_v41, %v1230_v18 }
 0x249   : > { %1473 = vrot.lane.b32.xlu1 %v3369_v25, %s3982_s9  ;;  %1559 = vrot.lane.b32.xlu0 %v3338_v13, %s3963_s15 }
 0x24a   : > { %v1149_v44 = vadd.f32 %v1147_v48, %v1111_v30  ;;  %v1236_v1 = vadd.f32 %v1234_v49, %v1196_v9  ;;  %v3448_v9 = vld [vmem:[#allocation4 + $0x26] sm:$0xff]  ;;  %v1311_v49 = vstv %s3426_s14  ;;  %s4097_s14 = sld [smem:[#allocation25_spill]] }
 0x24b   : > { %v1154_v19 = vpop.permute.xlu1 %1153  ;;  %v1240_v23 = vpop.permute.xlu0 %1239 }
 0x24c   : > { %v1157_v54 = vmul.f32 %v1155_v26, %v1154_v19  ;;  %v1244_v37 = vmul.f32 %v1243_v52, %v1240_v23 }
 0x24d   : > { %1483 = vrot.lane.b32.xlu1 %v3369_v25, %s3992_s16  ;;  %1569 = vrot.lane.b32.xlu0 %v3338_v13, %s3972_s17 }
 0x24e   : > { %v3389_v63 = vadd.f32 %v1157_v54, %v1121_v51  ;;  %v1246_v62 = vadd.f32 %v1244_v37, %v1206_v29  ;;  %v1321_v54 = vstv %s3436_s29 }
 0x24f   : > { %v1164_v26 = vpop.permute.xlu1 %1163  ;;  %v1250_v61 = vpop.permute.xlu0 %1249 }
 0x250   : > { %v1167_v46 = vmul.f32 %v1165_v45, %v1164_v26  ;;  %v1254_v10 = vmul.f32 %v1253_v7, %v1250_v61  ;;  %s1744_s29 = sshll.u32 %s4097_s14, 4 }
 0x251   : > { %1493 = vrot.lane.b32.xlu1 %v3369_v25, %s3963_s15  ;;  %1579 = vrot.lane.b32.xlu0 %v3338_v13, %s3964_s19 }
 0x252   : > { %v1169_v4 = vadd.f32 %v1167_v46, %v1129_v11  ;;  %v1256_v28 = vadd.f32 %v1254_v10, %v1216_v55  ;;  %v1261_v55 = vstv %s3406_s4  ;;  %v1339_v10 = vstv %s3453_s1  ;;  %s3654_s4 = sld [smem:[#allocation10 + $0x61]]  ;;  %s4098_s1 = sld [smem:[#allocation18_spill]] }
 0x253   : > { %v1174_v6 = vpop.permute.xlu1 %1173  ;;  %v1268_v20 = vpop.permute.xlu0 %1267 }
 0x254   : > { %v1177_v45 = vmul.f32 %v1175_v14, %v1174_v6  ;;  %v1272_v40 = vmul.f32 %v1271_v24, %v1268_v20  ;;  %v1349_v20 = vstv %s3462_s21  ;;  %s217_s21 = scalar_lea.vmem [#allocation11], %s1744_s29 }
 0x255   : > { %1503 = vrot.lane.b32.xlu1 %v3369_v25, %s3972_s17  ;;  %1589 = vrot.lane.b32.xlu0 %v3338_v13, %s3973_s25 }
 0x256   : > { %v1179_v8 = vadd.f32 %v1177_v45, %v1139_v0  ;;  %v1274_v60 = vadd.f32 %v1272_v40, %v1236_v1  ;;  %v4096_v0 = vld [vmem:[#allocation43_spill] sm:$0xff] }
 0x257   : > { %v1184_v39 = vpop.permute.xlu1 %1183  ;;  %v1278_v30 = vpop.permute.xlu0 %1277  ;;  %v1262_v17 = vmul.f32 %v1261_v55, %v4096_v0 }
 0x258   : > { %v1187_v14 = vmul.f32 %v1185_v50, %v1184_v39  ;;  %v1282_v29 = vmul.f32 %v1281_v32, %v1278_v30 }
 0x259   : > { %1513 = vrot.lane.b32.xlu1 %v3369_v25, %s3964_s19  ;;  %v1264_v18 = vadd.f32 %v1262_v17, %v3359_v12 }
 0x25a   : > { %v1189_v59 = vadd.f32 %v1187_v14, %v1149_v44  ;;  %v1284_v31 = vadd.f32 %v1282_v29, %v1246_v62 }
 0x25b   : > { %v1202_v38 = vpop.permute.xlu1 %1201  ;;  %v1288_v51 = vpop.permute.xlu0 %1287 }
 0x25c   : > { %v1205_v58 = vmul.f32 %v1203_v57, %v1202_v38  ;;  %v1292_v50 = vmul.f32 %v1291_v47, %v1288_v51 }
 0x25d   : > { %1523 = vrot.lane.b32.xlu1 %v3369_v25, %s3973_s25 }
 0x25e   : > { %v1207_v33 = vadd.f32 %v1205_v58, %v1169_v4  ;;  %v3438_v35 = vadd.f32 %v1292_v50, %v1256_v28 }
 0x25f   : > { %v1212_v43 = vpop.permute.xlu1 %1211  ;;  %v1298_v56 = vpop.permute.xlu0 %1297 }
 0x260   : > { %v1215_v57 = vmul.f32 %v1213_v53, %v1212_v43  ;;  %v1302_v48 = vmul.f32 %v1301_v2, %v1298_v56 }
 0x261   : > { %1541 = vrot.lane.b32.xlu1 %v3448_v9, %s3982_s9  ;;  %s3476_s9 = sld [smem:[#allocation10 + $0x46]] }
 0x262   : > { %v1217_v44 = vadd.f32 %v1215_v57, %v1179_v8  ;;  %v1304_v1 = vadd.f32 %v1302_v48, %v1264_v18  ;;  %v1379_v18 = vstv %s3492_s20 }
 0x263   : > { %v1222_v19 = vpop.permute.xlu1 %1221  ;;  %v1308_v23 = vpop.permute.xlu0 %1307 }
 0x264   : > { %v1225_v53 = vmul.f32 %v1223_v21, %v1222_v19  ;;  %v1312_v12 = vmul.f32 %v1311_v49, %v1308_v23  ;;  %v1197_v21 = vadd.f32 %v1195_v22, %v3389_v63 }
 0x265   : > { %1551 = vrot.lane.b32.xlu1 %v3448_v9, %s3992_s16  ;;  %s3474_s16 = sld [smem:[#allocation10 + $0x49]] }
 0x266   : > { %v1227_v37 = vadd.f32 %v1225_v53, %v1189_v59  ;;  %v1314_v62 = vadd.f32 %v1312_v12, %v1274_v60 }
 0x267   : > { %v1232_v26 = vpop.permute.xlu1 %1231  ;;  %v1318_v61 = vpop.permute.xlu0 %1317  ;;  %v1329_v38 = vstv %s3476_s9  ;;  %s1882_s9 = sshll.u32 %s4098_s1, 8 }
 0x268   : > { %v1235_v11 = vmul.f32 %v1233_v41, %v1232_v26  ;;  %v1322_v46 = vmul.f32 %v1321_v54, %v1318_v61  ;;  %v1330_v0 = vmul.f32 %v1329_v38, %v2836_v34 }
 0x269   : > { %1561 = vrot.lane.b32.xlu1 %v3448_v9, %s3963_s15  ;;  %s3485_s15 = sld [smem:[#allocation10 + $0x4a]] }
 0x26a   : > { %v1237_v4 = vadd.f32 %v1235_v11, %v1197_v21  ;;  %v1324_v28 = vadd.f32 %v1322_v46, %v1284_v31  ;;  %v1332_v57 = vadd.f32 %v1330_v0, %v3438_v35 }
 0x26b   : > { %v1242_v16 = vpop.permute.xlu1 %1241  ;;  %v1336_v6 = vpop.permute.xlu0 %1335 }
 0x26c   : > { %v1245_v63 = vmul.f32 %v1243_v52, %v1242_v16  ;;  %v1340_v41 = vmul.f32 %v1339_v10, %v1336_v6  ;;  %v1359_v52 = vstv %s3474_s16  ;;  %s4099_s16 = sld [smem:[#allocation23_spill]] }
 0x26d   : > { %1571 = vrot.lane.b32.xlu1 %v3448_v9, %s3972_s17  ;;  %s3553_s17 = sld [smem:[#allocation10 + $0x4f]] }
 0x26e   : > { %v1247_v45 = vadd.f32 %v1245_v63, %v1207_v33  ;;  %v1342_v40 = vadd.f32 %v1340_v41, %v1304_v1 }
 0x26f   : > { %v1252_v8 = vpop.permute.xlu1 %1251  ;;  %v1346_v60 = vpop.permute.xlu0 %1345 }
 0x270   : > { %v1255_v39 = vmul.f32 %v1253_v7, %v1252_v8  ;;  %v1350_v30 = vmul.f32 %v1349_v20, %v1346_v60  ;;  %v1369_v7 = vstv %s3485_s15  ;;  %s1637_s15 = sshll.u32 %s217_s21, 4  ;;  %s3766_s15 = int_to_ptr.vmem [resolvable:$true] %s1637_s15 }
 0x271   : > { %1581 = vrot.lane.b32.xlu1 %v3448_v9, %s3964_s19  ;;  %s3555_s19 = sld [smem:[#allocation10 + $0x4e]] }
 0x272   : > { %v1257_v14 = vadd.f32 %v1255_v39, %v1217_v44  ;;  %v3494_v29 = vadd.f32 %v1350_v30, %v1314_v62  ;;  %p4102_p2 = scmp.ne.s32.totalorder %s4099_s16, 0 }
 0x273   : > { %v1270_v59 = vpop.permute.xlu1 %1269  ;;  %v1356_v31 = vpop.permute.xlu0 %1355 }
 0x274   : > { %v1273_v51 = vmul.f32 %v1271_v24, %v1270_v59  ;;  %v1360_v58 = vmul.f32 %v1359_v52, %v1356_v31 }
 0x275   : > { %1591 = vrot.lane.b32.xlu1 %v3448_v9, %s3973_s25  ;;  %s3557_s25 = sld [smem:[#allocation10 + $0x53]] }
 0x276   : > { %v1275_v50 = vadd.f32 %v1273_v51, %v1237_v4  ;;  %v3502_v33 = vadd.f32 %v1360_v58, %v1324_v28 }
 0x277   : > { %v1280_v17 = vpop.permute.xlu1 %1279  ;;  %v1366_v43 = vpop.permute.xlu0 %1365 }
 0x278   : > { %v1283_v56 = vmul.f32 %v1281_v32, %v1280_v17  ;;  %v1370_v24 = vmul.f32 %v1369_v7, %v1366_v43  ;;  %v1263_v32 = vmul.f32 %v1261_v55, %v2931_v42 }
 0x27a   : > { %v1285_v48 = vadd.f32 %v1283_v56, %v1247_v45  ;;  %v3509_v44 = vadd.f32 %v1370_v24, %v1332_v57  ;;  %v1265_v36 = vadd.f32 %v1263_v32, %v1227_v37  ;;  %v1417_v24 = vstv %s3553_s17 }
 0x27b   : > { %v1290_v1 = vpop.permute.xlu1 %1289  ;;  %v1376_v19 = vpop.permute.xlu0 %1375  ;;  %v1389_v32 = vstv %s3567_s2  ;;  %s2030_s2 = scalar_lea.vmem %s3766_s15, 256 }
 0x27c   : > { %v1293_v23 = vmul.f32 %v1291_v47, %v1290_v1  ;;  %v1380_v53 = vmul.f32 %v1379_v18, %v1376_v19  ;;  %p2031_p8 = scmp.ne.s32.totalorder %s3766_s15, %s2030_s2 }
 0x27e   : > { %v1295_v34 = vadd.f32 %v1293_v23, %v1257_v14  ;;  %v3513_v12 = vadd.f32 %v1380_v53, %v1342_v40  ;;  %v1447_v53 = vstv %s3563_s23  ;;  %p2032_p12 = pnand %p2031_p8, %p4102_p2 }
 0x27f   : > { %v1300_v35 = vpop.permute.xlu1 %1299  ;;  %v3518_v62 = vpop.permute.xlu0 %1385 }
 0x280   : > { %v1303_v22 = vmul.f32 %v1301_v2, %v1300_v35  ;;  %p2033_p5 = pneg %p2032_p12 }
 0x282   : > { %v1305_v26 = vadd.f32 %v1303_v22, %v1265_v36  ;;  %v1485_v22 = vstv %s3569_s28  ;;  %s2137_s28 = smov [#allocation11]  }
 0x283   : > { %v1310_v61 = vpop.permute.xlu1 %1309  ;;  %v3522_v21 = vpop.permute.xlu0 %1403 }
 0x284   : > { %v1313_v47 = vmul.f32 %v1311_v49, %v1310_v61 }
 0x286   : > { %v1315_v11 = vadd.f32 %v1313_v47, %v1275_v50 }
 0x287   : > { %v1320_v46 = vpop.permute.xlu1 %1319  ;;  %v1414_v4 = vpop.permute.xlu0 %1413 }
 0x288   : > { %v1323_v28 = vmul.f32 %v1321_v54, %v1320_v46  ;;  %v1331_v54 = vmul.f32 %v1329_v38, %v3099_v27  ;;  %v1418_v23 = vmul.f32 %v1417_v24, %v1414_v4  ;;  %v1390_v4 = vmul.f32 %v1389_v32, %v3518_v62 }
 0x28a   : > { %v1325_v16 = vadd.f32 %v1323_v28, %v1285_v48  ;;  %v1333_v14 = vadd.f32 %v1331_v54, %v1295_v34  ;;  %v1457_v48 = vstv %s3557_s25  ;;  %v1495_v34 = vstv %s3565_s5  ;;  %s1624_s5 = scalar_lea.sflag [#allocation8], %s4097_s14 }
 0x28b   : > { %v1338_v42 = vpop.permute.xlu1 %1337  ;;  %v3528_v55 = vpop.permute.xlu0 %1423  ;;  %v1420_v47 = vadd.f32 %v1418_v23, %v3513_v12  ;;  %v1397_v28 = vstv %s3576_s7 }
 0x28c   : > { %v1341_v6 = vmul.f32 %v1339_v10, %v1338_v42  ;;  %v1437_v42 = vstv %s3580_s6 }
 0x28e   : > { %v1343_v37 = vadd.f32 %v1341_v6, %v1305_v26 }
 0x28f   : > { %v1348_v63 = vpop.permute.xlu1 %1347  ;;  %v3532_v2 = vpop.permute.xlu0 %1433 }
 0x290   : > { %v1351_v41 = vmul.f32 %v1349_v20, %v1348_v63 }
 0x292   : > { %v3534_v45 = vadd.f32 %v1351_v41, %v1315_v11  ;;  %v1427_v11 = vstv %s3573_s18  ;;  %v1563_v41 = vstv %s3588_s26  ;;  %s2034_s18 = sshll.u32 %s2137_s28, 4  ;;  %s2035_s18 = int_to_ptr.vmem [resolvable:$false] %s2034_s18 }
 0x293   : > { %v1358_v40 = vpop.permute.xlu1 %1357  ;;  %v1444_v49 = vpop.permute.xlu0 %1443  ;;  %v1428_v63 = vmul.f32 %v1427_v11, %v3528_v55  ;;  %v1392_v55 = vadd.f32 %v1390_v4, %v3494_v29  ;;  %s2036_s7 = scalar_lea.vmem %s2035_s18, 512  ;;  %p2037_p4 = scmp.lt.s32.totalorder %s3766_s15, %s2035_s18 }
 0x294   : > { %v1361_v8 = vmul.f32 %v1359_v52, %v1358_v40  ;;  %p2038_p9 = scmp.lt.s32.totalorder %s2036_s7, %s2030_s2 }
 0x295   : > { %v1430_v29 = vadd.f32 %v1428_v63, %v1392_v55 }
 0x296   : > { %v3536_v60 = vadd.f32 %v1361_v8, %v1325_v16  ;;  %v1525_v16 = vstv %s3578_s0  ;;  %p2039_p13 = por %p2038_p9, %p2037_p4 }
 0x297   : > { %v1368_v39 = vpop.permute.xlu1 %1367  ;;  %v1454_v30 = vpop.permute.xlu0 %1453 }
 0x298   : > { %v1371_v59 = vmul.f32 %v1369_v7, %v1368_v39  ;;  %v1458_v36 = vmul.f32 %v1457_v48, %v1454_v30  ;;  %v1438_v30 = vmul.f32 %v1437_v42, %v3532_v2  ;;  %p2040_p11 = pnand %p2039_p13, %p2033_p5 }
 0x29a   : > { %v3539_v31 = vadd.f32 %v1371_v59, %v1333_v14  ;;  %v1460_v6 = vadd.f32 %v1458_v36, %v1420_v47  ;;  %v1475_v14 = vstv %s3595_s3  ;;  %v1573_v59 = vstv %s3598_s13 }
 0x29b   : > { %v1378_v10 = vpop.permute.xlu1 %1377  ;;  %v3541_v51 = vpop.permute.xlu0 %1471 }
 0x29c   : > { %v1381_v58 = vmul.f32 %v1379_v18, %v1378_v10  ;;  %v1407_v18 = vstv %s3555_s19  ;;  %v1476_v36 = vmul.f32 %v1475_v14, %v3541_v51  ;;  %s4100_s19 = sld [smem:[#allocation83_spill]] }
 0x29d   : > { %v1408_v35 = vmul.f32 %v1407_v18, %v3522_v21  ;;  %v1448_v21 = vmul.f32 %v1447_v53, %v1444_v49  ;;  %v1533_v49 = vstv %s3590_s24 }
 0x29e   : > { %v3543_v20 = vadd.f32 %v1381_v58, %v1343_v37 }
 0x29f   : > { %v3545_v50 = vpop.permute.xlu1 %1387  ;;  %v1482_v0 = vpop.permute.xlu0 %1481  ;;  %v1410_v12 = vadd.f32 %v1408_v35, %v3509_v44  ;;  %v1398_v44 = vmul.f32 %v1397_v28, %v3051_v3  ;;  %v1465_v3 = vstv %s3606_s12 }
 0x2a0   : > { %v1486_v37 = vmul.f32 %v1485_v22, %v1482_v0  ;;  %v1534_v0 = vmul.f32 %v1533_v49, %v3338_v13  ;;  %v1466_v13 = vmul.f32 %v1465_v3, %v3226_v5 }
 0x2a1   : > { %v1450_v8 = vadd.f32 %v1448_v21, %v1410_v12  ;;  %v1400_v2 = vadd.f32 %v1398_v44, %v3502_v33  ;;  %v1543_v33 = vstv %s3626_s27  ;;  %v1553_v12 = vstv %s3628_s22 }
 0x2a2   : > { %s4101_s25 = smov %s4100_s19  ;;  %s3764_s23 = scalar_lea.hbm %s4100_s19, %s1882_s9 }
 0x2a3   : > { %v3547_v52 = vpop.permute.xlu1 %1405  ;;  %v1492_v17 = vpop.permute.xlu0 %1491  ;;  %v1488_v10 = vadd.f32 %v1486_v37, %v1450_v8  ;;  %v1440_v4 = vadd.f32 %v1438_v30, %v1400_v2  ;;  %v1583_v8 = vstv %s3641_s8 }
 0x2a4   : > { %v1496_v46 = vmul.f32 %v1495_v34, %v1492_v17  ;;  %v1505_v17 = vstv %s3609_s11 }
 0x2a6   : > { %v1498_v54 = vadd.f32 %v1496_v46, %v1460_v6 }
 0x2a7   : > { %v3549_v43 = vpop.permute.xlu1 %1415  ;;  %v3551_v27 = vpop.permute.xlu0 %1501 }
 0x2a8   : > { %v1536_v21 = vadd.f32 %v1534_v0, %v1498_v54  ;;  %v1506_v6 = vmul.f32 %v1505_v17, %v3551_v27 }
 0x2ab   : > { %v3559_v38 = vpop.permute.xlu1 %1425  ;;  %v3561_v7 = vpop.permute.xlu0 %1511 }
 0x2af   : > { %v3571_v56 = vpop.permute.xlu1 %1435  ;;  %v1522_v57 = vpop.permute.xlu0 %1521 }
 0x2b0   : > { %v1526_v39 = vmul.f32 %v1525_v16, %v1522_v57  ;;  %v1515_v57 = vstv %s3611_s30 }
 0x2b1   : > { %v1516_v51 = vmul.f32 %v1515_v57, %v3561_v7 }
 0x2b2   : > { %v1528_v47 = vadd.f32 %v1526_v39, %v1488_v10  ;;  %v1478_v39 = vadd.f32 %v1476_v36, %v1440_v4  ;;  %v1593_v10 = vstv %s3654_s4 }
 0x2b3   : > { %v3584_v1 = vpop.permute.xlu1 %1445  ;;  %v3586_v19 = vpop.permute.xlu0 %1539 }
 0x2b4   : > { %v1544_v5 = vmul.f32 %v1543_v33, %v3586_v19  ;;  %v1518_v7 = vadd.f32 %v1516_v51, %v1478_v39 }
 0x2b7   : > { %v3613_v26 = vpop.permute.xlu1 %1455  ;;  %v1550_v61 = vpop.permute.xlu0 %1549 }
 0x2b8   : > { %v1554_v55 = vmul.f32 %v1553_v12, %v1550_v61 }
 0x2bb   : > { %v3637_v62 = vpop.permute.xlu1 %1473  ;;  %v1560_v40 = vpop.permute.xlu0 %1559 }
 0x2bc   : > { %v1564_v58 = vmul.f32 %v1563_v41, %v1560_v40  ;;  %v1468_v40 = vadd.f32 %v1466_v13, %v1430_v29 }
 0x2be   : > { %v1566_v37 = vadd.f32 %v1564_v58, %v1528_v47  ;;  %v1508_v27 = vadd.f32 %v1506_v6, %v1468_v40  ;;  %v1409_v40 = vmul.f32 %v1407_v18, %v3547_v52 }
 0x2bf   : > { %v1484_v23 = vpop.permute.xlu1 %1483  ;;  %v1570_v35 = vpop.permute.xlu0 %1569 }
 0x2c0   : > { %v1574_v46 = vmul.f32 %v1573_v59, %v1570_v35  ;;  %v1546_v2 = vadd.f32 %v1544_v5, %v1508_v27  ;;  %v1556_v35 = vadd.f32 %v1554_v55, %v1518_v7  ;;  %v1449_v55 = vmul.f32 %v1447_v53, %v3584_v1 }
 0x2c1   : > { %v1411_v52 = vadd.f32 %v1409_v40, %v3539_v31  ;;  %v1487_v18 = vmul.f32 %v1485_v22, %v1484_v23  ;;  %v1439_v31 = vmul.f32 %v1437_v42, %v3571_v56  ;;  %v1535_v22 = vmul.f32 %v1533_v49, %v3448_v9 }
 0x2c2   : > { %v1576_v63 = vadd.f32 %v1574_v46, %v1536_v21  ;;  %v1605_v46 = vstv %s3688_s10  ;;  %v1467_v9 = vmul.f32 %v1465_v3, %v3369_v25 }
 0x2c3   : > { %v1494_v44 = vpop.permute.xlu1 %1493  ;;  %v1580_v54 = vpop.permute.xlu0 %1579 }
 0x2c4   : > { %v1600_v30 = vadd.f32 %v1576_v63, %v1566_v37  ;;  %v1584_v58 = vmul.f32 %v1583_v8, %v1580_v54  ;;  %v1419_v63 = vmul.f32 %v1417_v24, %v3549_v43  ;;  %v1459_v54 = vmul.f32 %v1457_v48, %v3613_v26 }
 0x2c5   : > { %v1391_v43 = vmul.f32 %v1389_v32, %v3545_v50  ;;  %v1429_v48 = vmul.f32 %v1427_v11, %v3559_v38  ;;  %v1451_v26 = vadd.f32 %v1449_v55, %v1411_v52  ;;  %v1399_v50 = vmul.f32 %v1397_v28, %v3283_v15 }
 0x2c6   : > { %v1586_v61 = vadd.f32 %v1584_v58, %v1546_v2  ;;  %v1421_v5 = vadd.f32 %v1419_v63, %v3543_v20  ;;  %v1477_v15 = vmul.f32 %v1475_v14, %v3637_v62 }
 0x2c7   : > { %v1504_v0 = vpop.permute.xlu1 %1503  ;;  %v1590_v29 = vpop.permute.xlu0 %1589  ;;  %v1393_v53 = vadd.f32 %v1391_v43, %v3534_v45  ;;  %v1489_v38 = vadd.f32 %v1487_v18, %v1451_v26 }
 0x2c8   : > { %v1594_v19 = vmul.f32 %v1593_v10, %v1590_v29  ;;  %v1461_v24 = vadd.f32 %v1459_v54, %v1421_v5 }
 0x2c9   : > { %v1431_v11 = vadd.f32 %v1429_v48, %v1393_v53 }
 0x2ca   : > { %v1596_v36 = vadd.f32 %v1594_v19, %v1556_v35 }
 0x2cb   : > { %v1514_v47 = vpop.permute.xlu1 %1513  ;;  %v1469_v58 = vadd.f32 %v1467_v9, %v1431_v11 }
 0x2cc   : > { %v1598_v21 = vadd.f32 %v1596_v36, %v1586_v61 }
 0x2ce   : > { %v1602_v4 = vadd.f32 %v1600_v30, %v1598_v21  ;;  %v1497_v30 = vmul.f32 %v1495_v34, %v1494_v44 }
 0x2cf   : > { %v1524_v13 = vpop.permute.xlu1 %1523 }
 0x2d0   : > { %v1606_v6 = vadd.f32 %v1605_v46, %v1602_v4  ;;  %v1499_v27 = vadd.f32 %v1497_v30, %v1461_v24  ;;  %v1527_v1 = vmul.f32 %v1525_v16, %v1524_v13  ;;  %v1401_v16 = vadd.f32 %v1399_v50, %v3536_v60 }
 0x2d1   : > { %v1507_v60 = vmul.f32 %v1505_v17, %v1504_v0 }
 0x2d2   : > { %v1874_v51 = vmul.f32 -1.442695, %v1606_v6  ;;  %v1529_v56 = vadd.f32 %v1527_v1, %v1489_v38  ;;  %v1537_v28 = vadd.f32 %v1535_v22, %v1499_v27  ;;  %v1441_v44 = vadd.f32 %v1439_v31, %v1401_v16 }
 0x2d3   : > { %v1542_v37 = vpop.permute.xlu1 %1541  ;;  %v1509_v35 = vadd.f32 %v1507_v60, %v1469_v58 }
 0x2d4   : > { %1976 = vpow2.f32 %v1874_v51  ;;  %v1479_v14 = vadd.f32 %v1477_v15, %v1441_v44  ;;  %v1545_v29 = vmul.f32 %v1543_v33, %v1542_v37 }
 0x2d6   : > { %v1547_v17 = vadd.f32 %v1545_v29, %v1509_v35 }
 0x2d7   : > { %v1552_v39 = vpop.permute.xlu1 %1551 }
 0x2db   : > { %v1562_v20 = vpop.permute.xlu1 %1561 }
 0x2dc   : > { %v1565_v32 = vmul.f32 %v1563_v41, %v1562_v20  ;;  %v1517_v41 = vmul.f32 %v1515_v57, %v1514_v47 }
 0x2de   : > { %v1977_v34 = vpop.eup %1976  ;;  %v1567_v49 = vadd.f32 %v1565_v32, %v1529_v56  ;;  %v1519_v19 = vadd.f32 %v1517_v41, %v1479_v14 }
 0x2df   : > { %v1614_v45 = vadd.f32 1.0, %v1977_v34  ;;  %v1572_v23 = vpop.permute.xlu1 %1571 }
 0x2e0   : > { %v1575_v42 = vmul.f32 %v1573_v59, %v1572_v23  ;;  %v1555_v59 = vmul.f32 %v1553_v12, %v1552_v39 }
 0x2e1   : > { %1978 = vrcp.f32 %v1614_v45 }
 0x2e2   : > { %v1577_v7 = vadd.f32 %v1575_v42, %v1537_v28  ;;  %v1557_v57 = vadd.f32 %v1555_v59, %v1519_v19 }
 0x2e3   : > { %v1582_v62 = vpop.permute.xlu1 %1581 }
 0x2e4   : > { %v1601_v2 = vadd.f32 %v1577_v7, %v1567_v49  ;;  %v1585_v25 = vmul.f32 %v1583_v8, %v1582_v62 }
 0x2e6   : > { %v1587_v61 = vadd.f32 %v1585_v25, %v1547_v17 }
 0x2e7   : > { %v1592_v3 = vpop.permute.xlu1 %1591 }
 0x2e8   : > { %v1595_v0 = vmul.f32 %v1593_v10, %v1592_v3 }
 0x2ea   : > { %v1597_v36 = vadd.f32 %v1595_v0, %v1557_v57 }
 0x2eb   : > { %v1979_v47 = vpop.eup %1978 }
 0x2ec   : > { %v1599_v33 = vadd.f32 %v1597_v36, %v1587_v61  ;;  %1621 = vst.msk [vmem:[%s217_s21] sm:$0xff] %vm1620_vm5, %v1979_v47 }
 0x2ee   : > { %v1603_v12 = vadd.f32 %v1601_v2, %v1599_v33 }
 0x2f0   : > { %v1607_v8 = vadd.f32 %v1605_v46, %v1603_v12 }
 0x2f2   : > { %v1875_v21 = vmul.f32 -1.442695, %v1607_v8 }
 0x2f4   : > { %1980 = vpow2.f32 %v1875_v21 }
 0x2fe   : > { %v1981_v4 = vpop.eup %1980 }
 0x2ff   : > { %v1615_v13 = vadd.f32 1.0, %v1981_v4 }
 0x301   : > { %1982 = vrcp.f32 %v1615_v13 }
 0x30b   : > { %v1983_v10 = vpop.eup %1982 }
 0x30c   : > { %1622 = vst.msk [vmem:[%s217_s21 + $0x8] sm:$0xff] %vm1620_vm5, %v1983_v10 }
 0x30d   : > { %2043 = shalt.err (!%p2040_p11)
}
 0x30e   : > { %s2044_s0 = scalar_lea.hbm %s3764_s23, 256  ;;  %s2048_s24 = scalar_lea.hbm %s4101_s25, 512 }
 0x30f   : > { %p2045_p3 = scmp.ne.s32.totalorder %s3764_s23, %s2044_s0  ;;  %p2049_p6 = scmp.lt.u32.totalorder %s3764_s23, %s4101_s25 }
 0x310   : > { %p2050_p1 = scmp.lt.u32.totalorder %s2048_s24, %s2044_s0  ;;  %p2052_p8 = scmp.lt.u32.totalorder %s2044_s0, %s3764_s23 }
 0x311   : > { %p2046_p7 = pnand %p2045_p3, %p4102_p2 }
 0x312   : > { %p2051_p0 = por %p2050_p1, %p2049_p6 }
 0x313   : > { %p2047_p10 = pneg %p2046_p7 }
 0x314   : > { %p2053_p12 = por %p2052_p8, %p2051_p0 }
 0x316   : > { %p2054_p5 = pnand %p2053_p12, %p2047_p10 }
 0x318   : > { %2057 = shalt.err (!%p2054_p5)
}
 0x319   : > { %s2138_s12 = smov 128   ;;  %s2139_s11 = smov 8  }
 0x31a   : > { %1889 = dma.vmem_to_hbm [thread:$0]  (%p4102_p2), %s3766_s15, 256, %s3764_s23, %s1624_s5, %s2138_s12, %s2138_s12, %s2139_s11  }
 0x31b PF: > { %s4103_s30 = sld [smem:[#allocation15_spill]]  ;;  %s4104_s27 = sld [smem:[#allocation21_spill]] }
 0x31c   : > { %s4105_s22 = sld [smem:[#allocation20_spill]] }
 0x321   : > { %s1652_s8 = sand.u32 1, %s4103_s30   ;;  %p4106_p4 = scmp.ne.s32.totalorder %s4104_s27, 0 }
 0x322   : > { %p4107_p9 = scmp.ge.s32.totalorder %s4105_s22, 2  ;;  %s1653_s4 = scalar_lea.sflag [#allocation8], %s1652_s8 }
 0x324   : > { %p1900_p13 = pnand %p4107_p9, %p4106_p4 }
 0x326   : > { %2091 = dma.done.wait (!%p1900_p13), %s1653_s4, 256  }
 0x327   : > { %2093 = vsyncadd (!%p1900_p13), %s1653_s4, 4294967040  ;;  %s21_s19 = sadd.s32 1, %s4105_s22   ;;  %s4108_s14 = sld [smem:[#allocation16_spill]] }
 0x328   : > { %p18_p11 = scmp.ge.s32.totalorder %s21_s19, 4   ;;  %s4109_s15 = sld [smem:[#allocation17_spill]] }
 0x329   : > { %s4110_s16 = sld [smem:[#allocation24_spill]]  ;;  %s4111_s17 = sld [smem:[#allocation19_spill]] }
 0x32a   : > { %s4112_s18 = sld [smem:[#allocation22_spill]]  ;;  %20 = sbr.rel (!%p18_p11) target bundleno = 12 (0xc), region = 91 }
 0x331   :  { %1658 = vsyncpa [#allocation7], 1 }
 0x332   :  { %1660 = vsyncpa [#allocation7 + $0x1], 1 }
 0x333   :  { %1661 = vsyncpa [#allocation8], 1 }
 0x334   :  { %1663 = vsyncpa [#allocation8 + $0x1], 1 }
 0x335   :  { %1664 = vsyncpa [#allocation9], 1 }
 0x336   :  { %1666 = vsyncpa [#allocation9 + $0x1], 1 }

</bundles_post_ra>
